<compile_context>
chip_gen: v7x
topology: tpu7x:2x2x1
jax: 0.10.0
libtpu: 0.0.40
codegen_flags: <defaults>
</compile_context>

<pallas_src>
import functools

import jax
import jax.numpy as jnp
from jax.experimental import pallas as pl
from jax.experimental.pallas import tpu as pltpu


# ---------------------------------------------------------------------------
# Kernels
# ---------------------------------------------------------------------------
def _conv_accumulate(x_ref, w_ref, *, k, s, Ho):
    """Accumulate the conv as k row-tap MXU matmuls (f32 accumulator).

    x_ref block: (1, s, Hs, s*Ws*Cin)   bf16 (phase-decomposed, row-flattened)
    w_ref block: (k, s*Ws*Cin, Wo*Cout) bf16 (banded / Toeplitz-expanded weights)
    returns    : (Ho, Wo*Cout) f32
    """
    n_lanes = w_ref.shape[-1]
    acc = jnp.zeros((Ho, n_lanes), jnp.float32)
    for ky in range(k):                      # short static loop (k <= 7), unrolled
        py, oy = ky % s, ky // s
        lhs = x_ref[0, py, pl.ds(oy, Ho), :]          # (Ho, s*Ws*Cin)
        acc = acc + jnp.dot(lhs, w_ref[ky],
                            preferred_element_type=jnp.float32)
    return acc


def _conv_gn_relu_kernel(x_ref, w_ref, m2_ref, m2t_ref, gamma_ref, beta_ref,
                         o_ref, *, k, s, Ho, n_per_group, eps):
    acc = _conv_accumulate(x_ref, w_ref, k=k, s=s, Ho=Ho)      # (Ho, Wo*Cout) f32
    # GroupNorm statistics: sublane reduction + tiny lane->group membership
    # matmuls (avoids lane-splitting reshapes inside the kernel).
    s1 = jnp.sum(acc, axis=0, keepdims=True)                   # (1, Wo*Cout)
    s2 = jnp.sum(acc * acc, axis=0, keepdims=True)
    gsum = jnp.dot(s1, m2_ref[...], preferred_element_type=jnp.float32)  # (1, G)
    gsq = jnp.dot(s2, m2_ref[...], preferred_element_type=jnp.float32)   # (1, G)
    mean = gsum / n_per_group
    var = gsq / n_per_group - mean * mean                      # biased (PyTorch GN)
    inv = jax.lax.rsqrt(var + eps)
    mean_l = jnp.dot(mean, m2t_ref[...], preferred_element_type=jnp.float32)
    inv_l = jnp.dot(inv, m2t_ref[...], preferred_element_type=jnp.float32)
    y = (acc - mean_l) * (inv_l * gamma_ref[...]) + beta_ref[...]
    y = jnp.maximum(y, 0.0)
    o_ref[...] = y[None].astype(o_ref.dtype)


def _conv_kernel(x_ref, w_ref, o_ref, *, k, s, Ho):
    acc = _conv_accumulate(x_ref, w_ref, k=k, s=s, Ho=Ho)
    o_ref[...] = acc[None].astype(o_ref.dtype)


# ---------------------------------------------------------------------------
# Fused layer wrapper (Conv2d [+ GroupNorm + ReLU]) — one pallas_call per layer
# ---------------------------------------------------------------------------
def fused_conv2d(x_nhwc, w_oihw, *, stride, padding, gn=None, eps=1e-5,
                 out_dtype=jnp.float32):
    """Conv2d(bias=False) [+ GroupNorm(G) + ReLU] as a single Pallas kernel.

    x_nhwc: (B, H, W, Cin)   w_oihw: (Cout, Cin, k, k)
    gn    : None or (gamma, beta, num_groups)
    Returns (B, Ho, Wo, Cout) in out_dtype.
    """
    B, H, W, Cin = x_nhwc.shape
    Cout, Cin2, kh, kw = w_oihw.shape
    assert Cin == Cin2 and kh == kw
    k, s, p = kh, stride, padding
    Ho = (H + 2 * p - k) // s + 1
    Wo = (W + 2 * p - k) // s + 1
    n_off = (k - 1) // s + 1                     # tap offsets per stride phase
    Hs, Ws = Ho + n_off - 1, Wo + n_off - 1
    Hp, Wp = s * Hs, s * Ws
    assert Hp >= H + p and Wp >= W + p
    K2 = s * Ws * Cin                            # matmul K per row-tap
    NL = Wo * Cout                               # output lane width (mult. of 128 here)

    # --- phase decomposition (space-to-depth over the stride) + row flatten ---
    xp = jnp.pad(x_nhwc, ((0, 0), (p, Hp - H - p), (p, Wp - W - p), (0, 0)))
    xr = xp.reshape(B, Hs, s, Ws, s, Cin).transpose(0, 2, 1, 4, 3, 5)
    xr = xr.reshape(B, s, Hs, K2).astype(jnp.bfloat16)

    # --- banded (Toeplitz-expanded) weights: one (K2, Wo*Cout) slab per ky ----
    # (In a real model these would be precomputed once per weight, not per call.)
    w_pad = jnp.pad(w_oihw, ((0, 0), (0, 0), (0, 0), (0, s * n_off - k)))
    w_r = w_pad.reshape(Cout, Cin, k, n_off, s).transpose(2, 4, 3, 1, 0)  # (k,s,n_off,Cin,Cout)
    tpl = (jnp.arange(Ws)[None, :, None]
           == jnp.arange(Wo)[None, None, :] + jnp.arange(n_off)[:, None, None])
    tpl = tpl.astype(w_oihw.dtype)                                        # (n_off, Ws, Wo)
    w2 = jnp.einsum("owx,kpoic->kpwixc", tpl, w_r)
    w2 = w2.reshape(k, K2, NL).astype(jnp.bfloat16)

    out_shape = jax.ShapeDtypeStruct((B, Ho, NL), out_dtype)
    x_spec = pl.BlockSpec((1, s, Hs, K2), lambda b: (b, 0, 0, 0))
    w_spec = pl.BlockSpec((k, K2, NL), lambda b: (0, 0, 0))
    o_spec = pl.BlockSpec((1, Ho, NL), lambda b: (b, 0, 0))
    cparams = pltpu.CompilerParams(dimension_semantics=("parallel",),
                                   vmem_limit_bytes=32 * 1024 * 1024)

    if gn is None:
        kern = functools.partial(_conv_kernel, k=k, s=s, Ho=Ho)
        out = pl.pallas_call(
            kern, out_shape=out_shape, grid=(B,),
            in_specs=[x_spec, w_spec], out_specs=o_spec,
            compiler_params=cparams,
        )(xr, w2)
    else:
        gamma, beta, G = gn
        assert Cout % G == 0
        Cg = Cout // G
        gid = jnp.arange(Cout) // Cg                       # group id per channel
        lane_gid = jnp.tile(gid, Wo)                       # lane index = x*Cout + co
        m2 = (lane_gid[:, None] == jnp.arange(G)[None, :]).astype(jnp.float32)  # (NL, G)
        m2t = m2.T                                                              # (G, NL)
        gamma_l = jnp.tile(gamma.astype(jnp.float32), Wo)[None, :]              # (1, NL)
        beta_l = jnp.tile(beta.astype(jnp.float32), Wo)[None, :]                # (1, NL)
        kern = functools.partial(_conv_gn_relu_kernel, k=k, s=s, Ho=Ho,
                                 n_per_group=float(Ho * Wo * Cg), eps=eps)
        out = pl.pallas_call(
            kern, out_shape=out_shape, grid=(B,),
            in_specs=[x_spec, w_spec,
                      pl.BlockSpec((NL, G), lambda b: (0, 0)),
                      pl.BlockSpec((G, NL), lambda b: (0, 0)),
                      pl.BlockSpec((1, NL), lambda b: (0, 0)),
                      pl.BlockSpec((1, NL), lambda b: (0, 0))],
            out_specs=o_spec, compiler_params=cparams,
        )(xr, w2, m2, m2t, gamma_l, beta_l)
    return out.reshape(B, Ho, Wo, Cout)


# ---------------------------------------------------------------------------
# FullConvPatchEmbedding forward (Pallas)
# ---------------------------------------------------------------------------
def full_conv_patch_embedding_forward(x_nchw, params, num_groups=8, eps=1e-5):
    x = jnp.transpose(x_nchw, (0, 2, 3, 1))          # NCHW -> NHWC once at entry
    for i in range(len(params["conv_w"])):
        stride, pad = (2, 3) if i == 0 else (2, 1)   # stem: k=7,s=2,p=3; hidden: 3,2,1
        x = fused_conv2d(x, params["conv_w"][i], stride=stride, padding=pad,
                         gn=(params["gn_gamma"][i], params["gn_beta"][i], num_groups),
                         eps=eps, out_dtype=jnp.bfloat16)
    pe = params["to_embed_w"].shape[-1]              # non-overlapping patch projection
    x = fused_conv2d(x, params["to_embed_w"], stride=pe, padding=0,
                     gn=None, out_dtype=jnp.float32)
    return jnp.transpose(x, (0, 3, 1, 2))            # NHWC -> NCHW at the boundary


# ---------------------------------------------------------------------------
# Pure-JAX f32 reference (for correctness check)
# ---------------------------------------------------------------------------
def _ref_conv(x, w, stride, pad):
    return jax.lax.conv_general_dilated(
        x, w, (stride, stride), ((pad, pad), (pad, pad)),
        dimension_numbers=("NCHW", "OIHW", "NCHW"),
        precision=jax.lax.Precision.HIGHEST,
    )


def _ref_gn_relu(x, gamma, beta, G, eps=1e-5):
    B, C, H, W = x.shape
    xr = x.reshape(B, G, -1)
    mean = xr.mean(-1, keepdims=True)
    var = ((xr - mean) ** 2).mean(-1, keepdims=True)
    xn = ((xr - mean) * jax.lax.rsqrt(var + eps)).reshape(B, C, H, W)
    y = xn * gamma[None, :, None, None] + beta[None, :, None, None]
    return jnp.maximum(y, 0.0)


def reference_forward(x, params, num_groups=8):
    x = _ref_conv(x, params["conv_w"][0], 2, 3)
    x = _ref_gn_relu(x, params["gn_gamma"][0], params["gn_beta"][0], num_groups)
    for i in range(1, len(params["conv_w"])):
        x = _ref_conv(x, params["conv_w"][i], 2, 1)
        x = _ref_gn_relu(x, params["gn_gamma"][i], params["gn_beta"][i], num_groups)
    pe = params["to_embed_w"].shape[-1]
    return _ref_conv(x, params["to_embed_w"], pe, 0)


# ---------------------------------------------------------------------------
# Parameter init (deterministic, synthetic)
# ---------------------------------------------------------------------------
def init_params(key, in_chans, hidden_channels, embed_dim, patch_size):
    conv_w, gn_gamma, gn_beta = [], [], []
    chans = [in_chans] + list(hidden_channels)
    ksizes = [7] + [3] * (len(hidden_channels) - 1)
    for i, k in enumerate(ksizes):
        key, k1, k2, k3 = jax.random.split(key, 4)
        fan_in = chans[i] * k * k
        conv_w.append(
            jax.random.normal(k1, (chans[i + 1], chans[i], k, k), jnp.float32)
            / jnp.sqrt(fan_in)
        )
        gn_gamma.append(1.0 + 0.1 * jax.random.normal(k2, (chans[i + 1],), jnp.float32))
        gn_beta.append(0.1 * jax.random.normal(k3, (chans[i + 1],), jnp.float32))
    cur_stride = 2 ** len(hidden_channels)
    p_embed = patch_size // cur_stride
    key, k1 = jax.random.split(key)
    to_embed_w = jax.random.normal(
        k1, (embed_dim, hidden_channels[-1], p_embed, p_embed), jnp.float32
    ) / jnp.sqrt(hidden_channels[-1] * p_embed * p_embed)
    return {
        "conv_w": conv_w,
        "gn_gamma": gn_gamma,
        "gn_beta": gn_beta,
        "to_embed_w": to_embed_w,
    }


if __name__ == "__main__":
    # Small config consistent with the module: img=32, patch=16, in_chans=3,
    # hidden_channels=[16, 32, 64] (divisible by 8 groups), embed_dim=64.
    B, in_chans, img_size, patch_size = 2, 3, 32, 16
    hidden_channels = [16, 32, 64]
    embed_dim = 64

    key = jax.random.PRNGKey(0)
    key, kx = jax.random.split(key)
    x = jax.random.normal(kx, (B, in_chans, img_size, img_size), jnp.float32)
    params = init_params(key, in_chans, hidden_channels, embed_dim, patch_size)

    fwd = jax.jit(full_conv_patch_embedding_forward)
    out = jax.block_until_ready(fwd(x, params))

    # shape check: (B, embed_dim, img/patch, img/patch)
    assert out.shape == (B, embed_dim, img_size // patch_size, img_size // patch_size), out.shape

    # Numerical check vs. f32 reference.  Kernel uses bf16 MXU operands and bf16
    # intermediate activations (f32 accumulation / GN math), so tolerances are
    # loosened accordingly.
    ref = jax.block_until_ready(reference_forward(x, params))
    max_err = float(jnp.max(jnp.abs(out - ref)))
    mean_err = float(jnp.mean(jnp.abs(out - ref)))
    assert jnp.allclose(out, ref, atol=1e-1, rtol=1e-1), (max_err, mean_err)
    assert mean_err < 3e-2, (max_err, mean_err)

    print("KERNEL_OK")
</pallas_src>

<mosaic_0001>
module attributes {stable_mosaic.version = 11 : i64} {
  func.func @_conv_gn_relu_kernel(%arg0: i32, %arg1: memref<1x2x19x114xbf16, #tpu.memory_space<vmem>>, %arg2: memref<7x114x256xbf16, #tpu.memory_space<vmem>>, %arg3: memref<256x8xf32, #tpu.memory_space<vmem>>, %arg4: memref<8x256xf32, #tpu.memory_space<vmem>>, %arg5: memref<1x256xf32, #tpu.memory_space<vmem>>, %arg6: memref<1x256xf32, #tpu.memory_space<vmem>>, %arg7: memref<1x16x256xbf16, #tpu.memory_space<vmem>>) attributes {dimension_semantics = [#tpu.dimension_semantics<parallel>], iteration_bounds = array<i64: 2>, scalar_prefetch = 0 : i64, scratch_operands = 0 : i64, tpu.core_type = #tpu.core_type<tc>, window_params = [{transform_indices = @transform_0, window_bounds = array<i64: 1, 2, 19, 114>}, {pipeline_mode = #tpu.pipeline_mode<synchronous>, transform_indices = @transform_1, window_bounds = array<i64: 7, 114, 256>}, {pipeline_mode = #tpu.pipeline_mode<synchronous>, transform_indices = @transform_2, window_bounds = array<i64: 256, 8>}, {pipeline_mode = #tpu.pipeline_mode<synchronous>, transform_indices = @transform_3, window_bounds = array<i64: 8, 256>}, {pipeline_mode = #tpu.pipeline_mode<synchronous>, transform_indices = @transform_4, window_bounds = array<i64: 1, 256>}, {pipeline_mode = #tpu.pipeline_mode<synchronous>, transform_indices = @transform_5, window_bounds = array<i64: 1, 256>}, {transform_indices = @transform_6, window_bounds = array<i64: 1, 16, 256>}]} {
    %cst = arith.constant 0.000000e+00 : f32
    %0 = vector.broadcast %cst : f32 to vector<16x256xf32>
    %c0 = arith.constant 0 : index
    %c0_0 = arith.constant 0 : index
    %c0_1 = arith.constant 0 : index
    %c0_2 = arith.constant 0 : index
    %1 = vector.load %arg1[%c0, %c0_0, %c0_1, %c0_2] : memref<1x2x19x114xbf16, #tpu.memory_space<vmem>>, vector<1x1x16x114xbf16>
    %2 = vector.shape_cast %1 : vector<1x1x16x114xbf16> to vector<16x114xbf16>
    %c0_3 = arith.constant 0 : index
    %c0_4 = arith.constant 0 : index
    %c0_5 = arith.constant 0 : index
    %3 = vector.load %arg2[%c0_3, %c0_4, %c0_5] : memref<7x114x256xbf16, #tpu.memory_space<vmem>>, vector<1x114x256xbf16>
    %4 = vector.shape_cast %3 : vector<1x114x256xbf16> to vector<114x256xbf16>
    %cst_6 = arith.constant dense<0.000000e+00> : vector<16x256xf32>
    %5 = tpu.matmul %2, %4, %cst_6 {dimension_numbers = #tpu.dot_dimension_numbers<[1], [0], [0], [1], [0, 0, 1, 1], [], []>} : vector<16x114xbf16>, vector<114x256xbf16>, vector<16x256xf32> -> vector<16x256xf32>
    %6 = arith.addf %0, %5 : vector<16x256xf32>
    %c0_7 = arith.constant 0 : index
    %c1 = arith.constant 1 : index
    %c0_8 = arith.constant 0 : index
    %c0_9 = arith.constant 0 : index
    %7 = vector.load %arg1[%c0_7, %c1, %c0_8, %c0_9] : memref<1x2x19x114xbf16, #tpu.memory_space<vmem>>, vector<1x1x16x114xbf16>
    %8 = vector.shape_cast %7 : vector<1x1x16x114xbf16> to vector<16x114xbf16>
    %c1_10 = arith.constant 1 : index
    %c0_11 = arith.constant 0 : index
    %c0_12 = arith.constant 0 : index
    %9 = vector.load %arg2[%c1_10, %c0_11, %c0_12] : memref<7x114x256xbf16, #tpu.memory_space<vmem>>, vector<1x114x256xbf16>
    %10 = vector.shape_cast %9 : vector<1x114x256xbf16> to vector<114x256xbf16>
    %cst_13 = arith.constant dense<0.000000e+00> : vector<16x256xf32>
    %11 = tpu.matmul %8, %10, %cst_13 {dimension_numbers = #tpu.dot_dimension_numbers<[1], [0], [0], [1], [0, 0, 1, 1], [], []>} : vector<16x114xbf16>, vector<114x256xbf16>, vector<16x256xf32> -> vector<16x256xf32>
    %12 = arith.addf %6, %11 : vector<16x256xf32>
    %c0_14 = arith.constant 0 : index
    %c0_15 = arith.constant 0 : index
    %c1_16 = arith.constant 1 : index
    %c0_17 = arith.constant 0 : index
    %13 = vector.load %arg1[%c0_14, %c0_15, %c1_16, %c0_17] : memref<1x2x19x114xbf16, #tpu.memory_space<vmem>>, vector<1x1x16x114xbf16>
    %14 = vector.shape_cast %13 : vector<1x1x16x114xbf16> to vector<16x114xbf16>
    %c2 = arith.constant 2 : index
    %c0_18 = arith.constant 0 : index
    %c0_19 = arith.constant 0 : index
    %15 = vector.load %arg2[%c2, %c0_18, %c0_19] : memref<7x114x256xbf16, #tpu.memory_space<vmem>>, vector<1x114x256xbf16>
    %16 = vector.shape_cast %15 : vector<1x114x256xbf16> to vector<114x256xbf16>
    %cst_20 = arith.constant dense<0.000000e+00> : vector<16x256xf32>
    %17 = tpu.matmul %14, %16, %cst_20 {dimension_numbers = #tpu.dot_dimension_numbers<[1], [0], [0], [1], [0, 0, 1, 1], [], []>} : vector<16x114xbf16>, vector<114x256xbf16>, vector<16x256xf32> -> vector<16x256xf32>
    %18 = arith.addf %12, %17 : vector<16x256xf32>
    %c0_21 = arith.constant 0 : index
    %c1_22 = arith.constant 1 : index
    %c1_23 = arith.constant 1 : index
    %c0_24 = arith.constant 0 : index
    %19 = vector.load %arg1[%c0_21, %c1_22, %c1_23, %c0_24] : memref<1x2x19x114xbf16, #tpu.memory_space<vmem>>, vector<1x1x16x114xbf16>
    %20 = vector.shape_cast %19 : vector<1x1x16x114xbf16> to vector<16x114xbf16>
    %c3 = arith.constant 3 : index
    %c0_25 = arith.constant 0 : index
    %c0_26 = arith.constant 0 : index
    %21 = vector.load %arg2[%c3, %c0_25, %c0_26] : memref<7x114x256xbf16, #tpu.memory_space<vmem>>, vector<1x114x256xbf16>
    %22 = vector.shape_cast %21 : vector<1x114x256xbf16> to vector<114x256xbf16>
    %cst_27 = arith.constant dense<0.000000e+00> : vector<16x256xf32>
    %23 = tpu.matmul %20, %22, %cst_27 {dimension_numbers = #tpu.dot_dimension_numbers<[1], [0], [0], [1], [0, 0, 1, 1], [], []>} : vector<16x114xbf16>, vector<114x256xbf16>, vector<16x256xf32> -> vector<16x256xf32>
    %24 = arith.addf %18, %23 : vector<16x256xf32>
    %c0_28 = arith.constant 0 : index
    %c0_29 = arith.constant 0 : index
    %c2_30 = arith.constant 2 : index
    %c0_31 = arith.constant 0 : index
    %25 = vector.load %arg1[%c0_28, %c0_29, %c2_30, %c0_31] : memref<1x2x19x114xbf16, #tpu.memory_space<vmem>>, vector<1x1x16x114xbf16>
    %26 = vector.shape_cast %25 : vector<1x1x16x114xbf16> to vector<16x114xbf16>
    %c4 = arith.constant 4 : index
    %c0_32 = arith.constant 0 : index
    %c0_33 = arith.constant 0 : index
    %27 = vector.load %arg2[%c4, %c0_32, %c0_33] : memref<7x114x256xbf16, #tpu.memory_space<vmem>>, vector<1x114x256xbf16>
    %28 = vector.shape_cast %27 : vector<1x114x256xbf16> to vector<114x256xbf16>
    %cst_34 = arith.constant dense<0.000000e+00> : vector<16x256xf32>
    %29 = tpu.matmul %26, %28, %cst_34 {dimension_numbers = #tpu.dot_dimension_numbers<[1], [0], [0], [1], [0, 0, 1, 1], [], []>} : vector<16x114xbf16>, vector<114x256xbf16>, vector<16x256xf32> -> vector<16x256xf32>
    %30 = arith.addf %24, %29 : vector<16x256xf32>
    %c0_35 = arith.constant 0 : index
    %c1_36 = arith.constant 1 : index
    %c2_37 = arith.constant 2 : index
    %c0_38 = arith.constant 0 : index
    %31 = vector.load %arg1[%c0_35, %c1_36, %c2_37, %c0_38] : memref<1x2x19x114xbf16, #tpu.memory_space<vmem>>, vector<1x1x16x114xbf16>
    %32 = vector.shape_cast %31 : vector<1x1x16x114xbf16> to vector<16x114xbf16>
    %c5 = arith.constant 5 : index
    %c0_39 = arith.constant 0 : index
    %c0_40 = arith.constant 0 : index
    %33 = vector.load %arg2[%c5, %c0_39, %c0_40] : memref<7x114x256xbf16, #tpu.memory_space<vmem>>, vector<1x114x256xbf16>
    %34 = vector.shape_cast %33 : vector<1x114x256xbf16> to vector<114x256xbf16>
    %cst_41 = arith.constant dense<0.000000e+00> : vector<16x256xf32>
    %35 = tpu.matmul %32, %34, %cst_41 {dimension_numbers = #tpu.dot_dimension_numbers<[1], [0], [0], [1], [0, 0, 1, 1], [], []>} : vector<16x114xbf16>, vector<114x256xbf16>, vector<16x256xf32> -> vector<16x256xf32>
    %36 = arith.addf %30, %35 : vector<16x256xf32>
    %c0_42 = arith.constant 0 : index
    %c0_43 = arith.constant 0 : index
    %c3_44 = arith.constant 3 : index
    %c0_45 = arith.constant 0 : index
    %37 = vector.load %arg1[%c0_42, %c0_43, %c3_44, %c0_45] : memref<1x2x19x114xbf16, #tpu.memory_space<vmem>>, vector<1x1x16x114xbf16>
    %38 = vector.shape_cast %37 : vector<1x1x16x114xbf16> to vector<16x114xbf16>
    %c6 = arith.constant 6 : index
    %c0_46 = arith.constant 0 : index
    %c0_47 = arith.constant 0 : index
    %39 = vector.load %arg2[%c6, %c0_46, %c0_47] : memref<7x114x256xbf16, #tpu.memory_space<vmem>>, vector<1x114x256xbf16>
    %40 = vector.shape_cast %39 : vector<1x114x256xbf16> to vector<114x256xbf16>
    %cst_48 = arith.constant dense<0.000000e+00> : vector<16x256xf32>
    %41 = tpu.matmul %38, %40, %cst_48 {dimension_numbers = #tpu.dot_dimension_numbers<[1], [0], [0], [1], [0, 0, 1, 1], [], []>} : vector<16x114xbf16>, vector<114x256xbf16>, vector<16x256xf32> -> vector<16x256xf32>
    %42 = arith.addf %36, %41 : vector<16x256xf32>
    %cst_49 = arith.constant dense<0.000000e+00> : vector<256xf32>
    %43 = vector.multi_reduction <add>, %42, %cst_49 [0] : vector<16x256xf32> to vector<256xf32>
    %44 = vector.shape_cast %43 : vector<256xf32> to vector<1x256xf32>
    %45 = arith.mulf %42, %42 : vector<16x256xf32>
    %cst_50 = arith.constant dense<0.000000e+00> : vector<256xf32>
    %46 = vector.multi_reduction <add>, %45, %cst_50 [0] : vector<16x256xf32> to vector<256xf32>
    %47 = vector.shape_cast %46 : vector<256xf32> to vector<1x256xf32>
    %c0_51 = arith.constant 0 : index
    %c0_52 = arith.constant 0 : index
    %48 = vector.load %arg3[%c0_51, %c0_52] : memref<256x8xf32, #tpu.memory_space<vmem>>, vector<256x8xf32>
    %cst_53 = arith.constant dense<0.000000e+00> : vector<1x8xf32>
    %49 = tpu.matmul %44, %48, %cst_53 {dimension_numbers = #tpu.dot_dimension_numbers<[1], [0], [0], [1], [0, 0, 1, 1], [], []>} : vector<1x256xf32>, vector<256x8xf32>, vector<1x8xf32> -> vector<1x8xf32>
    %c0_54 = arith.constant 0 : index
    %c0_55 = arith.constant 0 : index
    %50 = vector.load %arg3[%c0_54, %c0_55] : memref<256x8xf32, #tpu.memory_space<vmem>>, vector<256x8xf32>
    %cst_56 = arith.constant dense<0.000000e+00> : vector<1x8xf32>
    %51 = tpu.matmul %47, %50, %cst_56 {dimension_numbers = #tpu.dot_dimension_numbers<[1], [0], [0], [1], [0, 0, 1, 1], [], []>} : vector<1x256xf32>, vector<256x8xf32>, vector<1x8xf32> -> vector<1x8xf32>
    %cst_57 = arith.constant 5.120000e+02 : f32
    %52 = vector.broadcast %cst_57 : f32 to vector<1x8xf32>
    %53 = arith.divf %49, %52 : vector<1x8xf32>
    %cst_58 = arith.constant 5.120000e+02 : f32
    %54 = vector.broadcast %cst_58 : f32 to vector<1x8xf32>
    %55 = arith.divf %51, %54 : vector<1x8xf32>
    %56 = arith.mulf %53, %53 : vector<1x8xf32>
    %57 = arith.subf %55, %56 : vector<1x8xf32>
    %cst_59 = arith.constant 9.99999974E-6 : f32
    %58 = vector.broadcast %cst_59 : f32 to vector<1x8xf32>
    %59 = arith.addf %57, %58 : vector<1x8xf32>
    %60 = math.rsqrt %59 : vector<1x8xf32>
    %c0_60 = arith.constant 0 : index
    %c0_61 = arith.constant 0 : index
    %61 = vector.load %arg4[%c0_60, %c0_61] : memref<8x256xf32, #tpu.memory_space<vmem>>, vector<8x256xf32>
    %cst_62 = arith.constant dense<0.000000e+00> : vector<1x256xf32>
    %62 = tpu.matmul %53, %61, %cst_62 {dimension_numbers = #tpu.dot_dimension_numbers<[1], [0], [0], [1], [0, 0, 1, 1], [], []>} : vector<1x8xf32>, vector<8x256xf32>, vector<1x256xf32> -> vector<1x256xf32>
    %c0_63 = arith.constant 0 : index
    %c0_64 = arith.constant 0 : index
    %63 = vector.load %arg4[%c0_63, %c0_64] : memref<8x256xf32, #tpu.memory_space<vmem>>, vector<8x256xf32>
    %cst_65 = arith.constant dense<0.000000e+00> : vector<1x256xf32>
    %64 = tpu.matmul %60, %63, %cst_65 {dimension_numbers = #tpu.dot_dimension_numbers<[1], [0], [0], [1], [0, 0, 1, 1], [], []>} : vector<1x8xf32>, vector<8x256xf32>, vector<1x256xf32> -> vector<1x256xf32>
    %65 = vector.broadcast %62 : vector<1x256xf32> to vector<16x256xf32>
    %66 = arith.subf %42, %65 : vector<16x256xf32>
    %c0_66 = arith.constant 0 : index
    %c0_67 = arith.constant 0 : index
    %67 = vector.load %arg5[%c0_66, %c0_67] : memref<1x256xf32, #tpu.memory_space<vmem>>, vector<1x256xf32>
    %68 = arith.mulf %64, %67 : vector<1x256xf32>
    %69 = vector.broadcast %68 : vector<1x256xf32> to vector<16x256xf32>
    %70 = arith.mulf %66, %69 : vector<16x256xf32>
    %c0_68 = arith.constant 0 : index
    %c0_69 = arith.constant 0 : index
    %71 = vector.load %arg6[%c0_68, %c0_69] : memref<1x256xf32, #tpu.memory_space<vmem>>, vector<1x256xf32>
    %72 = vector.broadcast %71 : vector<1x256xf32> to vector<16x256xf32>
    %73 = arith.addf %70, %72 : vector<16x256xf32>
    %cst_70 = arith.constant 0.000000e+00 : f32
    %74 = vector.broadcast %cst_70 : f32 to vector<16x256xf32>
    %75 = arith.maximumf %73, %74 : vector<16x256xf32>
    %76 = vector.shape_cast %75 : vector<16x256xf32> to vector<1x16x256xf32>
    %77 = arith.truncf %76 : vector<1x16x256xf32> to vector<1x16x256xbf16>
    %c0_71 = arith.constant 0 : index
    %c0_72 = arith.constant 0 : index
    %c0_73 = arith.constant 0 : index
    %78 = vector.load %arg7[%c0_71, %c0_72, %c0_73] : memref<1x16x256xbf16, #tpu.memory_space<vmem>>, vector<1x16x256xbf16>
    tpu.vector_store %arg7[%c0_71, %c0_72, %c0_73], %77 {strides = array<i32>} : memref<1x16x256xbf16, #tpu.memory_space<vmem>>, vector<1x16x256xbf16>,
    return
  }
  func.func @transform_0(%arg0: i32) -> (i32, i32, i32, i32) {
    %c0_i32 = arith.constant 0 : i32
    %c0_i32_0 = arith.constant 0 : i32
    %c0_i32_1 = arith.constant 0 : i32
    %c0_i32_2 = arith.constant 0 : i32
    return %arg0, %c0_i32, %c0_i32_0, %c0_i32_1 : i32, i32, i32, i32
  }
  func.func @transform_1(%arg0: i32) -> (i32, i32, i32) {
    %c0_i32 = arith.constant 0 : i32
    %c0_i32_0 = arith.constant 0 : i32
    %c0_i32_1 = arith.constant 0 : i32
    %c0_i32_2 = arith.constant 0 : i32
    return %c0_i32, %c0_i32_0, %c0_i32_1 : i32, i32, i32
  }
  func.func @transform_2(%arg0: i32) -> (i32, i32) {
    %c0_i32 = arith.constant 0 : i32
    %c0_i32_0 = arith.constant 0 : i32
    %c0_i32_1 = arith.constant 0 : i32
    return %c0_i32, %c0_i32_0 : i32, i32
  }
  func.func @transform_3(%arg0: i32) -> (i32, i32) {
    %c0_i32 = arith.constant 0 : i32
    %c0_i32_0 = arith.constant 0 : i32
    %c0_i32_1 = arith.constant 0 : i32
    return %c0_i32, %c0_i32_0 : i32, i32
  }
  func.func @transform_4(%arg0: i32) -> (i32, i32) {
    %c0_i32 = arith.constant 0 : i32
    %c0_i32_0 = arith.constant 0 : i32
    %c0_i32_1 = arith.constant 0 : i32
    return %c0_i32, %c0_i32_0 : i32, i32
  }
  func.func @transform_5(%arg0: i32) -> (i32, i32) {
    %c0_i32 = arith.constant 0 : i32
    %c0_i32_0 = arith.constant 0 : i32
    %c0_i32_1 = arith.constant 0 : i32
    return %c0_i32, %c0_i32_0 : i32, i32
  }
  func.func @transform_6(%arg0: i32) -> (i32, i32, i32) {
    %c0_i32 = arith.constant 0 : i32
    %c0_i32_0 = arith.constant 0 : i32
    %c0_i32_1 = arith.constant 0 : i32
    return %arg0, %c0_i32, %c0_i32_0 : i32, i32, i32
  }
}

module attributes {stable_mosaic.version = 11 : i64} {
  func.func @_conv_gn_relu_kernel(%arg0: i32, %arg1: memref<1x2x9x288xbf16, #tpu.memory_space<vmem>>, %arg2: memref<3x288x256xbf16, #tpu.memory_space<vmem>>, %arg3: memref<256x8xf32, #tpu.memory_space<vmem>>, %arg4: memref<8x256xf32, #tpu.memory_space<vmem>>, %arg5: memref<1x256xf32, #tpu.memory_space<vmem>>, %arg6: memref<1x256xf32, #tpu.memory_space<vmem>>, %arg7: memref<1x8x256xbf16, #tpu.memory_space<vmem>>) attributes {dimension_semantics = [#tpu.dimension_semantics<parallel>], iteration_bounds = array<i64: 2>, scalar_prefetch = 0 : i64, scratch_operands = 0 : i64, tpu.core_type = #tpu.core_type<tc>, window_params = [{transform_indices = @transform_0, window_bounds = array<i64: 1, 2, 9, 288>}, {pipeline_mode = #tpu.pipeline_mode<synchronous>, transform_indices = @transform_1, window_bounds = array<i64: 3, 288, 256>}, {pipeline_mode = #tpu.pipeline_mode<synchronous>, transform_indices = @transform_2, window_bounds = array<i64: 256, 8>}, {pipeline_mode = #tpu.pipeline_mode<synchronous>, transform_indices = @transform_3, window_bounds = array<i64: 8, 256>}, {pipeline_mode = #tpu.pipeline_mode<synchronous>, transform_indices = @transform_4, window_bounds = array<i64: 1, 256>}, {pipeline_mode = #tpu.pipeline_mode<synchronous>, transform_indices = @transform_5, window_bounds = array<i64: 1, 256>}, {transform_indices = @transform_6, window_bounds = array<i64: 1, 8, 256>}]} {
    %cst = arith.constant 0.000000e+00 : f32
    %0 = vector.broadcast %cst : f32 to vector<8x256xf32>
    %c0 = arith.constant 0 : index
    %c0_0 = arith.constant 0 : index
    %c0_1 = arith.constant 0 : index
    %c0_2 = arith.constant 0 : index
    %1 = vector.load %arg1[%c0, %c0_0, %c0_1, %c0_2] : memref<1x2x9x288xbf16, #tpu.memory_space<vmem>>, vector<1x1x8x288xbf16>
    %2 = vector.shape_cast %1 : vector<1x1x8x288xbf16> to vector<8x288xbf16>
    %c0_3 = arith.constant 0 : index
    %c0_4 = arith.constant 0 : index
    %c0_5 = arith.constant 0 : index
    %3 = vector.load %arg2[%c0_3, %c0_4, %c0_5] : memref<3x288x256xbf16, #tpu.memory_space<vmem>>, vector<1x288x256xbf16>
    %4 = vector.shape_cast %3 : vector<1x288x256xbf16> to vector<288x256xbf16>
    %cst_6 = arith.constant dense<0.000000e+00> : vector<8x256xf32>
    %5 = tpu.matmul %2, %4, %cst_6 {dimension_numbers = #tpu.dot_dimension_numbers<[1], [0], [0], [1], [0, 0, 1, 1], [], []>} : vector<8x288xbf16>, vector<288x256xbf16>, vector<8x256xf32> -> vector<8x256xf32>
    %6 = arith.addf %0, %5 : vector<8x256xf32>
    %c0_7 = arith.constant 0 : index
    %c1 = arith.constant 1 : index
    %c0_8 = arith.constant 0 : index
    %c0_9 = arith.constant 0 : index
    %7 = vector.load %arg1[%c0_7, %c1, %c0_8, %c0_9] : memref<1x2x9x288xbf16, #tpu.memory_space<vmem>>, vector<1x1x8x288xbf16>
    %8 = vector.shape_cast %7 : vector<1x1x8x288xbf16> to vector<8x288xbf16>
    %c1_10 = arith.constant 1 : index
    %c0_11 = arith.constant 0 : index
    %c0_12 = arith.constant 0 : index
    %9 = vector.load %arg2[%c1_10, %c0_11, %c0_12] : memref<3x288x256xbf16, #tpu.memory_space<vmem>>, vector<1x288x256xbf16>
    %10 = vector.shape_cast %9 : vector<1x288x256xbf16> to vector<288x256xbf16>
    %cst_13 = arith.constant dense<0.000000e+00> : vector<8x256xf32>
    %11 = tpu.matmul %8, %10, %cst_13 {dimension_numbers = #tpu.dot_dimension_numbers<[1], [0], [0], [1], [0, 0, 1, 1], [], []>} : vector<8x288xbf16>, vector<288x256xbf16>, vector<8x256xf32> -> vector<8x256xf32>
    %12 = arith.addf %6, %11 : vector<8x256xf32>
    %c0_14 = arith.constant 0 : index
    %c0_15 = arith.constant 0 : index
    %c1_16 = arith.constant 1 : index
    %c0_17 = arith.constant 0 : index
    %13 = vector.load %arg1[%c0_14, %c0_15, %c1_16, %c0_17] : memref<1x2x9x288xbf16, #tpu.memory_space<vmem>>, vector<1x1x8x288xbf16>
    %14 = vector.shape_cast %13 : vector<1x1x8x288xbf16> to vector<8x288xbf16>
    %c2 = arith.constant 2 : index
    %c0_18 = arith.constant 0 : index
    %c0_19 = arith.constant 0 : index
    %15 = vector.load %arg2[%c2, %c0_18, %c0_19] : memref<3x288x256xbf16, #tpu.memory_space<vmem>>, vector<1x288x256xbf16>
    %16 = vector.shape_cast %15 : vector<1x288x256xbf16> to vector<288x256xbf16>
    %cst_20 = arith.constant dense<0.000000e+00> : vector<8x256xf32>
    %17 = tpu.matmul %14, %16, %cst_20 {dimension_numbers = #tpu.dot_dimension_numbers<[1], [0], [0], [1], [0, 0, 1, 1], [], []>} : vector<8x288xbf16>, vector<288x256xbf16>, vector<8x256xf32> -> vector<8x256xf32>
    %18 = arith.addf %12, %17 : vector<8x256xf32>
    %cst_21 = arith.constant dense<0.000000e+00> : vector<256xf32>
    %19 = vector.multi_reduction <add>, %18, %cst_21 [0] : vector<8x256xf32> to vector<256xf32>
    %20 = vector.shape_cast %19 : vector<256xf32> to vector<1x256xf32>
    %21 = arith.mulf %18, %18 : vector<8x256xf32>
    %cst_22 = arith.constant dense<0.000000e+00> : vector<256xf32>
    %22 = vector.multi_reduction <add>, %21, %cst_22 [0] : vector<8x256xf32> to vector<256xf32>
    %23 = vector.shape_cast %22 : vector<256xf32> to vector<1x256xf32>
    %c0_23 = arith.constant 0 : index
    %c0_24 = arith.constant 0 : index
    %24 = vector.load %arg3[%c0_23, %c0_24] : memref<256x8xf32, #tpu.memory_space<vmem>>, vector<256x8xf32>
    %cst_25 = arith.constant dense<0.000000e+00> : vector<1x8xf32>
    %25 = tpu.matmul %20, %24, %cst_25 {dimension_numbers = #tpu.dot_dimension_numbers<[1], [0], [0], [1], [0, 0, 1, 1], [], []>} : vector<1x256xf32>, vector<256x8xf32>, vector<1x8xf32> -> vector<1x8xf32>
    %c0_26 = arith.constant 0 : index
    %c0_27 = arith.constant 0 : index
    %26 = vector.load %arg3[%c0_26, %c0_27] : memref<256x8xf32, #tpu.memory_space<vmem>>, vector<256x8xf32>
    %cst_28 = arith.constant dense<0.000000e+00> : vector<1x8xf32>
    %27 = tpu.matmul %23, %26, %cst_28 {dimension_numbers = #tpu.dot_dimension_numbers<[1], [0], [0], [1], [0, 0, 1, 1], [], []>} : vector<1x256xf32>, vector<256x8xf32>, vector<1x8xf32> -> vector<1x8xf32>
    %cst_29 = arith.constant 2.560000e+02 : f32
    %28 = vector.broadcast %cst_29 : f32 to vector<1x8xf32>
    %29 = arith.divf %25, %28 : vector<1x8xf32>
    %cst_30 = arith.constant 2.560000e+02 : f32
    %30 = vector.broadcast %cst_30 : f32 to vector<1x8xf32>
    %31 = arith.divf %27, %30 : vector<1x8xf32>
    %32 = arith.mulf %29, %29 : vector<1x8xf32>
    %33 = arith.subf %31, %32 : vector<1x8xf32>
    %cst_31 = arith.constant 9.99999974E-6 : f32
    %34 = vector.broadcast %cst_31 : f32 to vector<1x8xf32>
    %35 = arith.addf %33, %34 : vector<1x8xf32>
    %36 = math.rsqrt %35 : vector<1x8xf32>
    %c0_32 = arith.constant 0 : index
    %c0_33 = arith.constant 0 : index
    %37 = vector.load %arg4[%c0_32, %c0_33] : memref<8x256xf32, #tpu.memory_space<vmem>>, vector<8x256xf32>
    %cst_34 = arith.constant dense<0.000000e+00> : vector<1x256xf32>
    %38 = tpu.matmul %29, %37, %cst_34 {dimension_numbers = #tpu.dot_dimension_numbers<[1], [0], [0], [1], [0, 0, 1, 1], [], []>} : vector<1x8xf32>, vector<8x256xf32>, vector<1x256xf32> -> vector<1x256xf32>
    %c0_35 = arith.constant 0 : index
    %c0_36 = arith.constant 0 : index
    %39 = vector.load %arg4[%c0_35, %c0_36] : memref<8x256xf32, #tpu.memory_space<vmem>>, vector<8x256xf32>
    %cst_37 = arith.constant dense<0.000000e+00> : vector<1x256xf32>
    %40 = tpu.matmul %36, %39, %cst_37 {dimension_numbers = #tpu.dot_dimension_numbers<[1], [0], [0], [1], [0, 0, 1, 1], [], []>} : vector<1x8xf32>, vector<8x256xf32>, vector<1x256xf32> -> vector<1x256xf32>
    %41 = vector.broadcast %38 : vector<1x256xf32> to vector<8x256xf32>
    %42 = arith.subf %18, %41 : vector<8x256xf32>
    %c0_38 = arith.constant 0 : index
    %c0_39 = arith.constant 0 : index
    %43 = vector.load %arg5[%c0_38, %c0_39] : memref<1x256xf32, #tpu.memory_space<vmem>>, vector<1x256xf32>
    %44 = arith.mulf %40, %43 : vector<1x256xf32>
    %45 = vector.broadcast %44 : vector<1x256xf32> to vector<8x256xf32>
    %46 = arith.mulf %42, %45 : vector<8x256xf32>
    %c0_40 = arith.constant 0 : index
    %c0_41 = arith.constant 0 : index
    %47 = vector.load %arg6[%c0_40, %c0_41] : memref<1x256xf32, #tpu.memory_space<vmem>>, vector<1x256xf32>
    %48 = vector.broadcast %47 : vector<1x256xf32> to vector<8x256xf32>
    %49 = arith.addf %46, %48 : vector<8x256xf32>
    %cst_42 = arith.constant 0.000000e+00 : f32
    %50 = vector.broadcast %cst_42 : f32 to vector<8x256xf32>
    %51 = arith.maximumf %49, %50 : vector<8x256xf32>
    %52 = vector.shape_cast %51 : vector<8x256xf32> to vector<1x8x256xf32>
    %53 = arith.truncf %52 : vector<1x8x256xf32> to vector<1x8x256xbf16>
    %c0_43 = arith.constant 0 : index
    %c0_44 = arith.constant 0 : index
    %c0_45 = arith.constant 0 : index
    %54 = vector.load %arg7[%c0_43, %c0_44, %c0_45] : memref<1x8x256xbf16, #tpu.memory_space<vmem>>, vector<1x8x256xbf16>
    tpu.vector_store %arg7[%c0_43, %c0_44, %c0_45], %53 {strides = array<i32>} : memref<1x8x256xbf16, #tpu.memory_space<vmem>>, vector<1x8x256xbf16>,
    return
  }
  func.func @transform_0(%arg0: i32) -> (i32, i32, i32, i32) {
    %c0_i32 = arith.constant 0 : i32
    %c0_i32_0 = arith.constant 0 : i32
    %c0_i32_1 = arith.constant 0 : i32
    %c0_i32_2 = arith.constant 0 : i32
    return %arg0, %c0_i32, %c0_i32_0, %c0_i32_1 : i32, i32, i32, i32
  }
  func.func @transform_1(%arg0: i32) -> (i32, i32, i32) {
    %c0_i32 = arith.constant 0 : i32
    %c0_i32_0 = arith.constant 0 : i32
    %c0_i32_1 = arith.constant 0 : i32
    %c0_i32_2 = arith.constant 0 : i32
    return %c0_i32, %c0_i32_0, %c0_i32_1 : i32, i32, i32
  }
  func.func @transform_2(%arg0: i32) -> (i32, i32) {
    %c0_i32 = arith.constant 0 : i32
    %c0_i32_0 = arith.constant 0 : i32
    %c0_i32_1 = arith.constant 0 : i32
    return %c0_i32, %c0_i32_0 : i32, i32
  }
  func.func @transform_3(%arg0: i32) -> (i32, i32) {
    %c0_i32 = arith.constant 0 : i32
    %c0_i32_0 = arith.constant 0 : i32
    %c0_i32_1 = arith.constant 0 : i32
    return %c0_i32, %c0_i32_0 : i32, i32
  }
  func.func @transform_4(%arg0: i32) -> (i32, i32) {
    %c0_i32 = arith.constant 0 : i32
    %c0_i32_0 = arith.constant 0 : i32
    %c0_i32_1 = arith.constant 0 : i32
    return %c0_i32, %c0_i32_0 : i32, i32
  }
  func.func @transform_5(%arg0: i32) -> (i32, i32) {
    %c0_i32 = arith.constant 0 : i32
    %c0_i32_0 = arith.constant 0 : i32
    %c0_i32_1 = arith.constant 0 : i32
    return %c0_i32, %c0_i32_0 : i32, i32
  }
  func.func @transform_6(%arg0: i32) -> (i32, i32, i32) {
    %c0_i32 = arith.constant 0 : i32
    %c0_i32_0 = arith.constant 0 : i32
    %c0_i32_1 = arith.constant 0 : i32
    return %arg0, %c0_i32, %c0_i32_0 : i32, i32, i32
  }
}

module attributes {stable_mosaic.version = 11 : i64} {
  func.func @_conv_gn_relu_kernel(%arg0: i32, %arg1: memref<1x2x5x320xbf16, #tpu.memory_space<vmem>>, %arg2: memref<3x320x256xbf16, #tpu.memory_space<vmem>>, %arg3: memref<256x8xf32, #tpu.memory_space<vmem>>, %arg4: memref<8x256xf32, #tpu.memory_space<vmem>>, %arg5: memref<1x256xf32, #tpu.memory_space<vmem>>, %arg6: memref<1x256xf32, #tpu.memory_space<vmem>>, %arg7: memref<1x4x256xbf16, #tpu.memory_space<vmem>>) attributes {dimension_semantics = [#tpu.dimension_semantics<parallel>], iteration_bounds = array<i64: 2>, scalar_prefetch = 0 : i64, scratch_operands = 0 : i64, tpu.core_type = #tpu.core_type<tc>, window_params = [{transform_indices = @transform_0, window_bounds = array<i64: 1, 2, 5, 320>}, {pipeline_mode = #tpu.pipeline_mode<synchronous>, transform_indices = @transform_1, window_bounds = array<i64: 3, 320, 256>}, {pipeline_mode = #tpu.pipeline_mode<synchronous>, transform_indices = @transform_2, window_bounds = array<i64: 256, 8>}, {pipeline_mode = #tpu.pipeline_mode<synchronous>, transform_indices = @transform_3, window_bounds = array<i64: 8, 256>}, {pipeline_mode = #tpu.pipeline_mode<synchronous>, transform_indices = @transform_4, window_bounds = array<i64: 1, 256>}, {pipeline_mode = #tpu.pipeline_mode<synchronous>, transform_indices = @transform_5, window_bounds = array<i64: 1, 256>}, {transform_indices = @transform_6, window_bounds = array<i64: 1, 4, 256>}]} {
    %cst = arith.constant 0.000000e+00 : f32
    %0 = vector.broadcast %cst : f32 to vector<4x256xf32>
    %c0 = arith.constant 0 : index
    %c0_0 = arith.constant 0 : index
    %c0_1 = arith.constant 0 : index
    %c0_2 = arith.constant 0 : index
    %1 = vector.load %arg1[%c0, %c0_0, %c0_1, %c0_2] : memref<1x2x5x320xbf16, #tpu.memory_space<vmem>>, vector<1x1x4x320xbf16>
    %2 = vector.shape_cast %1 : vector<1x1x4x320xbf16> to vector<4x320xbf16>
    %c0_3 = arith.constant 0 : index
    %c0_4 = arith.constant 0 : index
    %c0_5 = arith.constant 0 : index
    %3 = vector.load %arg2[%c0_3, %c0_4, %c0_5] : memref<3x320x256xbf16, #tpu.memory_space<vmem>>, vector<1x320x256xbf16>
    %4 = vector.shape_cast %3 : vector<1x320x256xbf16> to vector<320x256xbf16>
    %cst_6 = arith.constant dense<0.000000e+00> : vector<4x256xf32>
    %5 = tpu.matmul %2, %4, %cst_6 {dimension_numbers = #tpu.dot_dimension_numbers<[1], [0], [0], [1], [0, 0, 1, 1], [], []>} : vector<4x320xbf16>, vector<320x256xbf16>, vector<4x256xf32> -> vector<4x256xf32>
    %6 = arith.addf %0, %5 : vector<4x256xf32>
    %c0_7 = arith.constant 0 : index
    %c1 = arith.constant 1 : index
    %c0_8 = arith.constant 0 : index
    %c0_9 = arith.constant 0 : index
    %7 = vector.load %arg1[%c0_7, %c1, %c0_8, %c0_9] : memref<1x2x5x320xbf16, #tpu.memory_space<vmem>>, vector<1x1x4x320xbf16>
    %8 = vector.shape_cast %7 : vector<1x1x4x320xbf16> to vector<4x320xbf16>
    %c1_10 = arith.constant 1 : index
    %c0_11 = arith.constant 0 : index
    %c0_12 = arith.constant 0 : index
    %9 = vector.load %arg2[%c1_10, %c0_11, %c0_12] : memref<3x320x256xbf16, #tpu.memory_space<vmem>>, vector<1x320x256xbf16>
    %10 = vector.shape_cast %9 : vector<1x320x256xbf16> to vector<320x256xbf16>
    %cst_13 = arith.constant dense<0.000000e+00> : vector<4x256xf32>
    %11 = tpu.matmul %8, %10, %cst_13 {dimension_numbers = #tpu.dot_dimension_numbers<[1], [0], [0], [1], [0, 0, 1, 1], [], []>} : vector<4x320xbf16>, vector<320x256xbf16>, vector<4x256xf32> -> vector<4x256xf32>
    %12 = arith.addf %6, %11 : vector<4x256xf32>
    %c0_14 = arith.constant 0 : index
    %c0_15 = arith.constant 0 : index
    %c1_16 = arith.constant 1 : index
    %c0_17 = arith.constant 0 : index
    %13 = vector.load %arg1[%c0_14, %c0_15, %c1_16, %c0_17] : memref<1x2x5x320xbf16, #tpu.memory_space<vmem>>, vector<1x1x4x320xbf16>
    %14 = vector.shape_cast %13 : vector<1x1x4x320xbf16> to vector<4x320xbf16>
    %c2 = arith.constant 2 : index
    %c0_18 = arith.constant 0 : index
    %c0_19 = arith.constant 0 : index
    %15 = vector.load %arg2[%c2, %c0_18, %c0_19] : memref<3x320x256xbf16, #tpu.memory_space<vmem>>, vector<1x320x256xbf16>
    %16 = vector.shape_cast %15 : vector<1x320x256xbf16> to vector<320x256xbf16>
    %cst_20 = arith.constant dense<0.000000e+00> : vector<4x256xf32>
    %17 = tpu.matmul %14, %16, %cst_20 {dimension_numbers = #tpu.dot_dimension_numbers<[1], [0], [0], [1], [0, 0, 1, 1], [], []>} : vector<4x320xbf16>, vector<320x256xbf16>, vector<4x256xf32> -> vector<4x256xf32>
    %18 = arith.addf %12, %17 : vector<4x256xf32>
    %cst_21 = arith.constant dense<0.000000e+00> : vector<256xf32>
    %19 = vector.multi_reduction <add>, %18, %cst_21 [0] : vector<4x256xf32> to vector<256xf32>
    %20 = vector.shape_cast %19 : vector<256xf32> to vector<1x256xf32>
    %21 = arith.mulf %18, %18 : vector<4x256xf32>
    %cst_22 = arith.constant dense<0.000000e+00> : vector<256xf32>
    %22 = vector.multi_reduction <add>, %21, %cst_22 [0] : vector<4x256xf32> to vector<256xf32>
    %23 = vector.shape_cast %22 : vector<256xf32> to vector<1x256xf32>
    %c0_23 = arith.constant 0 : index
    %c0_24 = arith.constant 0 : index
    %24 = vector.load %arg3[%c0_23, %c0_24] : memref<256x8xf32, #tpu.memory_space<vmem>>, vector<256x8xf32>
    %cst_25 = arith.constant dense<0.000000e+00> : vector<1x8xf32>
    %25 = tpu.matmul %20, %24, %cst_25 {dimension_numbers = #tpu.dot_dimension_numbers<[1], [0], [0], [1], [0, 0, 1, 1], [], []>} : vector<1x256xf32>, vector<256x8xf32>, vector<1x8xf32> -> vector<1x8xf32>
    %c0_26 = arith.constant 0 : index
    %c0_27 = arith.constant 0 : index
    %26 = vector.load %arg3[%c0_26, %c0_27] : memref<256x8xf32, #tpu.memory_space<vmem>>, vector<256x8xf32>
    %cst_28 = arith.constant dense<0.000000e+00> : vector<1x8xf32>
    %27 = tpu.matmul %23, %26, %cst_28 {dimension_numbers = #tpu.dot_dimension_numbers<[1], [0], [0], [1], [0, 0, 1, 1], [], []>} : vector<1x256xf32>, vector<256x8xf32>, vector<1x8xf32> -> vector<1x8xf32>
    %cst_29 = arith.constant 1.280000e+02 : f32
    %28 = vector.broadcast %cst_29 : f32 to vector<1x8xf32>
    %29 = arith.divf %25, %28 : vector<1x8xf32>
    %cst_30 = arith.constant 1.280000e+02 : f32
    %30 = vector.broadcast %cst_30 : f32 to vector<1x8xf32>
    %31 = arith.divf %27, %30 : vector<1x8xf32>
    %32 = arith.mulf %29, %29 : vector<1x8xf32>
    %33 = arith.subf %31, %32 : vector<1x8xf32>
    %cst_31 = arith.constant 9.99999974E-6 : f32
    %34 = vector.broadcast %cst_31 : f32 to vector<1x8xf32>
    %35 = arith.addf %33, %34 : vector<1x8xf32>
    %36 = math.rsqrt %35 : vector<1x8xf32>
    %c0_32 = arith.constant 0 : index
    %c0_33 = arith.constant 0 : index
    %37 = vector.load %arg4[%c0_32, %c0_33] : memref<8x256xf32, #tpu.memory_space<vmem>>, vector<8x256xf32>
    %cst_34 = arith.constant dense<0.000000e+00> : vector<1x256xf32>
    %38 = tpu.matmul %29, %37, %cst_34 {dimension_numbers = #tpu.dot_dimension_numbers<[1], [0], [0], [1], [0, 0, 1, 1], [], []>} : vector<1x8xf32>, vector<8x256xf32>, vector<1x256xf32> -> vector<1x256xf32>
    %c0_35 = arith.constant 0 : index
    %c0_36 = arith.constant 0 : index
    %39 = vector.load %arg4[%c0_35, %c0_36] : memref<8x256xf32, #tpu.memory_space<vmem>>, vector<8x256xf32>
    %cst_37 = arith.constant dense<0.000000e+00> : vector<1x256xf32>
    %40 = tpu.matmul %36, %39, %cst_37 {dimension_numbers = #tpu.dot_dimension_numbers<[1], [0], [0], [1], [0, 0, 1, 1], [], []>} : vector<1x8xf32>, vector<8x256xf32>, vector<1x256xf32> -> vector<1x256xf32>
    %41 = vector.broadcast %38 : vector<1x256xf32> to vector<4x256xf32>
    %42 = arith.subf %18, %41 : vector<4x256xf32>
    %c0_38 = arith.constant 0 : index
    %c0_39 = arith.constant 0 : index
    %43 = vector.load %arg5[%c0_38, %c0_39] : memref<1x256xf32, #tpu.memory_space<vmem>>, vector<1x256xf32>
    %44 = arith.mulf %40, %43 : vector<1x256xf32>
    %45 = vector.broadcast %44 : vector<1x256xf32> to vector<4x256xf32>
    %46 = arith.mulf %42, %45 : vector<4x256xf32>
    %c0_40 = arith.constant 0 : index
    %c0_41 = arith.constant 0 : index
    %47 = vector.load %arg6[%c0_40, %c0_41] : memref<1x256xf32, #tpu.memory_space<vmem>>, vector<1x256xf32>
    %48 = vector.broadcast %47 : vector<1x256xf32> to vector<4x256xf32>
    %49 = arith.addf %46, %48 : vector<4x256xf32>
    %cst_42 = arith.constant 0.000000e+00 : f32
    %50 = vector.broadcast %cst_42 : f32 to vector<4x256xf32>
    %51 = arith.maximumf %49, %50 : vector<4x256xf32>
    %52 = vector.shape_cast %51 : vector<4x256xf32> to vector<1x4x256xf32>
    %53 = arith.truncf %52 : vector<1x4x256xf32> to vector<1x4x256xbf16>
    %c0_43 = arith.constant 0 : index
    %c0_44 = arith.constant 0 : index
    %c0_45 = arith.constant 0 : index
    %54 = vector.load %arg7[%c0_43, %c0_44, %c0_45] : memref<1x4x256xbf16, #tpu.memory_space<vmem>>, vector<1x4x256xbf16>
    tpu.vector_store %arg7[%c0_43, %c0_44, %c0_45], %53 {strides = array<i32>} : memref<1x4x256xbf16, #tpu.memory_space<vmem>>, vector<1x4x256xbf16>,
    return
  }
  func.func @transform_0(%arg0: i32) -> (i32, i32, i32, i32) {
    %c0_i32 = arith.constant 0 : i32
    %c0_i32_0 = arith.constant 0 : i32
    %c0_i32_1 = arith.constant 0 : i32
    %c0_i32_2 = arith.constant 0 : i32
    return %arg0, %c0_i32, %c0_i32_0, %c0_i32_1 : i32, i32, i32, i32
  }
  func.func @transform_1(%arg0: i32) -> (i32, i32, i32) {
    %c0_i32 = arith.constant 0 : i32
    %c0_i32_0 = arith.constant 0 : i32
    %c0_i32_1 = arith.constant 0 : i32
    %c0_i32_2 = arith.constant 0 : i32
    return %c0_i32, %c0_i32_0, %c0_i32_1 : i32, i32, i32
  }
  func.func @transform_2(%arg0: i32) -> (i32, i32) {
    %c0_i32 = arith.constant 0 : i32
    %c0_i32_0 = arith.constant 0 : i32
    %c0_i32_1 = arith.constant 0 : i32
    return %c0_i32, %c0_i32_0 : i32, i32
  }
  func.func @transform_3(%arg0: i32) -> (i32, i32) {
    %c0_i32 = arith.constant 0 : i32
    %c0_i32_0 = arith.constant 0 : i32
    %c0_i32_1 = arith.constant 0 : i32
    return %c0_i32, %c0_i32_0 : i32, i32
  }
  func.func @transform_4(%arg0: i32) -> (i32, i32) {
    %c0_i32 = arith.constant 0 : i32
    %c0_i32_0 = arith.constant 0 : i32
    %c0_i32_1 = arith.constant 0 : i32
    return %c0_i32, %c0_i32_0 : i32, i32
  }
  func.func @transform_5(%arg0: i32) -> (i32, i32) {
    %c0_i32 = arith.constant 0 : i32
    %c0_i32_0 = arith.constant 0 : i32
    %c0_i32_1 = arith.constant 0 : i32
    return %c0_i32, %c0_i32_0 : i32, i32
  }
  func.func @transform_6(%arg0: i32) -> (i32, i32, i32) {
    %c0_i32 = arith.constant 0 : i32
    %c0_i32_0 = arith.constant 0 : i32
    %c0_i32_1 = arith.constant 0 : i32
    return %arg0, %c0_i32, %c0_i32_0 : i32, i32, i32
  }
}

module attributes {stable_mosaic.version = 11 : i64} {
  func.func @_conv_kernel(%arg0: i32, %arg1: memref<1x2x2x256xbf16, #tpu.memory_space<vmem>>, %arg2: memref<2x256x128xbf16, #tpu.memory_space<vmem>>, %arg3: memref<1x2x128xf32, #tpu.memory_space<vmem>>) attributes {dimension_semantics = [#tpu.dimension_semantics<parallel>], iteration_bounds = array<i64: 2>, scalar_prefetch = 0 : i64, scratch_operands = 0 : i64, tpu.core_type = #tpu.core_type<tc>, window_params = [{transform_indices = @transform_0, window_bounds = array<i64: 1, 2, 2, 256>}, {pipeline_mode = #tpu.pipeline_mode<synchronous>, transform_indices = @transform_1, window_bounds = array<i64: 2, 256, 128>}, {transform_indices = @transform_2, window_bounds = array<i64: 1, 2, 128>}]} {
    %cst = arith.constant 0.000000e+00 : f32
    %0 = vector.broadcast %cst : f32 to vector<2x128xf32>
    %c0 = arith.constant 0 : index
    %c0_0 = arith.constant 0 : index
    %c0_1 = arith.constant 0 : index
    %c0_2 = arith.constant 0 : index
    %1 = vector.load %arg1[%c0, %c0_0, %c0_1, %c0_2] : memref<1x2x2x256xbf16, #tpu.memory_space<vmem>>, vector<1x1x2x256xbf16>
    %2 = vector.shape_cast %1 : vector<1x1x2x256xbf16> to vector<2x256xbf16>
    %c0_3 = arith.constant 0 : index
    %c0_4 = arith.constant 0 : index
    %c0_5 = arith.constant 0 : index
    %3 = vector.load %arg2[%c0_3, %c0_4, %c0_5] : memref<2x256x128xbf16, #tpu.memory_space<vmem>>, vector<1x256x128xbf16>
    %4 = vector.shape_cast %3 : vector<1x256x128xbf16> to vector<256x128xbf16>
    %cst_6 = arith.constant dense<0.000000e+00> : vector<2x128xf32>
    %5 = tpu.matmul %2, %4, %cst_6 {dimension_numbers = #tpu.dot_dimension_numbers<[1], [0], [0], [1], [0, 0, 1, 1], [], []>} : vector<2x256xbf16>, vector<256x128xbf16>, vector<2x128xf32> -> vector<2x128xf32>
    %6 = arith.addf %0, %5 : vector<2x128xf32>
    %c0_7 = arith.constant 0 : index
    %c1 = arith.constant 1 : index
    %c0_8 = arith.constant 0 : index
    %c0_9 = arith.constant 0 : index
    %7 = vector.load %arg1[%c0_7, %c1, %c0_8, %c0_9] : memref<1x2x2x256xbf16, #tpu.memory_space<vmem>>, vector<1x1x2x256xbf16>
    %8 = vector.shape_cast %7 : vector<1x1x2x256xbf16> to vector<2x256xbf16>
    %c1_10 = arith.constant 1 : index
    %c0_11 = arith.constant 0 : index
    %c0_12 = arith.constant 0 : index
    %9 = vector.load %arg2[%c1_10, %c0_11, %c0_12] : memref<2x256x128xbf16, #tpu.memory_space<vmem>>, vector<1x256x128xbf16>
    %10 = vector.shape_cast %9 : vector<1x256x128xbf16> to vector<256x128xbf16>
    %cst_13 = arith.constant dense<0.000000e+00> : vector<2x128xf32>
    %11 = tpu.matmul %8, %10, %cst_13 {dimension_numbers = #tpu.dot_dimension_numbers<[1], [0], [0], [1], [0, 0, 1, 1], [], []>} : vector<2x256xbf16>, vector<256x128xbf16>, vector<2x128xf32> -> vector<2x128xf32>
    %12 = arith.addf %6, %11 : vector<2x128xf32>
    %13 = vector.shape_cast %12 : vector<2x128xf32> to vector<1x2x128xf32>
    %c0_14 = arith.constant 0 : index
    %c0_15 = arith.constant 0 : index
    %c0_16 = arith.constant 0 : index
    %14 = vector.load %arg3[%c0_14, %c0_15, %c0_16] : memref<1x2x128xf32, #tpu.memory_space<vmem>>, vector<1x2x128xf32>
    tpu.vector_store %arg3[%c0_14, %c0_15, %c0_16], %13 {strides = array<i32>} : memref<1x2x128xf32, #tpu.memory_space<vmem>>, vector<1x2x128xf32>,
    return
  }
  func.func @transform_0(%arg0: i32) -> (i32, i32, i32, i32) {
    %c0_i32 = arith.constant 0 : i32
    %c0_i32_0 = arith.constant 0 : i32
    %c0_i32_1 = arith.constant 0 : i32
    %c0_i32_2 = arith.constant 0 : i32
    return %arg0, %c0_i32, %c0_i32_0, %c0_i32_1 : i32, i32, i32, i32
  }
  func.func @transform_1(%arg0: i32) -> (i32, i32, i32) {
    %c0_i32 = arith.constant 0 : i32
    %c0_i32_0 = arith.constant 0 : i32
    %c0_i32_1 = arith.constant 0 : i32
    %c0_i32_2 = arith.constant 0 : i32
    return %c0_i32, %c0_i32_0, %c0_i32_1 : i32, i32, i32
  }
  func.func @transform_2(%arg0: i32) -> (i32, i32, i32) {
    %c0_i32 = arith.constant 0 : i32
    %c0_i32_0 = arith.constant 0 : i32
    %c0_i32_1 = arith.constant 0 : i32
    return %arg0, %c0_i32, %c0_i32_0 : i32, i32, i32
  }
}

</mosaic_0001>

<bundles_post_ra>
// kernel: tile.48
= control target key start
LH: loop header
LB: loop body
LE: loop exit
PB: predicated region body
PF: predicated region fallthrough
CT: control target
= control target key end

     0   :  { %s28_s0 = inlined_call_operand.vmem [shape: s32[16], index: 0, kind: input, shape index: {}]   ;;  %s29_s1 = inlined_call_operand.vmem [shape: s32[16,16], index: 1, kind: output, shape index: {}]  }
   0x1   :  { %v4_v0 = vld [vmem:[%s28_s0] ss:$0 sm:$0xff] }
   0x2   :  { %5 = vst [vmem:[%s29_s1] sm:$0xff] %v4_v0  ;;  %8 = vst [vmem:[%s29_s1 + $0x8] sm:$0xff] %v4_v0 }

// kernel: eq.57
= control target key start
LH: loop header
LB: loop body
LE: loop exit
PB: predicated region body
PF: predicated region fallthrough
CT: control target
= control target key end

     0   :  { %s7_s6 = smov 3  ;;  %s21_s9 = smov 3  ;;  %vm4_vm0 = vcmask 130048   ;;  %vm11_vm1 = vcmask 1048448   ;;  %vm18_vm2 = vcmask 917248   ;;  %vm25_vm3 = vcmask 786048   ;;  %s119_s0 = inlined_call_operand.vmem [shape: s32[16,16], index: 0, kind: input, shape index: {}]   ;;  %s120_s1 = inlined_call_operand.vmem [shape: s32[256], index: 1, kind: output, shape index: {}]  }
   0x1   :  { %v61_v0 = vld [vmem:[%s119_s0 + $0x7] ss:$8 sm:%s7_s6]   ;;  %s75_s10 = smov 112   ;;  %v63_v1 = vld [vmem:[%s119_s0 + $0x5] ss:$8 sm:%s21_s9]   ;;  %s14_s13 = smov 3 }
   0x2   :  { %9 = vrot.lane.b32.xlu0 %v61_v0, %s75_s10  ;;  %s76_s14 = smov 80   ;;  %v62_v2 = vld [vmem:[%s119_s0 + $0x6] ss:$8 sm:%s14_s13]   ;;  %s28_s17 = smov 3  ;;  %vm32_vm4 = vcmask 654848   ;;  %vm39_vm5 = vcmask 523648  }
   0x3   :  { %23 = vrot.lane.b32.xlu1 %v63_v1, %s76_s14  ;;  %v64_v3 = vld [vmem:[%s119_s0 + $0x4] ss:$8 sm:%s28_s17]   ;;  %s35_s20 = smov 3  ;;  %s42_s21 = smov 3  ;;  %vm46_vm6 = vcmask 392448   ;;  %vm53_vm7 = vcmask 261248  }
   0x4   :  { %s77_s22 = smov 96   ;;  %s78_s23 = smov 64   ;;  %v65_v4 = vld [vmem:[%s119_s0 + $0x3] ss:$8 sm:%s35_s20]   ;;  %v66_v5 = vld [vmem:[%s119_s0 + $0x2] ss:$8 sm:%s42_s21]  }
   0x5   :  { %s2_s26 = smov 3  ;;  %s49_s29 = smov 3 }
   0x6   :  { %16 = vrot.lane.b32.xlu0 %v62_v2, %s77_s22  ;;  %v3_v6 = vld [vmem:[%s119_s0] ss:$8 sm:%s2_s26]   ;;  %s79_s3 = smov 48   ;;  %s80_s4 = smov 32  }
   0x7   :  { %30 = vrot.lane.b32.xlu1 %v64_v3, %s78_s23  ;;  %5 = vst.msk [vmem:[#allocation0] sm:$0x3] %vm4_vm0, %v3_v6   ;;  %v67_v7 = vld [vmem:[%s119_s0 + $0x1] ss:$8 sm:%s49_s29]   ;;  %s81_s0 = smov 16  }
   0xa   :  { %37 = vrot.lane.b32.xlu0 %v65_v4, %s79_s3 }
   0xb   :  { %44 = vrot.lane.b32.xlu1 %v66_v5, %s80_s4 }
   0xe   :  { %51 = vrot.lane.b32.xlu0 %v67_v7, %s81_s0 }
  0x74   :  { %v10_v8 = vpop.permute.xlu0 %9  }
  0x75   :  { %12 = vst.msk [vmem:[#allocation0] sm:$0x3] %vm11_vm1, %v10_v8   ;;  %v24_v9 = vpop.permute.xlu1 %23  }
  0x78   :  { %v17_v10 = vpop.permute.xlu0 %16  }
  0x79   :  { %19 = vst.msk [vmem:[#allocation0] sm:$0x3] %vm18_vm2, %v17_v10   ;;  %v31_v11 = vpop.permute.xlu1 %30  }
  0x7a   :  { %26 = vst.msk [vmem:[#allocation0] sm:$0x3] %vm25_vm3, %v24_v9  }
  0x7b   :  { %33 = vst.msk [vmem:[#allocation0] sm:$0x3] %vm32_vm4, %v31_v11  }
  0x7c   :  { %v38_v12 = vpop.permute.xlu0 %37  }
  0x7d   :  { %40 = vst.msk [vmem:[#allocation0] sm:$0x3] %vm39_vm5, %v38_v12   ;;  %v45_v13 = vpop.permute.xlu1 %44  }
  0x7e   :  { %47 = vst.msk [vmem:[#allocation0] sm:$0x3] %vm46_vm6, %v45_v13  }
  0x80   :  { %v52_v14 = vpop.permute.xlu0 %51  }
  0x81   :  { %54 = vst.msk [vmem:[#allocation0] sm:$0x3] %vm53_vm7, %v52_v14  }
  0x88   :  { %v58_v15 = vld [vmem:[#allocation0] sm:$0x3] }
  0x89   :  { %60 = vst [vmem:[%s120_s1] sm:$0x3] %v58_v15 }

// kernel: tile.53
= control target key start
LH: loop header
LB: loop body
LE: loop exit
PB: predicated region body
PF: predicated region fallthrough
CT: control target
= control target key end

     0   :  { %s28_s0 = inlined_call_operand.vmem [shape: f32[16], index: 0, kind: input, shape index: {}]   ;;  %s29_s1 = inlined_call_operand.vmem [shape: f32[16,16], index: 1, kind: output, shape index: {}]  }
   0x1   :  { %v4_v0 = vld [vmem:[%s28_s0] ss:$0 sm:$0xff] }
   0x2   :  { %5 = vst [vmem:[%s29_s1] sm:$0xff] %v4_v0  ;;  %8 = vst [vmem:[%s29_s1 + $0x8] sm:$0xff] %v4_v0 }

// kernel: tile.54
= control target key start
LH: loop header
LB: loop body
LE: loop exit
PB: predicated region body
PF: predicated region fallthrough
CT: control target
= control target key end

     0   :  { %s7_s6 = smov 3  ;;  %s21_s9 = smov 3  ;;  %vm4_vm0 = vcmask 130048   ;;  %vm11_vm1 = vcmask 1048448   ;;  %vm18_vm2 = vcmask 917248   ;;  %vm25_vm3 = vcmask 786048   ;;  %s128_s0 = inlined_call_operand.vmem [shape: f32[16,16], index: 0, kind: input, shape index: {}]   ;;  %s129_s1 = inlined_call_operand.vmem [shape: f32[1,256], index: 1, kind: output, shape index: {}]  }
   0x1   :  { %v66_v0 = vld [vmem:[%s128_s0 + $0x7] ss:$8 sm:%s7_s6]   ;;  %s81_s10 = smov 112   ;;  %v68_v1 = vld [vmem:[%s128_s0 + $0x5] ss:$8 sm:%s21_s9]   ;;  %s14_s13 = smov 3 }
   0x2   :  { %9 = vrot.lane.b32.xlu0 %v66_v0, %s81_s10  ;;  %s82_s14 = smov 80   ;;  %v67_v2 = vld [vmem:[%s128_s0 + $0x6] ss:$8 sm:%s14_s13]   ;;  %s28_s17 = smov 3  ;;  %vm32_vm4 = vcmask 654848   ;;  %vm39_vm5 = vcmask 523648  }
   0x3   :  { %23 = vrot.lane.b32.xlu1 %v68_v1, %s82_s14  ;;  %v69_v3 = vld [vmem:[%s128_s0 + $0x4] ss:$8 sm:%s28_s17]   ;;  %s35_s20 = smov 3  ;;  %s42_s21 = smov 3  ;;  %vm46_vm6 = vcmask 392448   ;;  %vm53_vm7 = vcmask 261248  }
   0x4   :  { %s83_s22 = smov 96   ;;  %s84_s23 = smov 64   ;;  %v70_v4 = vld [vmem:[%s128_s0 + $0x3] ss:$8 sm:%s35_s20]   ;;  %v71_v5 = vld [vmem:[%s128_s0 + $0x2] ss:$8 sm:%s42_s21]  }
   0x5   :  { %s2_s26 = smov 3  ;;  %s49_s29 = smov 3 }
   0x6   :  { %16 = vrot.lane.b32.xlu0 %v67_v2, %s83_s22  ;;  %v3_v6 = vld [vmem:[%s128_s0] ss:$8 sm:%s2_s26]   ;;  %s85_s3 = smov 48   ;;  %s86_s4 = smov 32  }
   0x7   :  { %30 = vrot.lane.b32.xlu1 %v69_v3, %s84_s23  ;;  %5 = vst.msk [vmem:[#allocation0] ss:$8 sm:$0x3] %vm4_vm0, %v3_v6   ;;  %v72_v7 = vld [vmem:[%s128_s0 + $0x1] ss:$8 sm:%s49_s29]   ;;  %s87_s0 = smov 16  }
   0xa   :  { %37 = vrot.lane.b32.xlu0 %v70_v4, %s85_s3 }
   0xb   :  { %44 = vrot.lane.b32.xlu1 %v71_v5, %s86_s4 }
   0xe   :  { %51 = vrot.lane.b32.xlu0 %v72_v7, %s87_s0 }
  0x74   :  { %v10_v8 = vpop.permute.xlu0 %9  }
  0x75   :  { %12 = vst.msk [vmem:[#allocation0] ss:$8 sm:$0x3] %vm11_vm1, %v10_v8   ;;  %v24_v9 = vpop.permute.xlu1 %23  }
  0x78   :  { %v17_v10 = vpop.permute.xlu0 %16  }
  0x79   :  { %19 = vst.msk [vmem:[#allocation0] ss:$8 sm:$0x3] %vm18_vm2, %v17_v10   ;;  %v31_v11 = vpop.permute.xlu1 %30  }
  0x7a   :  { %26 = vst.msk [vmem:[#allocation0] ss:$8 sm:$0x3] %vm25_vm3, %v24_v9  }
  0x7b   :  { %33 = vst.msk [vmem:[#allocation0] ss:$8 sm:$0x3] %vm32_vm4, %v31_v11  }
  0x7c   :  { %v38_v12 = vpop.permute.xlu0 %37  }
  0x7d   :  { %40 = vst.msk [vmem:[#allocation0] ss:$8 sm:$0x3] %vm39_vm5, %v38_v12   ;;  %v45_v13 = vpop.permute.xlu1 %44  }
  0x7e   :  { %47 = vst.msk [vmem:[#allocation0] ss:$8 sm:$0x3] %vm46_vm6, %v45_v13  }
  0x80   :  { %v52_v14 = vpop.permute.xlu0 %51  }
  0x81   :  { %54 = vst.msk [vmem:[#allocation0] ss:$8 sm:$0x3] %vm53_vm7, %v52_v14  }
  0x88   :  { %v58_v15 = vld [vmem:[#allocation0] sm:$0x1]  ;;  %v62_v16 = vld [vmem:[#allocation0 + $0x8] sm:$0x1] }
  0x89   :  { %60 = vst [vmem:[%s129_s1] sm:$0x1] %v58_v15  ;;  %73 = vst [vmem:[%s129_s1 + $0x1] sm:$0x1] %v62_v16 }

// kernel: full_conv_patch_embedding_forward.4
= control target key start
LH: loop header
LB: loop body
LE: loop exit
PB: predicated region body
PF: predicated region fallthrough
CT: control target
= control target key end

     0   :  { %s2497_s21 = smov 0   ;;  %s3088_s0 = inlined_call_operand.vmem [shape: bf16[2,2,19,114], index: 0, kind: input, shape index: {}]   ;;  %s3089_s1 = inlined_call_operand.vmem [shape: bf16[7,114,256], index: 1, kind: input, shape index: {}]   ;;  %s3090_s2 = inlined_call_operand.vmem [shape: f32[256,8], index: 2, kind: input, shape index: {}]   ;;  %s3091_s3 = inlined_call_operand.vmem [shape: f32[8,256], index: 3, kind: input, shape index: {}]   ;;  %s3092_s4 = inlined_call_operand.vmem [shape: f32[1,256], index: 4, kind: input, shape index: {}]   ;;  %s3093_s5 = inlined_call_operand.vmem [shape: f32[1,256], index: 5, kind: input, shape index: {}]   ;;  %s3094_s6 = inlined_call_operand.vmem [shape: bf16[2,16,256], index: 6, kind: output, shape index: {}]  }
   0x1 LB: > { %s1863_s22 = sadd.s32 4294967295, %s2458_s21   ;;  %p1867_p0 = scmp.ge.s32.totalorder %s2458_s21, 1  ;;  %s2458_s21 = sphi %s2497_s21, %s16_s21  }
   0x2   : > { %p212_p1 = scmp.lt.s32.totalorder %s2458_s21, 3 }
   0x4   : > { %p213_p2 = pnand %p1867_p0, %p212_p1 }
   0x5   : > { %v2280_v0 = vld [vmem:[%s3089_s1 + $0xf4] ss:$8 sps:$4 sm:$0xff] (!%p213_p2)   ;;  %v2282_v1 = vld [vmem:[%s3089_s1 + $0xf0] ss:$8 sps:$4 sm:$0xff] (!%p213_p2)   ;;  %v2460_v2 = vmov (!%p213_p2), 0   ;;  %p242_p3 = scmp.lt.s32.totalorder (!%p213_p2), %s1863_s22, 1 }
   0x6   : > { %216 = sbr.rel (%p213_p2) target bundleno = 889 (0x379), region = 44  ;;  %711 = vmatprep.mubr.bf16.mxu0 (!%p213_p2), %v2460_v2  ;;  %412 = vmatprep.mubr.bf16.mxu1 (!%p213_p2), %v2460_v2  ;;  %v2283_v3 = vld [vmem:[%s3089_s1 + $0x104] ss:$8 sps:$4 sm:$0xff] (!%p213_p2)   ;;  %v2285_v4 = vld [vmem:[%s3089_s1 + $0x100] ss:$8 sps:$4 sm:$0xff] (!%p213_p2)   ;;  %vm916_vm0 = vcmask (!%p213_p2), 1046528  }
   0x7   : > { %679 = vmatprep.subr.bf16.mxu0 (!%p213_p2), %v2280_v0  ;;  %v2286_v5 = vld [vmem:[%s3089_s1 + $0x114] ss:$8 sps:$4 sm:$0xff] (!%p213_p2)   ;;  %v2288_v6 = vld [vmem:[%s3089_s1 + $0x110] ss:$8 sps:$4 sm:$0xff] (!%p213_p2)   ;;  %v2289_v7 = vld [vmem:[%s3089_s1 + $0x124] ss:$8 sps:$4 sm:$0xff] (!%p213_p2)  }
   0x8   : > { %680 = vmatpush1.bf16.msra.mxu0 (!%p213_p2), %v2282_v1  ;;  %v2291_v8 = vld [vmem:[%s3089_s1 + $0x120] ss:$8 sps:$4 sm:$0xff] (!%p213_p2)   ;;  %v2292_v9 = vld [vmem:[%s3089_s1 + $0x134] ss:$8 sps:$4 sm:$0xff] (!%p213_p2)   ;;  %v2294_v14 = vld [vmem:[%s3089_s1 + $0x130] ss:$8 sps:$4 sm:$0xff] (!%p213_p2)  }
   0x9   : > { %681 = vmatprep.subr.bf16.mxu0 (!%p213_p2), %v2283_v3  ;;  %v2295_v18 = vld [vmem:[%s3089_s1 + $0x144] ss:$8 sps:$4 sm:$0xff] (!%p213_p2)   ;;  %v2297_v20 = vld [vmem:[%s3089_s1 + $0x140] ss:$8 sps:$4 sm:$0xff] (!%p213_p2)   ;;  %v2298_v23 = vld [vmem:[%s3089_s1 + $0x154] ss:$8 sps:$4 sm:$0xff] (!%p213_p2)  }
   0xa   : > { %v2300_v24 = vld [vmem:[%s3089_s1 + $0x150] ss:$8 sps:$4 sm:$0xff] (!%p213_p2)   ;;  %v1940_v25 = vld [vmem:[%s3089_s1 + $0x160] sm:$0x11] (!%p213_p2)  ;;  %vm373_vm1 = vcmask (!%p213_p2), 1040384   ;;  %vm369_vm3 = vcmask (!%p213_p2), 932864  }
   0xb   : > { %v2329_v26 = vld [vmem:[%s3089_s1 + $0x7c] ss:$8 sps:$4 sm:$0xff] (!%p213_p2)   ;;  %v2331_v27 = vld [vmem:[%s3089_s1 + $0x78] ss:$8 sps:$4 sm:$0xff] (!%p213_p2)   ;;  %v1958_v31 = vcombine.high (!%p213_p2), %v1940_v25, %v1940_v25  ;;  %v1957_v32 = vcombine.low (!%p213_p2), %v1940_v25, %v1940_v25  ;;  %v2337_v33 = vld [vmem:[%s3089_s1 + $0x8c] ss:$8 sps:$4 sm:$0xff] (!%p213_p2)  }
   0xc   : > { %682 = vmatpush1.bf16.msra.mxu0 (!%p213_p2), %v2285_v4  ;;  %380 = vmatprep.subr.bf16.mxu1 (!%p213_p2), %v2329_v26  ;;  %v2339_v36 = vld [vmem:[%s3089_s1 + $0x88] ss:$8 sps:$4 sm:$0xff] (!%p213_p2)   ;;  %v2305_v38 = vld [vmem:[%s3089_s1 + $0x16c] ss:$8 sps:$4 sm:$0xff] (!%p213_p2)   ;;  %vm582_vm2 = vsmask.f32 (!%p213_p2), 7424 }
   0xd   : > { %s3096_s22 = smov (!%p242_p3, %s1863_s22), 1  ;;  %683 = vmatprep.subr.bf16.mxu0 %v2286_v5  ;;  %381 = vmatpush1.bf16.msra.mxu1 %v2331_v27  ;;  %v674_v37 = vsel %vm373_vm1, %v1957_v32, 0  ;;  %v2343_v39 = vld [vmem:[%s3089_s1 + $0x9c] ss:$8 sps:$4 sm:$0xff]   ;;  %v2345_v40 = vld [vmem:[%s3089_s1 + $0x98] ss:$8 sps:$4 sm:$0xff]  }
   0xe   : > { %s2269_s9 = smul.u32 24, %s3096_s22  ;;  %382 = vmatprep.subr.bf16.mxu1 %v2337_v33  ;;  %v2303_v41 = vld [vmem:[%s3089_s1 + $0x168] ss:$8 sps:$4 sm:$0xff]   ;;  %v2311_v43 = vld [vmem:[%s3089_s1 + $0x17c] ss:$8 sps:$4 sm:$0xff]   ;;  %vm1587_vm5 = vcmask 64512  }
   0xf   : > { %v2349_v44 = vld [vmem:[%s3089_s1 + $0xac] ss:$8 sps:$4 sm:$0xff]   ;;  %v2351_v45 = vld [vmem:[%s3089_s1 + $0xa8] ss:$8 sps:$4 sm:$0xff]   ;;  %v2355_v46 = vld [vmem:[%s3089_s1 + $0xbc] ss:$8 sps:$4 sm:$0xff]  }
  0x10   : > { %s2534_s16 = scalar_lea.vmem %s3088_s0, %s2269_s9  ;;  %684 = vmatpush1.bf16.msra.mxu0 %v2288_v6  ;;  %v2309_v47 = vld [vmem:[%s3089_s1 + $0x178] ss:$8 sps:$4 sm:$0xff]   ;;  %v2314_v48 = vld [vmem:[%s3089_s1 + $0x18c] ss:$8 sps:$4 sm:$0xff]   ;;  %v2312_v51 = vld [vmem:[%s3089_s1 + $0x188] ss:$8 sps:$4 sm:$0xff]  }
  0x11   : > { %685 = vmatprep.subr.bf16.mxu0 %v2289_v7  ;;  %v555_v10 = vld [vmem:[%s2534_s16] sm:$0xf]  ;;  %v556_v11 = vld [vmem:[%s2534_s16 + $0x4] sm:$0xf]  ;;  %383 = vmatpush1.bf16.msra.mxu1 %v2339_v36  ;;  %v2361_v50 = vld [vmem:[%s3089_s1 + $0xcc] ss:$8 sps:$4 sm:$0xff]  }
  0x12   : > { %v896_v12 = vld [vmem:[%s2534_s16] sm:$0xe]  ;;  %v1941_v15 = vcombine.low %v555_v10, %v556_v11  ;;  %v2307_v16 = vld [vmem:[%s2534_s16 + $0x8] ss:$0 sps:$4 sm:$0x11]   ;;  %384 = vmatprep.subr.bf16.mxu1 %v2343_v39  ;;  %v2380_v10 = vld [vmem:[%s2534_s16 + $0xc] sm:$0xff]  }
  0x13   : > { %v2545_v13 = vcombine.low %v896_v12, %v556_v11  ;;  %v918_v19 = vrot.slane %v2307_v16, 1  ;;  %v591_v30 = vshll.u32 %v2307_v16, 16  ;;  %v2357_v49 = vld [vmem:[%s3089_s1 + $0xb8] ss:$8 sps:$4 sm:$0xff]   ;;  %v2317_v52 = vld [vmem:[%s3089_s1 + $0x19c] ss:$8 sps:$4 sm:$0xff]  }
  0x14   : > { %686 = vmatpush1.bf16.msra.mxu0 %v2291_v8  ;;  %v586_v21 = vshll.u32 %v1941_v15, 16  ;;  %v584_v28 = vshrl.u32 %v1941_v15, 16  ;;  %v2315_v53 = vld [vmem:[%s3089_s1 + $0x198] ss:$8 sps:$4 sm:$0xff]   ;;  %v2363_v54 = vld [vmem:[%s3089_s1 + $0xc8] ss:$8 sps:$4 sm:$0xff]  }
  0x15   : > { %v917_v17 = vrot.slane %v2545_v13, 1  ;;  %687 = vmatprep.subr.bf16.mxu0 %v2292_v9  ;;  %v593_v35 = vrot.slane %v591_v30, 1  ;;  %385 = vmatpush1.bf16.msra.mxu1 %v2345_v40  ;;  %v2320_v55 = vld [vmem:[%s3089_s1 + $0x1ac] ss:$8 sps:$4 sm:$0xff]   ;;  %v2367_v56 = vld [vmem:[%s3089_s1 + $0xdc] ss:$8 sps:$4 sm:$0xff]  }
  0x16   : > { %v588_v29 = vrot.slane %v586_v21, 1  ;;  %386 = vmatprep.subr.bf16.mxu1 %v2349_v44  ;;  %v1961_v57 = vld [vmem:[%s2534_s16 + $0xc] sm:$0xf]  ;;  %v2646_v59 = vld [vmem:[%s2534_s16 + $0x10] sm:$0xf] }
  0x17   : > { %v2559_v22 = vsel %vm916_vm0, %v917_v17, %v918_v19  ;;  %v1887_v58 = vld [vmem:[%s3089_s1 + $0xe8] sm:$0x11]  ;;  %v2369_v60 = vld [vmem:[%s3089_s1 + $0xd8] ss:$8 sps:$4 sm:$0xff]   ;;  %v1979_v0 = vcombine.low %v1961_v57, %v2646_v59  ;;  %v2323_v1 = vld [vmem:[%s3089_s1 + $0x1bc] ss:$8 sps:$4 sm:$0xff]  }
  0x18   : > { %688 = vmatpush1.bf16.msra.mxu0 %v2294_v14  ;;  %v589_v34 = vor.u32 %v588_v29, %v584_v28  ;;  %v1904_v61 = vcombine.high %v1887_v58, %v1887_v58  ;;  %v1903_v62 = vcombine.low %v1887_v58, %v1887_v58  ;;  %v2318_v63 = vld [vmem:[%s3089_s1 + $0x1a8] ss:$8 sps:$4 sm:$0xff]   ;;  %v2321_v3 = vld [vmem:[%s3089_s1 + $0x1b8] ss:$8 sps:$4 sm:$0xff]   ;;  %v2326_v4 = vld [vmem:[%s3089_s1 + $0x1cc] ss:$8 sps:$4 sm:$0xff]  }
  0x19   : > { %689 = vmatprep.subr.bf16.mxu0 %v2295_v18  ;;  %387 = vmatpush1.bf16.msra.mxu1 %v2351_v45  ;;  %v2379_v6 = vld [vmem:[%s3089_s1 + $0x4] ss:$8 sps:$4 sm:$0xff]   ;;  %v2336_v7 = vld [vmem:[%s2534_s16 + $0x14] ss:$0 sps:$4 sm:$0x11]   ;;  %v756_v8 = vshll.u32 %v1979_v0, 16 }
  0x1a   : > { %v594_v42 = vsel %vm582_vm2, %v589_v34, %v593_v35  ;;  %388 = vmatprep.subr.bf16.mxu1 %v2355_v46  ;;  %v375_v5 = vsel %vm373_vm1, %v1903_v62, 0  ;;  %v1978_v9 = vld [vmem:[%s3089_s1 + $0x1d8] sm:$0x11]  ;;  %v2377_v11 = vld [vmem:[%s3089_s1] ss:$8 sps:$4 sm:$0xff]   ;;  %v754_v15 = vshrl.u32 %v1979_v0, 16 }
  0x1b   : > { %v2386_v12 = vld [vmem:[%s3089_s1 + $0x14] ss:$8 sps:$4 sm:$0xff]   ;;  %v2324_v14 = vld [vmem:[%s3089_s1 + $0x1c8] ss:$8 sps:$4 sm:$0xff]   ;;  %v758_v16 = vrot.slane %v756_v8, 1  ;;  %v761_v17 = vshll.u32 %v2336_v7, 16  ;;  %v1996_v18 = vcombine.high %v1978_v9, %v1978_v9  ;;  %v1995_v19 = vcombine.low %v1978_v9, %v1978_v9 }
  0x1c   : > { %690 = vmatpush1.bf16.msra.mxu0 %v2297_v20  ;;  %v2384_v20 = vld [vmem:[%s3089_s1 + $0x10] ss:$8 sps:$4 sm:$0xff]   ;;  %v2392_v21 = vld [vmem:[%s3089_s1 + $0x24] ss:$8 sps:$4 sm:$0xff]   ;;  %v2390_v27 = vld [vmem:[%s3089_s1 + $0x20] ss:$8 sps:$4 sm:$0xff]  }
  0x1d   : > { %691 = vmatprep.subr.bf16.mxu0 %v2298_v23  ;;  %389 = vmatpush1.bf16.msra.mxu1 %v2357_v49  ;;  %v759_v23 = vor.u32 %v758_v16, %v754_v15  ;;  %v844_v25 = vsel %vm373_vm1, %v1995_v19, 0  ;;  %v2334_v26 = vld [vmem:[%s3089_s1 + $0x1e4] ss:$8 sps:$4 sm:$0xff]   ;;  %v2398_v28 = vld [vmem:[%s3089_s1 + $0x34] ss:$8 sps:$4 sm:$0xff]   ;;  %v1072_v36 = vrot.slane %v2336_v7, 1 }
  0x1e   : > { %390 = vmatprep.subr.bf16.mxu1 %v2361_v50  ;;  %v2332_v29 = vld [vmem:[%s3089_s1 + $0x1e0] ss:$8 sps:$4 sm:$0xff]   ;;  %v2396_v32 = vld [vmem:[%s3089_s1 + $0x30] ss:$8 sps:$4 sm:$0xff]   ;;  %v2033_v33 = vld [vmem:[%s2534_s16 + $0xc] sm:$0xe] }
  0x1f   : > { %v2404_v34 = vld [vmem:[%s3089_s1 + $0x44] ss:$8 sps:$4 sm:$0xff]   ;;  %v2049_v35 = vcombine.low %v2033_v33, %v2646_v59  ;;  %v2402_v40 = vld [vmem:[%s3089_s1 + $0x40] ss:$8 sps:$4 sm:$0xff]   ;;  %v1230_v45 = vshll.u32 %v2545_v13, 16 }
  0x20   : > { %692 = vmatpush1.bf16.msra.mxu0 %v2300_v24  ;;  %v763_v24 = vrot.slane %v761_v17, 1  ;;  %v2346_v44 = vld [vmem:[%s3089_s1 + $0x200] ss:$8 sps:$4 sm:$0xff]   ;;  %v2354_v46 = vld [vmem:[%s3089_s1 + $0x214] ss:$8 sps:$4 sm:$0xff]  }
  0x21   : > { %1959 = vmatprep.subr.msk.bf16.mxu0 %vm373_vm1, %v1958_v31  ;;  %391 = vmatpush1.bf16.msra.mxu1 %v2363_v54  ;;  %v2342_v31 = vld [vmem:[%s3089_s1 + $0x1f4] ss:$8 sps:$4 sm:$0xff]   ;;  %v1071_v39 = vrot.slane %v2049_v35, 1  ;;  %v2352_v49 = vld [vmem:[%s3089_s1 + $0x210] ss:$8 sps:$4 sm:$0xff]  }
  0x22   : > { %392 = vmatprep.subr.bf16.mxu1 %v2367_v56  ;;  %v764_v30 = vsel %vm582_vm2, %v759_v23, %v763_v24  ;;  %v269_v50 = vld [vmem:[%s3089_s1 + $0x70] sm:$0x11]  ;;  %v2414_v54 = vld [vmem:[%s3089_s1 + $0x60] ss:$8 sps:$4 sm:$0xff]   ;;  %vm1225_vm4 = vsmask.f32 6400 }
  0x23   : > { %v1923_v57 = vcombine.high %v269_v50, %v269_v50  ;;  %v1922_v58 = vcombine.low %v269_v50, %v269_v50  ;;  %v2358_v59 = vld [vmem:[%s3089_s1 + $0x220] ss:$8 sps:$4 sm:$0xff]   ;;  %v2013_v7 = vld [vmem:[%s3089_s1 + $0x250] sm:$0x11]  ;;  %v2395_v17 = vld [vmem:[%s3089_s1 + $0x27c] ss:$8 sps:$4 sm:$0xff]  }
  0x24   : > { %694 = vmatpush1.bf16.msra.mxu0 %v674_v37  ;;  %v2340_v37 = vld [vmem:[%s3089_s1 + $0x1f0] ss:$8 sps:$4 sm:$0xff]   ;;  %v2370_v8 = vld [vmem:[%s3089_s1 + $0x240] ss:$8 sps:$4 sm:$0xff]   ;;  %v2030_v9 = vcombine.high %v2013_v7, %v2013_v7  ;;  %v2389_v15 = vld [vmem:[%s3089_s1 + $0x26c] ss:$8 sps:$4 sm:$0xff]  }
  0x25   : > { %849 = vmatprep.subr.bf16.mxu0 %v2305_v38  ;;  %393 = vmatpush1.bf16.msra.mxu1 %v2369_v60  ;;  %v2348_v38 = vld [vmem:[%s3089_s1 + $0x204] ss:$8 sps:$4 sm:$0xff]   ;;  %v2387_v16 = vld [vmem:[%s3089_s1 + $0x268] ss:$8 sps:$4 sm:$0xff]   ;;  %v2434_v35 = vld [vmem:[%s3089_s1 + $0x2f4] ss:$8 sps:$4 sm:$0xff]  }
  0x26   : > { %1905 = vmatprep.subr.msk.bf16.mxu1 %vm373_vm1, %v1904_v61  ;;  %v2399_v19 = vld [vmem:[%s3089_s1 + $0x288] ss:$8 sps:$4 sm:$0xff]   ;;  %v2413_v23 = vld [vmem:[%s3089_s1 + $0x2ac] ss:$8 sps:$4 sm:$0xff]  }
  0x27   : > { %1960 = vmatmul.mubr.msk.bf16.vlgmr.msra.gmra.mrb[0].mxu0 %vm369_vm3, %v594_v42  ;;  %v2410_v42 = vld [vmem:[%s3089_s1 + $0x54] ss:$8 sps:$4 sm:$0xff]   ;;  %v2411_v24 = vld [vmem:[%s3089_s1 + $0x2a8] ss:$8 sps:$4 sm:$0xff]   ;;  %v2431_v33 = vld [vmem:[%s3089_s1 + $0x2e4] ss:$8 sps:$4 sm:$0xff]  }
  0x28   : > { %850 = vmatpush1.bf16.msra.mxu0 %v2303_v41  ;;  %881 = vmatprep.mubr.bf16.mxu0 %v2460_v2  ;;  %v1227_v41 = vshrl.u32 %v2545_v13, 16  ;;  %v2416_v13 = vld [vmem:[%s3089_s1 + $0x64] ss:$8 sps:$4 sm:$0xff]  }
  0x29   : > { %851 = vmatprep.subr.bf16.mxu0 %v2311_v43  ;;  %395 = vmatpush1.bf16.msra.mxu1 %v375_v5  ;;  %v2733_v43 = vsel %vm916_vm0, %v1071_v39, %v1072_v36  ;;  %v2372_v5 = vld [vmem:[%s3089_s1 + $0x244] ss:$8 sps:$4 sm:$0xff]   ;;  %v2432_v36 = vld [vmem:[%s3089_s1 + $0x2f0] ss:$8 sps:$4 sm:$0xff]  }
  0x2a   : > { %512 = vmatprep.subr.bf16.mxu1 %v2379_v6  ;;  %v2424_v6 = vld [vmem:[%s2534_s16] sm:$0xff]   ;;  %v2438_v39 = vld [vmem:[%s3089_s1 + $0x310] ss:$8 sps:$4 sm:$0xff]  }
  0x2c   : > { %852 = vmatpush1.bf16.msra.mxu0 %v2309_v47  ;;  %1906 = vmatmul.mubr.msk.bf16.vlgmr.msra.gmra.mrb[0].mxu1 %vm369_vm3, %v2380_v10  ;;  %v2408_v47 = vld [vmem:[%s3089_s1 + $0x50] ss:$8 sps:$4 sm:$0xff]   ;;  %v2029_v10 = vcombine.low %v2013_v7, %v2013_v7 }
  0x2d   : > { %853 = vmatprep.subr.bf16.mxu0 %v2314_v48  ;;  %513 = vmatpush1.bf16.msra.mxu1 %v2377_v11  ;;  %v1229_v48 = vrot.slane %v1227_v41, 1  ;;  %v2441_v41 = vld [vmem:[%s3089_s1 + $0x320] ss:$8 sps:$4 sm:$0xff]  }
  0x2e   : > { %544 = vmatprep.mubr.bf16.mxu1 %v2460_v2  ;;  %514 = vmatprep.subr.bf16.mxu1 %v2386_v12  ;;  %v999_v11 = vsel %vm373_vm1, %v2029_v10, 0  ;;  %v2383_v12 = vld [vmem:[%s3089_s1 + $0x25c] ss:$8 sps:$4 sm:$0xff]  }
  0x30   : > { %854 = vmatpush1.bf16.msra.mxu0 %v2312_v51  ;;  %v2449_v51 = vld [vmem:[%s2534_s16 + $0x8] ss:$0 sps:$4 sm:$0x33]   ;;  %s2108_s16 = sshll.u32 %s3096_s22, 4 }
  0x31   : > { %855 = vmatprep.subr.bf16.mxu0 %v2317_v52  ;;  %515 = vmatpush1.bf16.msra.mxu1 %v2384_v20  ;;  %v1232_v52 = vrot.slane %v1230_v45, 2  ;;  %v1238_v56 = vshll.u32 %v2449_v51, 16  ;;  %v2407_v20 = vld [vmem:[%s3089_s1 + $0x29c] ss:$8 sps:$4 sm:$0xff]   ;;  %s251_s7 = scalar_lea.vmem %s3094_s6, %s2108_s16 }
  0x32   : > { %516 = vmatprep.subr.bf16.mxu1 %v2392_v21  ;;  %v2405_v21 = vld [vmem:[%s3089_s1 + $0x298] ss:$8 sps:$4 sm:$0xff]  }
  0x33   : > { %v1233_v60 = vor.u32 %v1232_v52, %v1229_v48  ;;  %v1240_v62 = vrot.slane %v1238_v56, 2  ;;  %v1422_v48 = vld [vmem:[%s3090_s2 + $0x80] sm:$0xff]  ;;  %v1424_v52 = vld [vmem:[%s3090_s2 + $0x90] sm:$0xff] }
  0x34   : > { %856 = vmatpush1.bf16.msra.mxu0 %v2315_v53  ;;  %v2360_v53 = vld [vmem:[%s3089_s1 + $0x224] ss:$8 sps:$4 sm:$0xff]   ;;  %v1408_v56 = vld [vmem:[%s3090_s2 + $0x10] sm:$0xff] }
  0x35   : > { %857 = vmatprep.subr.bf16.mxu0 %v2320_v55  ;;  %517 = vmatpush1.bf16.msra.mxu1 %v2390_v27  ;;  %v1235_v55 = vshrl.u32 %v2449_v51, 16  ;;  %v2417_v27 = vld [vmem:[%s3089_s1 + $0x2b8] ss:$8 sps:$4 sm:$0xff]   ;;  %v1407_v51 = vld [vmem:[%s3090_s2 + $0x8] sm:$0xff] }
  0x36   : > { %518 = vmatprep.subr.bf16.mxu1 %v2398_v28 }
  0x37   : > { %v1237_v61 = vrot.slane %v1235_v55, 1 }
  0x38   : > { %858 = vmatpush1.bf16.msra.mxu0 %v2318_v63  ;;  %v2366_v63 = vld [vmem:[%s3089_s1 + $0x234] ss:$8 sps:$4 sm:$0xff]  }
  0x39   : > { %859 = vmatprep.subr.bf16.mxu0 %v2323_v1  ;;  %519 = vmatpush1.bf16.msra.mxu1 %v2396_v32  ;;  %v1241_v0 = vor.u32 %v1240_v62, %v1237_v61  ;;  %v507_v1 = vsel %vm373_vm1, %v1922_v58, 0  ;;  %v2425_v32 = vld [vmem:[%s3089_s1 + $0x2d0] ss:$8 sps:$4 sm:$0xff]   ;;  %v1426_v58 = vld [vmem:[%s3090_s2 + $0xa0] sm:$0xff] }
  0x3a   : > { %520 = vmatprep.subr.bf16.mxu1 %v2404_v34  ;;  %v2429_v34 = vld [vmem:[%s3089_s1 + $0x2e0] ss:$8 sps:$4 sm:$0xff]  }
  0x3b   : > { %v1410_v62 = vld [vmem:[%s3090_s2 + $0x20] sm:$0xff] }
  0x3c   : > { %860 = vmatpush1.bf16.msra.mxu0 %v2321_v3  ;;  %v2364_v3 = vld [vmem:[%s3089_s1 + $0x230] ss:$8 sps:$4 sm:$0xff]  }
  0x3d   : > { %861 = vmatprep.subr.bf16.mxu0 %v2326_v4  ;;  %521 = vmatpush1.bf16.msra.mxu1 %v2402_v40  ;;  %v2772_v4 = vsel %vm1225_vm4, %v1233_v60, %v1241_v0  ;;  %v2443_v40 = vld [vmem:[%s3089_s1 + $0x324] ss:$8 sps:$4 sm:$0xff]  }
  0x3e   : > { %522 = vmatprep.subr.bf16.mxu1 %v2410_v42  ;;  %v2446_v42 = vld [vmem:[%s3089_s1 + $0x334] ss:$8 sps:$4 sm:$0xff]  }
  0x40   : > { %862 = vmatpush1.bf16.msra.mxu0 %v2324_v14  ;;  %v2381_v14 = vld [vmem:[%s3089_s1 + $0x258] ss:$8 sps:$4 sm:$0xff]  }
  0x41   : > { %1997 = vmatprep.subr.msk.bf16.mxu0 %vm373_vm1, %v1996_v18  ;;  %523 = vmatpush1.bf16.msra.mxu1 %v2408_v47  ;;  %v2393_v18 = vld [vmem:[%s3089_s1 + $0x278] ss:$8 sps:$4 sm:$0xff]  }
  0x42   : > { %524 = vmatprep.subr.bf16.mxu1 %v2416_v13  ;;  %v1406_v13 = vld [vmem:[%s3090_s2] sm:$0xff] }
  0x44   : > { %864 = vmatpush1.bf16.msra.mxu0 %v844_v25  ;;  %v2419_v25 = vld [vmem:[%s3089_s1 + $0x2bc] ss:$8 sps:$4 sm:$0xff]  }
  0x45   : > { %1004 = vmatprep.subr.bf16.mxu0 %v2334_v26  ;;  %525 = vmatpush1.bf16.msra.mxu1 %v2414_v54  ;;  %v2048_v26 = vld [vmem:[%s3089_s1 + $0x2c8] sm:$0x11]  ;;  %v2907_v54 = vpack.c.bf16 %v1407_v51, %v1406_v13 }
  0x46   : > { %1924 = vmatprep.subr.msk.bf16.mxu1 %vm373_vm1, %v1923_v57  ;;  %v2065_v28 = vcombine.high %v2048_v26, %v2048_v26  ;;  %v1409_v57 = vld [vmem:[%s3090_s2 + $0x18] sm:$0xff] }
  0x47   : > { %1998 = vmatmul.mubr.msk.bf16.vlgmr.msra.gmra.mrb[0].mxu0 %vm369_vm3, %v764_v30  ;;  %v2924_v60 = vpack.c.bf16 %v1409_v57, %v1408_v56 }
  0x48   : > { %1005 = vmatpush1.bf16.msra.mxu0 %v2332_v29  ;;  %1036 = vmatprep.mubr.bf16.mxu0 %v2460_v2  ;;  %v2064_v29 = vcombine.low %v2048_v26, %v2048_v26 }
  0x49   : > { %1006 = vmatprep.subr.bf16.mxu0 %v2342_v31  ;;  %527 = vmatpush1.bf16.msra.mxu1 %v507_v1  ;;  %v2427_v31 = vld [vmem:[%s3089_s1 + $0x2d4] ss:$8 sps:$4 sm:$0xff]  }
  0x4a   : > { %v1153_v30 = vsel %vm373_vm1, %v2064_v29, 0  ;;  %v1428_v1 = vld [vmem:[%s3090_s2 + $0xb0] sm:$0xff] }
  0x4b   : > { %v1420_v29 = vld [vmem:[%s3090_s2 + $0x70] sm:$0xff] }
  0x4c   : > { %1007 = vmatpush1.bf16.msra.mxu0 %v2340_v37  ;;  %1925 = vmatmul.mubr.msk.bf16.vlgmr.msra.gmra.mrb[0].mxu1 %vm369_vm3, %v2424_v6  ;;  %v2437_v37 = vld [vmem:[%s3089_s1 + $0x304] ss:$8 sps:$4 sm:$0xff]   ;;  %v1413_v6 = vld [vmem:[%s3090_s2 + $0x38] sm:$0xff] }
  0x4d   : > { %1008 = vmatprep.subr.bf16.mxu0 %v2348_v38  ;;  %v2440_v38 = vld [vmem:[%s3089_s1 + $0x314] ss:$8 sps:$4 sm:$0xff]  }
  0x50   : > { %1009 = vmatpush1.bf16.msra.mxu0 %v2346_v44  ;;  %v2444_v44 = vld [vmem:[%s3089_s1 + $0x330] ss:$8 sps:$4 sm:$0xff]  }
  0x51   : > { %1010 = vmatprep.subr.bf16.mxu0 %v2354_v46 }
  0x54   : > { %1011 = vmatpush1.bf16.msra.mxu0 %v2352_v49  ;;  %v1423_v49 = vld [vmem:[%s3090_s2 + $0x88] sm:$0xff] }
  0x55   : > { %1012 = vmatprep.subr.bf16.mxu0 %v2360_v53  ;;  %v2181_v50 = vpack.c.bf16 %v1423_v49, %v1422_v48  ;;  %v1425_v53 = vld [vmem:[%s3090_s2 + $0x98] sm:$0xff] }
  0x56   : > { %v2909_v55 = vpack.c.bf16 %v1425_v53, %v1424_v52 }
  0x57   : > { %2182 = vmatprep.subr.bf16.mxu1 %v2181_v50 }
  0x58   : > { %1013 = vmatpush1.bf16.msra.mxu0 %v2358_v59  ;;  %v1427_v59 = vld [vmem:[%s3090_s2 + $0xa8] sm:$0xff]  ;;  %2184 = vmatpush3.bf16.msra.mxu1 %v2907_v54 }
  0x59   : > { %1014 = vmatprep.subr.bf16.mxu0 %v2366_v63  ;;  %2186 = vmatprep.subr.bf16.mxu1 %v2909_v55  ;;  %v2927_v61 = vpack.c.bf16 %v1427_v59, %v1426_v58  ;;  %v1411_v63 = vld [vmem:[%s3090_s2 + $0x28] sm:$0xff] }
  0x5a   : > { %v2936_v0 = vpack.c.bf16 %v1411_v63, %v1410_v62 }
  0x5c   : > { %1015 = vmatpush1.bf16.msra.mxu0 %v2364_v3  ;;  %2188 = vmatpush3.bf16.msra.mxu1 %v2924_v60  ;;  %v1429_v3 = vld [vmem:[%s3090_s2 + $0xb8] sm:$0xff] }
  0x5d   : > { %1016 = vmatprep.subr.bf16.mxu0 %v2372_v5  ;;  %2190 = vmatprep.subr.bf16.mxu1 %v2927_v61  ;;  %v1412_v5 = vld [vmem:[%s3090_s2 + $0x30] sm:$0xff] }
  0x5e   : > { %v2954_v7 = vpack.c.bf16 %v1413_v6, %v1412_v5 }
  0x60   : > { %1017 = vmatpush1.bf16.msra.mxu0 %v2370_v8  ;;  %2192 = vmatpush3.bf16.msra.mxu1 %v2936_v0  ;;  %v1430_v8 = vld [vmem:[%s3090_s2 + $0xc0] sm:$0xff] }
  0x61   : > { %2031 = vmatprep.subr.msk.bf16.mxu0 %vm373_vm1, %v2030_v9  ;;  %v1431_v9 = vld [vmem:[%s3090_s2 + $0xc8] sm:$0xff] }
  0x62   : > { %v2964_v10 = vpack.c.bf16 %v1431_v9, %v1430_v8 }
  0x64   : > { %1019 = vmatpush1.bf16.msra.mxu0 %v999_v11  ;;  %v1414_v11 = vld [vmem:[%s3090_s2 + $0x40] sm:$0xff] }
  0x65   : > { %1158 = vmatprep.subr.bf16.mxu0 %v2383_v12  ;;  %v1415_v12 = vld [vmem:[%s3090_s2 + $0x48] sm:$0xff] }
  0x67   : > { %2032 = vmatmul.mubr.msk.bf16.vlgmr.msra.gmra.mrb[0].mxu0 %vm369_vm3, %v2559_v22  ;;  %v2401_v22 = vld [vmem:[%s3089_s1 + $0x28c] ss:$8 sps:$4 sm:$0xff]  }
  0x68   : > { %1159 = vmatpush1.bf16.msra.mxu0 %v2381_v14  ;;  %1190 = vmatprep.mubr.bf16.mxu0 %v2460_v2  ;;  %v2972_v14 = vpack.c.bf16 %v1415_v12, %v1414_v11 }
  0x69   : > { %1160 = vmatprep.subr.bf16.mxu0 %v2389_v15  ;;  %v1432_v15 = vld [vmem:[%s3090_s2 + $0xd0] sm:$0xff] }
  0x6c   : > { %1161 = vmatpush1.bf16.msra.mxu0 %v2387_v16  ;;  %v1433_v16 = vld [vmem:[%s3090_s2 + $0xd8] sm:$0xff] }
  0x6d   : > { %1162 = vmatprep.subr.bf16.mxu0 %v2395_v17  ;;  %v2982_v17 = vpack.c.bf16 %v1433_v16, %v1432_v15 }
  0x70   : > { %1163 = vmatpush1.bf16.msra.mxu0 %v2393_v18  ;;  %v1416_v18 = vld [vmem:[%s3090_s2 + $0x50] sm:$0xff] }
  0x71   : > { %1164 = vmatprep.subr.bf16.mxu0 %v2401_v22  ;;  %v1417_v22 = vld [vmem:[%s3090_s2 + $0x58] sm:$0xff] }
  0x74   : > { %1165 = vmatpush1.bf16.msra.mxu0 %v2399_v19  ;;  %v2990_v19 = vpack.c.bf16 %v1417_v22, %v1416_v18 }
  0x75   : > { %1166 = vmatprep.subr.bf16.mxu0 %v2407_v20  ;;  %v1434_v20 = vld [vmem:[%s3090_s2 + $0xe0] sm:$0xff] }
  0x78   : > { %1167 = vmatpush1.bf16.msra.mxu0 %v2405_v21  ;;  %v1435_v21 = vld [vmem:[%s3090_s2 + $0xe8] sm:$0xff] }
  0x79   : > { %1168 = vmatprep.subr.bf16.mxu0 %v2413_v23  ;;  %v3000_v23 = vpack.c.bf16 %v1435_v21, %v1434_v20 }
  0x7c   : > { %1169 = vmatpush1.bf16.msra.mxu0 %v2411_v24  ;;  %v1418_v24 = vld [vmem:[%s3090_s2 + $0x60] sm:$0xff] }
  0x7d   : > { %1170 = vmatprep.subr.bf16.mxu0 %v2419_v25  ;;  %v1419_v25 = vld [vmem:[%s3090_s2 + $0x68] sm:$0xff] }
  0x7e   : > { %v3008_v26 = vpack.c.bf16 %v1419_v25, %v1418_v24 }
  0x80   : > { %1171 = vmatpush1.bf16.msra.mxu0 %v2417_v27  ;;  %v1436_v27 = vld [vmem:[%s3090_s2 + $0xf0] sm:$0xff] }
  0x81   : > { %2066 = vmatprep.subr.msk.bf16.mxu0 %vm373_vm1, %v2065_v28  ;;  %v1437_v28 = vld [vmem:[%s3090_s2 + $0xf8] sm:$0xff] }
  0x84   : > { %1173 = vmatpush1.bf16.msra.mxu0 %v1153_v30  ;;  %v3021_v30 = vpack.c.bf16 %v1437_v28, %v1436_v27 }
  0x85   : > { %1327 = vmatprep.subr.bf16.mxu0 %v2427_v31  ;;  %v1421_v31 = vld [vmem:[%s3090_s2 + $0x78] sm:$0xff] }
  0x87   : > { %2067 = vmatmul.mubr.msk.bf16.vlgmr.msra.gmra.mrb[0].mxu0 %vm369_vm3, %v2733_v43  ;;  %v2082_v43 = vld [vmem:[%s3089_s1 + $0x340] sm:$0x11] }
  0x88   : > { %1328 = vmatpush1.bf16.msra.mxu0 %v2425_v32  ;;  %1359 = vmatprep.mubr.bf16.mxu0 %v2460_v2  ;;  %v2435_v2 = vld [vmem:[%s3089_s1 + $0x300] ss:$8 sps:$4 sm:$0xff]   ;;  %v2099_v45 = vcombine.high %v2082_v43, %v2082_v43  ;;  %v2098_v46 = vcombine.low %v2082_v43, %v2082_v43  ;;  %v3026_v32 = vpack.c.bf16 %v1421_v31, %v1420_v29 }
  0x89   : > { %1329 = vmatprep.subr.bf16.mxu0 %v2431_v33 }
  0x8a   : > { %v1322_v47 = vsel %vm373_vm1, %v2098_v46, 0 }
  0x8c   : > { %1330 = vmatpush1.bf16.msra.mxu0 %v2429_v34 }
  0x8d   : > { %1331 = vmatprep.subr.bf16.mxu0 %v2434_v35 }
  0x90   : > { %1332 = vmatpush1.bf16.msra.mxu0 %v2432_v36 }
  0x91   : > { %1333 = vmatprep.subr.bf16.mxu0 %v2437_v37 }
  0x94   : > { %1334 = vmatpush1.bf16.msra.mxu0 %v2435_v2 }
  0x95   : > { %1335 = vmatprep.subr.bf16.mxu0 %v2440_v38 }
  0x98   : > { %1336 = vmatpush1.bf16.msra.mxu0 %v2438_v39 }
  0x99   : > { %1337 = vmatprep.subr.bf16.mxu0 %v2443_v40 }
  0x9c   : > { %1338 = vmatpush1.bf16.msra.mxu0 %v2441_v41 }
  0x9d   : > { %1339 = vmatprep.subr.bf16.mxu0 %v2446_v42 }
  0xa0   : > { %1340 = vmatpush1.bf16.msra.mxu0 %v2444_v44 }
  0xa1   : > { %2100 = vmatprep.subr.msk.bf16.mxu0 %vm373_vm1, %v2099_v45 }
  0xa4   : > { %1342 = vmatpush1.bf16.msra.mxu0 %v1322_v47 }
  0xa7   : > { %2101 = vmatmul.mubr.msk.bf16.vlgmr.msra.gmra.mrb[0].mxu0 %vm369_vm3, %v2772_v4  ;;  %v2946_v4 = vpack.c.bf16 %v1429_v3, %v1428_v1 }
  0xa9   : > { %2194 = vmatprep.subr.bf16.mxu1 %v2946_v4 }
  0xaa   : > { %2196 = vmatpush3.bf16.msra.mxu1 %v2954_v7 }
  0xab   : > { %2198 = vmatprep.subr.bf16.mxu1 %v2964_v10 }
  0xae   : > { %2200 = vmatpush3.bf16.msra.mxu1 %v2972_v14 }
  0xaf   : > { %2202 = vmatprep.subr.bf16.mxu1 %v2982_v17 }
  0xb2   : > { %2204 = vmatpush3.bf16.msra.mxu1 %v2990_v19 }
  0xb3   : > { %2206 = vmatprep.subr.bf16.mxu1 %v3000_v23 }
  0xb6   : > { %2208 = vmatpush3.bf16.msra.mxu1 %v3008_v26 }
  0xb7   : > { %2210 = vmatprep.subr.bf16.mxu1 %v3021_v30 }
  0xba   : > { %2212 = vmatpush3.bf16.msra.mxu1 %v3026_v32 }
  0xbb   : > { %2214 = vmatprep.subr.bf16.mxu1 %v2181_v50 }
 0x11f   : > { %v546_v33 = vpop.f32.mrb[0].mxu1 }
 0x120   : > { %v548_v34 = vpop.f32.mrb[1].mxu1 }
 0x121   : > { %v550_v35 = vpop.f32.mrb[2].mxu1 }
 0x122   : > { %v552_v36 = vpop.f32.mrb[3].mxu1 }
 0x17a   : > { %v1361_v37 = vpop.f32.mrb[0].mxu0 }
 0x17b   : > { %v3030_v2 = vadd.f32 %v1361_v37, %v546_v33  ;;  %v1363_v38 = vpop.f32.mrb[1].mxu0 }
 0x17c   : > { %v3032_v39 = vadd.f32 %v1363_v38, %v548_v34  ;;  %v1365_v40 = vpop.f32.mrb[2].mxu0 }
 0x17d   : > { %v3034_v41 = vadd.f32 %v1365_v40, %v550_v35  ;;  %v1367_v42 = vpop.f32.mrb[3].mxu0  ;;  %v1388_v12 = vmul.f32 %v3030_v2, %v3030_v2 }
 0x17e   : > { %v3036_v43 = vadd.f32 %v1367_v42, %v552_v36  ;;  %v1389_v45 = vmul.f32 %v3032_v39, %v3032_v39  ;;  %v1774_v42 = vld [vmem:[%s3093_s5] sm:$0x3] }
 0x17f   : > { %v1374_v44 = vadd.f32 %v3034_v41, %v3030_v2  ;;  %v1390_v11 = vmul.f32 %v3034_v41, %v3034_v41 }
 0x180   : > { %v1381_v46 = vadd.f32 %v3036_v43, %v3032_v39  ;;  %v1391_v47 = vmul.f32 %v3036_v43, %v3036_v43 }
 0x181   : > { %v1375_v48 = vrot.slane %v1374_v44, 4  ;;  %v1392_v15 = vadd.f32 %v1390_v11, %v1388_v12 }
 0x182   : > { %v1382_v49 = vrot.slane %v1381_v46, 4  ;;  %v1399_v13 = vadd.f32 %v1391_v47, %v1389_v45 }
 0x183   : > { %v1376_v50 = vadd.f32 %v1375_v48, %v1374_v44  ;;  %v1393_v16 = vrot.slane %v1392_v15, 4 }
 0x184   : > { %v1383_v51 = vadd.f32 %v1382_v49, %v1381_v46  ;;  %v1400_v52 = vrot.slane %v1399_v13, 4 }
 0x185   : > { %v1377_v53 = vrot.slane %v1376_v50, 2 }
 0x186   : > { %v1384_v56 = vrot.slane %v1383_v51, 2  ;;  %v1401_v57 = vadd.f32 %v1400_v52, %v1399_v13 }
 0x187   : > { %v1378_v58 = vadd.f32 %v1377_v53, %v1376_v50 }
 0x188   : > { %v1385_v59 = vadd.f32 %v1384_v56, %v1383_v51  ;;  %v1402_v62 = vrot.slane %v1401_v57, 2 }
 0x189   : > { %v1379_v63 = vrot.slane %v1378_v58, 1 }
 0x18a   : > { %v1386_v1 = vrot.slane %v1385_v59, 1  ;;  %v1403_v3 = vadd.f32 %v1402_v62, %v1401_v57 }
 0x18b   : > { %v1380_v8 = vadd.f32 %v1379_v63, %v1378_v58 }
 0x18c   : > { %v1387_v5 = vadd.f32 %v1386_v1, %v1385_v59  ;;  %v1404_v6 = vrot.slane %v1403_v3, 1 }
 0x18e   : > { %1502 = vmatprep.mubr.f32.mxu1 %v1387_v5  ;;  %v1405_v9 = vadd.f32 %v1404_v6, %v1403_v3 }
 0x18f   : > { %1503 = vmatmul.mubr.f32.vlgmr.msra.gmra.mrb[4].mxu1 %v1380_v8 }
 0x190   : > { %2216 = vmatpush3.bf16.msra.mxu1 %v2907_v54  ;;  %1572 = vmatprep.mubr.f32.mxu1 %v1405_v9  ;;  %v1394_v54 = vadd.f32 %v1393_v16, %v1392_v15 }
 0x191   : > { %2218 = vmatprep.subr.bf16.mxu1 %v2909_v55 }
 0x192   : > { %v1395_v55 = vrot.slane %v1394_v54, 2 }
 0x194   : > { %2220 = vmatpush3.bf16.msra.mxu1 %v2924_v60  ;;  %v1396_v60 = vadd.f32 %v1395_v55, %v1394_v54 }
 0x195   : > { %2222 = vmatprep.subr.bf16.mxu1 %v2927_v61 }
 0x196   : > { %v1397_v61 = vrot.slane %v1396_v60, 1 }
 0x198   : > { %2224 = vmatpush3.bf16.msra.mxu1 %v2936_v0  ;;  %v1398_v0 = vadd.f32 %v1397_v61, %v1396_v60 }
 0x199   : > { %2226 = vmatprep.subr.bf16.mxu1 %v2946_v4  ;;  %v1586_v4 = vld [vmem:[%s3091_s3 + $0x8] sm:$0xff] }
 0x19c   : > { %2228 = vmatpush3.bf16.msra.mxu1 %v2954_v7  ;;  %v1585_v7 = vld [vmem:[%s3091_s3] sm:$0xff] }
 0x19d   : > { %2230 = vmatprep.subr.bf16.mxu1 %v2964_v10  ;;  %v2461_v10 = vmov 0.0  }
 0x1a0   : > { %2232 = vmatpush3.bf16.msra.mxu1 %v2972_v14 }
 0x1a1   : > { %2234 = vmatprep.subr.bf16.mxu1 %v2982_v17 }
 0x1a4   : > { %2236 = vmatpush3.bf16.msra.mxu1 %v2990_v19 }
 0x1a5   : > { %2238 = vmatprep.subr.bf16.mxu1 %v3000_v23 }
 0x1a8   : > { %2240 = vmatpush3.bf16.msra.mxu1 %v3008_v26 }
 0x1a9   : > { %2242 = vmatprep.subr.bf16.mxu1 %v3021_v30  ;;  %v1736_v30 = vlaneseq }
 0x1ab   : > { %v1737_v31 = vshrl.u32 %v1736_v30, 7 }
 0x1ac   : > { %2244 = vmatpush3.bf16.msra.mxu1 %v3026_v32  ;;  %v1748_v32 = vld [vmem:[%s3092_s4] sm:$0x3] }
 0x1ad   : > { %1591 = vmatprep.subr.mxu1 %v1586_v4  ;;  %v1756_v33 = vsub.s32 1, %v1737_v31  ;;  %v1738_v34 = vsub.s32 0, %v1737_v31 }
 0x1af   : > { %1573 = vmatmul.mubr.f32.vlgmr.msra.gmra.mrb[6].mxu1 %v1398_v0  ;;  %v1753_v35 = vrot.slane %v1748_v32, %v1738_v34  ;;  %v1757_v36 = vrot.slane %v1748_v32, %v1756_v33  ;;  %v1779_v13 = vrot.slane %v1774_v42, %v1738_v34  ;;  %v1783_v53 = vrot.slane %v1774_v42, %v1756_v33 }
 0x1b0   : > { %1592 = vmatpush1.msra.mxu1 %v1585_v7  ;;  %1655 = vmatprep.mubr.f32.mxu1 %v2461_v10 }
 0x1b1   : > { %1665 = vmatprep.subr.mxu1 %v1586_v4 }
 0x262   : > { %v2143_v14 = vpop.f32.mrb[4].mxu1 }
 0x263   : > { %v2144_v17 = vpop.f32.mrb[5].mxu1 }
 0x264   : > { %v2145_v18 = vadd.f32 %v2144_v17, %v2143_v14 }
 0x266   : > { %v1579_v22 = vmul.f32 0.001953125, %v2145_v18 }
 0x268   : > { %2102 = vmatmul.mubr.msk.f32.vlgmr.msra.gmra.mrb[8].mxu1 %vm1587_vm5, %v1579_v22  ;;  %v1581_v23 = vmul.f32 %v1579_v22, %v1579_v22 }
 0x269   : > { %1666 = vmatpush1.msra.mxu1 %v1585_v7  ;;  %1729 = vmatprep.mubr.f32.mxu1 %v2461_v10 }
 0x282   : > { %v2178_v19 = vpop.f32.mrb[6].mxu1 }
 0x283   : > { %v2179_v20 = vpop.f32.mrb[7].mxu1 }
 0x284   : > { %v2180_v21 = vadd.f32 %v2179_v20, %v2178_v19 }
 0x286   : > { %v1580_v24 = vmul.f32 0.001953125, %v2180_v21 }
 0x288   : > { %v1582_v25 = vsub.f32 %v1580_v24, %v1581_v23 }
 0x28a   : > { %v1583_v26 = vadd.f32 1e-05, %v1582_v25 }
 0x28c   : > { %2450 = vrsqrt.f32 %v1583_v26 }
 0x296   : > { %v2451_v27 = vpop.eup %2450 }
 0x297   : > { %2103 = vmatmul.mubr.msk.f32.vlgmr.msra.gmra.mrb[10].mxu1 %vm1587_vm5, %v2451_v27 }
 0x33b   : > { %v1657_v28 = vpop.f32.mrb[8].mxu1 }
 0x33c   : > { %v1659_v29 = vpop.f32.mrb[9].mxu1  ;;  %v1739_v37 = vrot.slane %v1657_v28, %v1738_v34 }
 0x33d   : > { %v1743_v38 = vrot.slane %v1659_v29, %v1738_v34 }
 0x33e   : > { %v1744_v47 = vsub.f32 %v3030_v2, %v1739_v37  ;;  %v1746_v48 = vsub.f32 %v3034_v41, %v1739_v37 }
 0x33f   : > { %v1745_v50 = vsub.f32 %v3032_v39, %v1743_v38  ;;  %v1747_v51 = vsub.f32 %v3036_v43, %v1743_v38 }
 0x36a   : > { %v1731_v40 = vpop.f32.mrb[10].mxu1 }
 0x36b   : > { %v1760_v44 = vmul.f32 %v1753_v35, %v1731_v40  ;;  %v1733_v45 = vpop.f32.mrb[11].mxu1 }
 0x36c   : > { %v1761_v46 = vmul.f32 %v1757_v36, %v1733_v45 }
 0x36d   : > { %v1765_v49 = vrot.slane %v1760_v44, %v1738_v34 }
 0x36e   : > { %v1769_v52 = vrot.slane %v1761_v46, %v1738_v34 }
 0x36f   : > { %v1770_v56 = vmul.f32 %v1765_v49, %v1744_v47  ;;  %v1772_v57 = vmul.f32 %v1765_v49, %v1746_v48 }
 0x370   : > { %v1771_v58 = vmul.f32 %v1769_v52, %v1745_v50  ;;  %v1773_v59 = vmul.f32 %v1769_v52, %v1747_v51 }
 0x371   : > { %v1786_v62 = vadd.f32 %v1779_v13, %v1770_v56  ;;  %v1788_v63 = vadd.f32 %v1779_v13, %v1772_v57 }
 0x372   : > { %v1787_v1 = vadd.f32 %v1783_v53, %v1771_v58  ;;  %v1789_v3 = vadd.f32 %v1783_v53, %v1773_v59 }
 0x373   : > { %v1790_v2 = vmax.f32 %v1786_v62, 0.0  ;;  %v1792_v5 = vmax.f32 %v1788_v63, 0.0 }
 0x374   : > { %v1791_v41 = vmax.f32 %v1787_v1, 0.0  ;;  %v1793_v6 = vmax.f32 %v1789_v3, 0.0 }
 0x376   : > { %v2109_v39 = vpack.c.bf16 %v1791_v41, %v1790_v2  ;;  %v2110_v43 = vpack.c.bf16 %v1793_v6, %v1792_v5 }
 0x378   : > { %1806 = vst [vmem:[%s251_s7] sm:$0xff] %v2109_v39  ;;  %1807 = vst [vmem:[%s251_s7 + $0x8] sm:$0xff] %v2110_v43 }
 0x379 PF: > { %s16_s21 = sadd.s32 1, %s2458_s21  }
 0x37a   : > { %p13_p4 = scmp.ge.s32.totalorder %s16_s21, 4  }
 0x37c   :  { %15 = sbr.rel (!%p13_p4) target bundleno = 1 (0x1), region = 81 }

// kernel: tile.63
= control target key start
LH: loop header
LB: loop body
LE: loop exit
PB: predicated region body
PF: predicated region fallthrough
CT: control target
= control target key end

     0   :  { %s22_s0 = inlined_call_operand.vmem [shape: s32[32], index: 0, kind: input, shape index: {}]   ;;  %s23_s1 = inlined_call_operand.vmem [shape: s32[8,32], index: 1, kind: output, shape index: {}]  }
   0x1   :  { %v4_v0 = vld [vmem:[%s22_s0] ss:$0 sm:$0xff] }
   0x2   :  { %5 = vst [vmem:[%s23_s1] sm:$0xff] %v4_v0 }

// kernel: eq.71
= control target key start
LH: loop header
LB: loop body
LE: loop exit
PB: predicated region body
PF: predicated region fallthrough
CT: control target
= control target key end

     0   :  { %s7_s6 = smov 3  ;;  %s14_s9 = smov 3  ;;  %vm4_vm0 = vcmask 261120   ;;  %vm11_vm1 = vcmask 1048320   ;;  %vm18_vm2 = vcmask 785920   ;;  %vm25_vm3 = vcmask 523520   ;;  %s67_s0 = inlined_call_operand.vmem [shape: s32[8,32], index: 0, kind: input, shape index: {}]   ;;  %s68_s1 = inlined_call_operand.vmem [shape: s32[256], index: 1, kind: output, shape index: {}]  }
   0x1   :  { %v33_v0 = vld [vmem:[%s67_s0 + $0x3] ss:$4 sm:%s7_s6]   ;;  %s39_s10 = smov 96   ;;  %s21_s11 = smov 3  ;;  %v34_v1 = vld [vmem:[%s67_s0 + $0x2] ss:$4 sm:%s14_s9]  }
   0x2   :  { %9 = vrot.lane.b32.xlu0 %v33_v0, %s39_s10  ;;  %v35_v2 = vld [vmem:[%s67_s0 + $0x1] ss:$4 sm:%s21_s11]   ;;  %s2_s16 = smov 3  ;;  %s40_s17 = smov 32  }
   0x3   :  { %23 = vrot.lane.b32.xlu1 %v35_v2, %s40_s17  ;;  %v3_v3 = vld [vmem:[%s67_s0] ss:$4 sm:%s2_s16]   ;;  %s41_s0 = smov 64  }
   0x4   :  { %5 = vst.msk [vmem:[#allocation0] sm:$0x3] %vm4_vm0, %v3_v3  }
   0x6   :  { %16 = vrot.lane.b32.xlu0 %v34_v1, %s41_s0 }
  0x74   :  { %v10_v4 = vpop.permute.xlu0 %9  }
  0x75   :  { %12 = vst.msk [vmem:[#allocation0] sm:$0x3] %vm11_vm1, %v10_v4   ;;  %v24_v5 = vpop.permute.xlu1 %23  }
  0x78   :  { %v17_v6 = vpop.permute.xlu0 %16  }
  0x79   :  { %19 = vst.msk [vmem:[#allocation0] sm:$0x3] %vm18_vm2, %v17_v6  }
  0x7a   :  { %26 = vst.msk [vmem:[#allocation0] sm:$0x3] %vm25_vm3, %v24_v5  }
  0x81   :  { %v30_v7 = vld [vmem:[#allocation0] sm:$0x3] }
  0x82   :  { %32 = vst [vmem:[%s68_s1] sm:$0x3] %v30_v7 }

// kernel: tile.68
= control target key start
LH: loop header
LB: loop body
LE: loop exit
PB: predicated region body
PF: predicated region fallthrough
CT: control target
= control target key end

     0   :  { %s22_s0 = inlined_call_operand.vmem [shape: f32[32], index: 0, kind: input, shape index: {}]   ;;  %s23_s1 = inlined_call_operand.vmem [shape: f32[8,32], index: 1, kind: output, shape index: {}]  }
   0x1   :  { %v4_v0 = vld [vmem:[%s22_s0] ss:$0 sm:$0xff] }
   0x2   :  { %5 = vst [vmem:[%s23_s1] sm:$0xff] %v4_v0 }

// kernel: tile.69
= control target key start
LH: loop header
LB: loop body
LE: loop exit
PB: predicated region body
PF: predicated region fallthrough
CT: control target
= control target key end

     0   :  { %s7_s6 = smov 3  ;;  %s14_s9 = smov 3  ;;  %vm4_vm0 = vcmask 261120   ;;  %vm11_vm1 = vcmask 1048320   ;;  %vm18_vm2 = vcmask 785920   ;;  %vm25_vm3 = vcmask 523520   ;;  %s76_s0 = inlined_call_operand.vmem [shape: f32[8,32], index: 0, kind: input, shape index: {}]   ;;  %s77_s1 = inlined_call_operand.vmem [shape: f32[1,256], index: 1, kind: output, shape index: {}]  }
   0x1   :  { %v38_v0 = vld [vmem:[%s76_s0 + $0x3] ss:$4 sm:%s7_s6]   ;;  %s45_s10 = smov 96   ;;  %s21_s11 = smov 3  ;;  %v39_v1 = vld [vmem:[%s76_s0 + $0x2] ss:$4 sm:%s14_s9]  }
   0x2   :  { %9 = vrot.lane.b32.xlu0 %v38_v0, %s45_s10  ;;  %v40_v2 = vld [vmem:[%s76_s0 + $0x1] ss:$4 sm:%s21_s11]   ;;  %s2_s16 = smov 3  ;;  %s46_s17 = smov 32  }
   0x3   :  { %23 = vrot.lane.b32.xlu1 %v40_v2, %s46_s17  ;;  %v3_v3 = vld [vmem:[%s76_s0] ss:$4 sm:%s2_s16]   ;;  %s47_s0 = smov 64  }
   0x4   :  { %5 = vst.msk [vmem:[#allocation0] ss:$8 sm:$0x3] %vm4_vm0, %v3_v3  }
   0x6   :  { %16 = vrot.lane.b32.xlu0 %v39_v1, %s47_s0 }
  0x74   :  { %v10_v4 = vpop.permute.xlu0 %9  }
  0x75   :  { %12 = vst.msk [vmem:[#allocation0] ss:$8 sm:$0x3] %vm11_vm1, %v10_v4   ;;  %v24_v5 = vpop.permute.xlu1 %23  }
  0x78   :  { %v17_v6 = vpop.permute.xlu0 %16  }
  0x79   :  { %19 = vst.msk [vmem:[#allocation0] ss:$8 sm:$0x3] %vm18_vm2, %v17_v6  }
  0x7a   :  { %26 = vst.msk [vmem:[#allocation0] ss:$8 sm:$0x3] %vm25_vm3, %v24_v5  }
  0x81   :  { %v30_v7 = vld [vmem:[#allocation0] sm:$0x1]  ;;  %v34_v8 = vld [vmem:[#allocation0 + $0x8] sm:$0x1] }
  0x82   :  { %32 = vst [vmem:[%s77_s1] sm:$0x1] %v30_v7  ;;  %41 = vst [vmem:[%s77_s1 + $0x1] sm:$0x1] %v34_v8 }

// kernel: full_conv_patch_embedding_forward.5
= control target key start
LH: loop header
LB: loop body
LE: loop exit
PB: predicated region body
PF: predicated region fallthrough
CT: control target
= control target key end

     0   :  { %s2286_s21 = smov 0   ;;  %s2827_s0 = inlined_call_operand.vmem [shape: bf16[2,2,9,288], index: 0, kind: input, shape index: {}]   ;;  %s2828_s1 = inlined_call_operand.vmem [shape: bf16[3,288,256], index: 1, kind: input, shape index: {}]   ;;  %s2829_s2 = inlined_call_operand.vmem [shape: f32[256,8], index: 2, kind: input, shape index: {}]   ;;  %s2830_s3 = inlined_call_operand.vmem [shape: f32[8,256], index: 3, kind: input, shape index: {}]   ;;  %s2831_s4 = inlined_call_operand.vmem [shape: f32[1,256], index: 4, kind: input, shape index: {}]   ;;  %s2832_s5 = inlined_call_operand.vmem [shape: f32[1,256], index: 5, kind: input, shape index: {}]   ;;  %s2833_s6 = inlined_call_operand.vmem [shape: bf16[2,8,256], index: 6, kind: output, shape index: {}]  }
   0x1 LB: > { %s1696_s22 = sadd.s32 4294967295, %s2247_s21   ;;  %p1700_p0 = scmp.ge.s32.totalorder %s2247_s21, 1  ;;  %s2247_s21 = sphi %s2286_s21, %s16_s21  }
   0x2   : > { %p212_p1 = scmp.lt.s32.totalorder %s2247_s21, 3 }
   0x4   : > { %p213_p2 = pnand %p1700_p0, %p212_p1 }
   0x5   : > { %v2068_v0 = vld [vmem:[%s2828_s1 + $0x4] ss:$8 sps:$4 sm:$0xff] (!%p213_p2)   ;;  %v2070_v1 = vld [vmem:[%s2828_s1] ss:$8 sps:$4 sm:$0xff] (!%p213_p2)   ;;  %v2071_v2 = vld [vmem:[%s2828_s1 + $0x14] ss:$8 sps:$4 sm:$0xff] (!%p213_p2)  }
   0x6   : > { %216 = sbr.rel (%p213_p2) target bundleno = 876 (0x36c), region = 44  ;;  %800 = vmatprep.subr.bf16.mxu0 (!%p213_p2), %v2068_v0  ;;  %v2073_v3 = vld [vmem:[%s2828_s1 + $0x10] ss:$8 sps:$4 sm:$0xff] (!%p213_p2)   ;;  %v2074_v4 = vld [vmem:[%s2828_s1 + $0x24] ss:$8 sps:$4 sm:$0xff] (!%p213_p2)   ;;  %p242_p3 = scmp.lt.s32.totalorder (!%p213_p2), %s1696_s22, 1 }
   0x7   : > { %801 = vmatpush1.bf16.msra.mxu0 (!%p213_p2), %v2070_v1  ;;  %v2076_v5 = vld [vmem:[%s2828_s1 + $0x20] ss:$8 sps:$4 sm:$0xff] (!%p213_p2)   ;;  %v2077_v6 = vld [vmem:[%s2828_s1 + $0x34] ss:$8 sps:$4 sm:$0xff] (!%p213_p2)   ;;  %v2079_v7 = vld [vmem:[%s2828_s1 + $0x30] ss:$8 sps:$4 sm:$0xff] (!%p213_p2)  }
   0x8   : > { %802 = vmatprep.subr.bf16.mxu0 (!%p213_p2), %v2071_v2  ;;  %v2080_v8 = vld [vmem:[%s2828_s1 + $0x44] ss:$8 sps:$4 sm:$0xff] (!%p213_p2)   ;;  %v2082_v9 = vld [vmem:[%s2828_s1 + $0x40] ss:$8 sps:$4 sm:$0xff] (!%p213_p2)   ;;  %v2083_v10 = vld [vmem:[%s2828_s1 + $0x54] ss:$8 sps:$4 sm:$0xff] (!%p213_p2)  }
   0x9   : > { %v2085_v11 = vld [vmem:[%s2828_s1 + $0x50] ss:$8 sps:$4 sm:$0xff] (!%p213_p2)   ;;  %v2086_v12 = vld [vmem:[%s2828_s1 + $0x64] ss:$8 sps:$4 sm:$0xff] (!%p213_p2)   ;;  %v2118_v14 = vld [vmem:[%s2828_s1 + $0x120] ss:$8 sps:$4 sm:$0xff] (!%p213_p2)  }
   0xa   : > { %v2115_v13 = vld [vmem:[%s2828_s1 + $0x124] ss:$8 sps:$4 sm:$0xff] (!%p213_p2)   ;;  %v2088_v16 = vld [vmem:[%s2828_s1 + $0x60] ss:$8 sps:$4 sm:$0xff] (!%p213_p2)   ;;  %v2089_v18 = vld [vmem:[%s2828_s1 + $0x74] ss:$8 sps:$4 sm:$0xff] (!%p213_p2)  }
   0xb   : > { %803 = vmatpush1.bf16.msra.mxu0 (!%p213_p2), %v2073_v3  ;;  %525 = vmatprep.subr.bf16.mxu1 (!%p213_p2), %v2115_v13  ;;  %v2124_v19 = vld [vmem:[%s2828_s1 + $0x134] ss:$8 sps:$4 sm:$0xff] (!%p213_p2)   ;;  %v2126_v20 = vld [vmem:[%s2828_s1 + $0x130] ss:$8 sps:$4 sm:$0xff] (!%p213_p2)   ;;  %v2127_v22 = vld [vmem:[%s2828_s1 + $0x144] ss:$8 sps:$4 sm:$0xff] (!%p213_p2)  }
   0xc   : > { %804 = vmatprep.subr.bf16.mxu0 (!%p213_p2), %v2074_v4  ;;  %526 = vmatpush1.bf16.msra.mxu1 (!%p213_p2), %v2118_v14  ;;  %v2091_v21 = vld [vmem:[%s2828_s1 + $0x70] ss:$8 sps:$4 sm:$0xff] (!%p213_p2)   ;;  %v2092_v23 = vld [vmem:[%s2828_s1 + $0x84] ss:$8 sps:$4 sm:$0xff] (!%p213_p2)   ;;  %v2129_v24 = vld [vmem:[%s2828_s1 + $0x140] ss:$8 sps:$4 sm:$0xff] (!%p213_p2)  }
   0xd   : > { %s2835_s22 = smov (!%p242_p3, %s1696_s22), 1  ;;  %527 = vmatprep.subr.bf16.mxu1 %v2124_v19  ;;  %v2133_v25 = vld [vmem:[%s2828_s1 + $0x154] ss:$8 sps:$4 sm:$0xff]   ;;  %v2094_v26 = vld [vmem:[%s2828_s1 + $0x80] ss:$8 sps:$4 sm:$0xff]   ;;  %v2249_v2 = vmov 0  }
   0xe   : > { %s2057_s19 = smul.u32 48, %s2835_s22  ;;  %v2095_v27 = vld [vmem:[%s2828_s1 + $0x94] ss:$8 sps:$4 sm:$0xff]   ;;  %v2135_v28 = vld [vmem:[%s2828_s1 + $0x150] ss:$8 sps:$4 sm:$0xff]   ;;  %vm521_vm0 = vcmask 261120  }
   0xf   : > { %805 = vmatpush1.bf16.msra.mxu0 %v2076_v5  ;;  %v2140_v29 = vld [vmem:[%s2828_s1 + $0x164] ss:$8 sps:$4 sm:$0xff]   ;;  %v2097_v30 = vld [vmem:[%s2828_s1 + $0x90] ss:$8 sps:$4 sm:$0xff]   ;;  %v2142_v32 = vld [vmem:[%s2828_s1 + $0x160] ss:$8 sps:$4 sm:$0xff]  }
  0x10   : > { %806 = vmatprep.subr.bf16.mxu0 %v2077_v6  ;;  %s2336_s28 = scalar_lea.vmem %s2827_s0, %s2057_s19  ;;  %528 = vmatpush1.bf16.msra.mxu1 %v2126_v20  ;;  %v2098_v31 = vld [vmem:[%s2828_s1 + $0xa4] ss:$8 sps:$4 sm:$0xff]   ;;  %v2146_v33 = vld [vmem:[%s2828_s1 + $0x174] ss:$8 sps:$4 sm:$0xff]   ;;  %v2100_v34 = vld [vmem:[%s2828_s1 + $0xa0] ss:$8 sps:$4 sm:$0xff]  }
  0x11   : > { %v2348_v15 = vld [vmem:[%s2336_s28] sm:$0xff]  ;;  %529 = vmatprep.subr.bf16.mxu1 %v2127_v22  ;;  %v2101_v35 = vld [vmem:[%s2828_s1 + $0xb4] ss:$8 sps:$4 sm:$0xff]   ;;  %v2148_v36 = vld [vmem:[%s2828_s1 + $0x170] ss:$8 sps:$4 sm:$0xff]   ;;  %vm1433_vm1 = vcmask 64512  }
  0x12   : > { %v1783_v17 = vcombine.high %v2348_v15, %v2348_v15  ;;  %v2152_v37 = vld [vmem:[%s2828_s1 + $0x184] ss:$8 sps:$4 sm:$0xff]   ;;  %v2103_v38 = vld [vmem:[%s2828_s1 + $0xb0] ss:$8 sps:$4 sm:$0xff]   ;;  %v2154_v40 = vld [vmem:[%s2828_s1 + $0x180] ss:$8 sps:$4 sm:$0xff]   ;;  %v1782_v58 = vcombine.low %v2348_v15, %v2348_v15 }
  0x13   : > { %807 = vmatpush1.bf16.msra.mxu0 %v2079_v7  ;;  %v2104_v39 = vld [vmem:[%s2828_s1 + $0xc4] ss:$8 sps:$4 sm:$0xff]   ;;  %v2158_v41 = vld [vmem:[%s2828_s1 + $0x194] ss:$8 sps:$4 sm:$0xff]   ;;  %v2106_v42 = vld [vmem:[%s2828_s1 + $0xc0] ss:$8 sps:$4 sm:$0xff]  }
  0x14   : > { %808 = vmatprep.subr.bf16.mxu0 %v2080_v8  ;;  %832 = vmatprep.mubr.bf16.mxu0 %v1783_v17  ;;  %v2107_v43 = vld [vmem:[%s2828_s1 + $0xd4] ss:$8 sps:$4 sm:$0xff]   ;;  %v2160_v44 = vld [vmem:[%s2828_s1 + $0x190] ss:$8 sps:$4 sm:$0xff]   ;;  %v2164_v45 = vld [vmem:[%s2828_s1 + $0x1a4] ss:$8 sps:$4 sm:$0xff]  }
  0x15   : > { %530 = vmatpush1.bf16.msra.mxu1 %v2129_v24  ;;  %v2109_v46 = vld [vmem:[%s2828_s1 + $0xd0] ss:$8 sps:$4 sm:$0xff]   ;;  %v2110_v47 = vld [vmem:[%s2828_s1 + $0xe4] ss:$8 sps:$4 sm:$0xff]   ;;  %v2166_v48 = vld [vmem:[%s2828_s1 + $0x1a0] ss:$8 sps:$4 sm:$0xff]  }
  0x16   : > { %531 = vmatprep.subr.bf16.mxu1 %v2133_v25  ;;  %v2170_v49 = vld [vmem:[%s2828_s1 + $0x1b4] ss:$8 sps:$4 sm:$0xff]   ;;  %v2112_v50 = vld [vmem:[%s2828_s1 + $0xe0] ss:$8 sps:$4 sm:$0xff]   ;;  %v2172_v52 = vld [vmem:[%s2828_s1 + $0x1b0] ss:$8 sps:$4 sm:$0xff]  }
  0x17   : > { %809 = vmatpush1.bf16.msra.mxu0 %v2082_v9  ;;  %v2113_v51 = vld [vmem:[%s2828_s1 + $0xf4] ss:$8 sps:$4 sm:$0xff]   ;;  %v2176_v53 = vld [vmem:[%s2828_s1 + $0x1c4] ss:$8 sps:$4 sm:$0xff]   ;;  %v2117_v54 = vld [vmem:[%s2828_s1 + $0xf0] ss:$8 sps:$4 sm:$0xff]  }
  0x18   : > { %810 = vmatprep.subr.bf16.mxu0 %v2083_v10  ;;  %v2123_v55 = vld [vmem:[%s2828_s1 + $0x104] ss:$8 sps:$4 sm:$0xff]   ;;  %v2178_v56 = vld [vmem:[%s2828_s1 + $0x1c0] ss:$8 sps:$4 sm:$0xff]   ;;  %v2182_v57 = vld [vmem:[%s2828_s1 + $0x1d4] ss:$8 sps:$4 sm:$0xff]  }
  0x19   : > { %532 = vmatpush1.bf16.msra.mxu1 %v2135_v28  ;;  %v2121_v59 = vld [vmem:[%s2828_s1 + $0x100] ss:$8 sps:$4 sm:$0xff]   ;;  %v2132_v60 = vld [vmem:[%s2828_s1 + $0x114] ss:$8 sps:$4 sm:$0xff]   ;;  %v2184_v62 = vld [vmem:[%s2828_s1 + $0x1d0] ss:$8 sps:$4 sm:$0xff]  }
  0x1a   : > { %533 = vmatprep.subr.bf16.mxu1 %v2140_v29  ;;  %v1704_v61 = vld [vmem:[%s2336_s28 + $0x18] sm:$0xff]  ;;  %v2188_v0 = vld [vmem:[%s2828_s1 + $0x1e4] ss:$8 sps:$4 sm:$0xff]   ;;  %v2190_v4 = vld [vmem:[%s2828_s1 + $0x1e0] ss:$8 sps:$4 sm:$0xff]   ;;  %s1903_s14 = sshll.u32 %s2835_s22, 3 }
  0x1b   : > { %811 = vmatpush1.bf16.msra.mxu0 %v2085_v11  ;;  %v1743_v63 = vcombine.high %v1704_v61, %v1704_v61  ;;  %v2130_v1 = vld [vmem:[%s2828_s1 + $0x110] ss:$8 sps:$4 sm:$0xff]   ;;  %v2138_v3 = vld [vmem:[%s2828_s1 + $0x244] ss:$8 sps:$4 sm:$0xff]   ;;  %v2194_v5 = vld [vmem:[%s2828_s1 + $0x1f4] ss:$8 sps:$4 sm:$0xff]   ;;  %v1742_v25 = vcombine.low %v1704_v61, %v1704_v61  ;;  %s251_s16 = scalar_lea.vmem %s2833_s6, %s1903_s14 }
  0x1c   : > { %812 = vmatprep.subr.bf16.mxu0 %v2086_v12  ;;  %v2504_v6 = vld [vmem:[%s2336_s28 + $0xc] sm:$0x11]  ;;  %v2139_v10 = vld [vmem:[%s2336_s28 + $0x8] ss:$0 sps:$4 sm:$0xff]   ;;  %v2145_v14 = vld [vmem:[%s2828_s1 + $0x254] ss:$8 sps:$4 sm:$0xff]  }
  0x1d   : > { %534 = vmatpush1.bf16.msra.mxu1 %v2142_v32  ;;  %557 = vmatprep.mubr.bf16.mxu1 %v1743_v63  ;;  %v2196_v7 = vld [vmem:[%s2828_s1 + $0x1f0] ss:$8 sps:$4 sm:$0xff]   ;;  %v1859_v8 = vcombine.high %v2348_v15, %v2504_v6  ;;  %v2200_v9 = vld [vmem:[%s2828_s1 + $0x204] ss:$8 sps:$4 sm:$0xff]   ;;  %v2136_v13 = vld [vmem:[%s2828_s1 + $0x240] ss:$8 sps:$4 sm:$0xff]  }
  0x1e   : > { %535 = vmatprep.subr.bf16.mxu1 %v2146_v33  ;;  %v2143_v20 = vld [vmem:[%s2828_s1 + $0x250] ss:$8 sps:$4 sm:$0xff]   ;;  %v2149_v24 = vld [vmem:[%s2828_s1 + $0x260] ss:$8 sps:$4 sm:$0xff]   ;;  %v2225_v28 = vld [vmem:[%s2828_s1 + $0x234] ss:$8 sps:$4 sm:$0xff]  }
  0x1f   : > { %813 = vmatpush1.bf16.msra.mxu0 %v2088_v16  ;;  %v944_v11 = vshrl.u32 %v1859_v8, 16  ;;  %v946_v12 = vshll.u32 %v1859_v8, 16  ;;  %v2202_v16 = vld [vmem:[%s2828_s1 + $0x200] ss:$8 sps:$4 sm:$0xff]   ;;  %v2208_v22 = vld [vmem:[%s2828_s1 + $0x210] ss:$8 sps:$4 sm:$0xff]  }
  0x20   : > { %814 = vmatprep.subr.bf16.mxu0 %v2089_v18  ;;  %v2206_v18 = vld [vmem:[%s2828_s1 + $0x214] ss:$8 sps:$4 sm:$0xff]   ;;  %v1268_v29 = vld [vmem:[%s2829_s2 + $0x80] sm:$0xff]  ;;  %v2223_v33 = vld [vmem:[%s2828_s1 + $0x230] ss:$8 sps:$4 sm:$0xff]  }
  0x21   : > { %536 = vmatpush1.bf16.msra.mxu1 %v2148_v36  ;;  %v948_v17 = vrot.slane %v946_v12, 1  ;;  %v2163_v32 = vld [vmem:[%s2828_s1 + $0x284] ss:$8 sps:$4 sm:$0xff]   ;;  %v2169_v36 = vld [vmem:[%s2828_s1 + $0x294] ss:$8 sps:$4 sm:$0xff]  }
  0x22   : > { %537 = vmatprep.subr.bf16.mxu1 %v2152_v37  ;;  %v1252_v37 = vld [vmem:[%s2829_s2] sm:$0xff]  ;;  %v2235_v8 = vld [vmem:[%s2828_s1 + $0x350] ss:$8 sps:$4 sm:$0xff]  }
  0x23   : > { %815 = vmatpush1.bf16.msra.mxu0 %v2091_v21  ;;  %v949_v19 = vor.u32 %v948_v17, %v944_v11  ;;  %v2151_v21 = vld [vmem:[%s2828_s1 + $0x264] ss:$8 sps:$4 sm:$0xff]   ;;  %v2220_v61 = vld [vmem:[%s2828_s1 + $0x320] ss:$8 sps:$4 sm:$0xff]   ;;  %v1270_v12 = vld [vmem:[%s2829_s2 + $0x90] sm:$0xff] }
  0x24   : > { %816 = vmatprep.subr.bf16.mxu0 %v2092_v23  ;;  %v2219_v23 = vld [vmem:[%s2828_s1 + $0x224] ss:$8 sps:$4 sm:$0xff]  }
  0x25   : > { %538 = vmatpush1.bf16.msra.mxu1 %v2154_v40  ;;  %v2229_v40 = vld [vmem:[%s2336_s28 + $0x20] ss:$0 sps:$4 sm:$0xff]  }
  0x26   : > { %539 = vmatprep.subr.bf16.mxu1 %v2158_v41  ;;  %v2175_v41 = vld [vmem:[%s2828_s1 + $0x2a4] ss:$8 sps:$4 sm:$0xff]  }
  0x27   : > { %817 = vmatpush1.bf16.msra.mxu0 %v2094_v26  ;;  %v2157_v26 = vld [vmem:[%s2828_s1 + $0x274] ss:$8 sps:$4 sm:$0xff]   ;;  %v1272_v17 = vld [vmem:[%s2829_s2 + $0xa0] sm:$0xff] }
  0x28   : > { %818 = vmatprep.subr.bf16.mxu0 %v2095_v27  ;;  %v2217_v27 = vld [vmem:[%s2828_s1 + $0x220] ss:$8 sps:$4 sm:$0xff]  }
  0x29   : > { %540 = vmatpush1.bf16.msra.mxu1 %v2160_v44  ;;  %v2181_v44 = vld [vmem:[%s2828_s1 + $0x2b4] ss:$8 sps:$4 sm:$0xff]  }
  0x2a   : > { %541 = vmatprep.subr.bf16.mxu1 %v2164_v45  ;;  %v2179_v45 = vld [vmem:[%s2828_s1 + $0x2b0] ss:$8 sps:$4 sm:$0xff]  }
  0x2b   : > { %819 = vmatpush1.bf16.msra.mxu0 %v2097_v30  ;;  %v1269_v30 = vld [vmem:[%s2829_s2 + $0x88] sm:$0xff] }
  0x2c   : > { %820 = vmatprep.subr.bf16.mxu0 %v2098_v31  ;;  %v2155_v31 = vld [vmem:[%s2828_s1 + $0x270] ss:$8 sps:$4 sm:$0xff]  }
  0x2d   : > { %542 = vmatpush1.bf16.msra.mxu1 %v2166_v48  ;;  %v2193_v48 = vld [vmem:[%s2828_s1 + $0x2d4] ss:$8 sps:$4 sm:$0xff]  }
  0x2e   : > { %543 = vmatprep.subr.bf16.mxu1 %v2170_v49  ;;  %v2191_v49 = vld [vmem:[%s2828_s1 + $0x2d0] ss:$8 sps:$4 sm:$0xff]  }
  0x2f   : > { %821 = vmatpush1.bf16.msra.mxu0 %v2100_v34  ;;  %v2568_v34 = vpack.c.bf16 %v1269_v30, %v1268_v29  ;;  %v1276_v30 = vld [vmem:[%s2829_s2 + $0xc0] sm:$0xff] }
  0x30   : > { %822 = vmatprep.subr.bf16.mxu0 %v2101_v35  ;;  %v2161_v35 = vld [vmem:[%s2828_s1 + $0x280] ss:$8 sps:$4 sm:$0xff]  }
  0x31   : > { %544 = vmatpush1.bf16.msra.mxu1 %v2172_v52  ;;  %v2205_v52 = vld [vmem:[%s2828_s1 + $0x2f4] ss:$8 sps:$4 sm:$0xff]  }
  0x32   : > { %545 = vmatprep.subr.bf16.mxu1 %v2176_v53  ;;  %v2203_v53 = vld [vmem:[%s2828_s1 + $0x2f0] ss:$8 sps:$4 sm:$0xff]  }
  0x33   : > { %823 = vmatpush1.bf16.msra.mxu0 %v2103_v38  ;;  %v1253_v38 = vld [vmem:[%s2829_s2 + $0x8] sm:$0xff] }
  0x34   : > { %824 = vmatprep.subr.bf16.mxu0 %v2104_v39  ;;  %v2167_v39 = vld [vmem:[%s2828_s1 + $0x290] ss:$8 sps:$4 sm:$0xff]  }
  0x35   : > { %546 = vmatpush1.bf16.msra.mxu1 %v2178_v56  ;;  %v2216_v56 = vld [vmem:[%s2828_s1 + $0x314] ss:$8 sps:$4 sm:$0xff]  }
  0x36   : > { %547 = vmatprep.subr.bf16.mxu1 %v2182_v57  ;;  %v1858_v57 = vcombine.low %v2348_v15, %v2504_v6  ;;  %v2228_v15 = vld [vmem:[%s2828_s1 + $0x334] ss:$8 sps:$4 sm:$0xff]  }
  0x37   : > { %825 = vmatpush1.bf16.msra.mxu0 %v2106_v42  ;;  %v2590_v42 = vpack.c.bf16 %v1253_v38, %v1252_v37  ;;  %v2237_v6 = vld [vmem:[%s2828_s1 + $0x354] ss:$8 sps:$4 sm:$0xff]  }
  0x38   : > { %826 = vmatprep.subr.bf16.mxu0 %v2107_v43  ;;  %v2173_v43 = vld [vmem:[%s2828_s1 + $0x2a0] ss:$8 sps:$4 sm:$0xff]   ;;  %v1278_v37 = vld [vmem:[%s2829_s2 + $0xd0] sm:$0xff]  ;;  %v1279_v38 = vld [vmem:[%s2829_s2 + $0xd8] sm:$0xff] }
  0x39   : > { %548 = vmatpush1.bf16.msra.mxu1 %v2184_v62  ;;  %v937_v62 = vshrl.u32 %v1858_v57, 16 }
  0x3a   : > { %549 = vmatprep.subr.bf16.mxu1 %v2188_v0  ;;  %v2226_v0 = vld [vmem:[%s2828_s1 + $0x330] ss:$8 sps:$4 sm:$0xff]  }
  0x3b   : > { %827 = vmatpush1.bf16.msra.mxu0 %v2109_v46  ;;  %v2187_v46 = vld [vmem:[%s2828_s1 + $0x2c4] ss:$8 sps:$4 sm:$0xff]  }
  0x3c   : > { %828 = vmatprep.subr.bf16.mxu0 %v2110_v47  ;;  %v2185_v47 = vld [vmem:[%s2828_s1 + $0x2c0] ss:$8 sps:$4 sm:$0xff]  }
  0x3d   : > { %550 = vmatpush1.bf16.msra.mxu1 %v2190_v4  ;;  %v2238_v4 = vld [vmem:[%s2336_s28 + $0x8] ss:$12 sps:$4 sm:$0x1f]  }
  0x3e   : > { %551 = vmatprep.subr.bf16.mxu1 %v2194_v5  ;;  %v2232_v5 = vld [vmem:[%s2828_s1 + $0x340] ss:$8 sps:$4 sm:$0xff]  }
  0x3f   : > { %829 = vmatpush1.bf16.msra.mxu0 %v2112_v50  ;;  %v2199_v50 = vld [vmem:[%s2828_s1 + $0x2e4] ss:$8 sps:$4 sm:$0xff]  }
  0x40   : > { %830 = vmatprep.subr.bf16.mxu0 %v2113_v51  ;;  %v2197_v51 = vld [vmem:[%s2828_s1 + $0x2e0] ss:$8 sps:$4 sm:$0xff]  }
  0x41   : > { %552 = vmatpush1.bf16.msra.mxu1 %v2196_v7  ;;  %v953_v7 = vshll.u32 %v2238_v4, 16 }
  0x42   : > { %553 = vmatprep.subr.bf16.mxu1 %v2200_v9  ;;  %v951_v9 = vshrl.u32 %v2238_v4, 16 }
  0x43   : > { %831 = vmatpush1.bf16.msra.mxu0 %v2117_v54  ;;  %v2211_v54 = vld [vmem:[%s2828_s1 + $0x304] ss:$8 sps:$4 sm:$0xff]  }
  0x44   : > { %841 = vmatprep.subr.bf16.mxu0 %v2123_v55  ;;  %v2209_v55 = vld [vmem:[%s2828_s1 + $0x300] ss:$8 sps:$4 sm:$0xff]  }
  0x45   : > { %554 = vmatpush1.bf16.msra.mxu1 %v2202_v16  ;;  %v1255_v16 = vld [vmem:[%s2829_s2 + $0x18] sm:$0xff] }
  0x46   : > { %833 = vmatmul.mubr.bf16.vlgmr.msra.gmra.mrb[0].mxu0 %v1782_v58  ;;  %555 = vmatprep.subr.bf16.mxu1 %v2206_v18  ;;  %v2214_v58 = vld [vmem:[%s2828_s1 + $0x310] ss:$8 sps:$4 sm:$0xff]  }
  0x47   : > { %842 = vmatpush1.bf16.msra.mxu0 %v2121_v59  ;;  %873 = vmatprep.mubr.bf16.mxu0 %v2249_v2  ;;  %v2222_v59 = vld [vmem:[%s2828_s1 + $0x324] ss:$8 sps:$4 sm:$0xff]  }
  0x48   : > { %843 = vmatprep.subr.bf16.mxu0 %v2132_v60  ;;  %v939_v60 = vshll.u32 %v1858_v57, 16 }
  0x49   : > { %556 = vmatpush1.bf16.msra.mxu1 %v2208_v22 }
  0x4a   : > { %566 = vmatprep.subr.bf16.mxu1 %v2219_v23  ;;  %v941_v63 = vrot.slane %v939_v60, 1  ;;  %v1274_v23 = vld [vmem:[%s2829_s2 + $0xb0] sm:$0xff] }
  0x4b   : > { %844 = vmatpush1.bf16.msra.mxu0 %v2130_v1  ;;  %v2234_v1 = vld [vmem:[%s2828_s1 + $0x344] ss:$8 sps:$4 sm:$0xff]  }
  0x4c   : > { %1142 = vmatprep.subr.bf16.mxu0 %v2138_v3  ;;  %558 = vmatmul.mubr.bf16.vlgmr.msra.gmra.mrb[0].mxu1 %v1742_v25  ;;  %v942_v3 = vor.u32 %v941_v63, %v937_v62 }
  0x4d   : > { %567 = vmatpush1.bf16.msra.mxu1 %v2217_v27  ;;  %598 = vmatprep.mubr.bf16.mxu1 %v2249_v2  ;;  %v1258_v27 = vld [vmem:[%s2829_s2 + $0x30] sm:$0xff] }
  0x4e   : > { %568 = vmatprep.subr.bf16.mxu1 %v2225_v28  ;;  %v1259_v28 = vld [vmem:[%s2829_s2 + $0x38] sm:$0xff] }
  0x4f   : > { %v2718_v29 = vpack.c.bf16 %v1259_v28, %v1258_v27  ;;  %v2250_v28 = vmov 0.0  }
  0x51   : > { %569 = vmatpush1.bf16.msra.mxu1 %v2223_v33  ;;  %v1260_v33 = vld [vmem:[%s2829_s2 + $0x40] sm:$0xff] }
  0x52   : > { %1821 = vmatmul.mubr.msk.bf16.vlgmr.msra.gmra.mrb[0].mxu0 %vm521_vm0, %v2139_v10  ;;  %1976 = vmatprep.subr.bf16.mxu1 %v2568_v34  ;;  %v955_v10 = vrot.slane %v953_v7, 1 }
  0x53   : > { %1143 = vmatpush1.bf16.msra.mxu0 %v2136_v13  ;;  %1174 = vmatprep.mubr.bf16.mxu0 %v949_v19  ;;  %v1271_v13 = vld [vmem:[%s2829_s2 + $0x98] sm:$0xff]  ;;  %v1273_v19 = vld [vmem:[%s2829_s2 + $0xa8] sm:$0xff] }
  0x54   : > { %1144 = vmatprep.subr.bf16.mxu0 %v2145_v14  ;;  %v956_v11 = vor.u32 %v955_v10, %v951_v9  ;;  %v2674_v14 = vpack.c.bf16 %v1271_v13, %v1270_v12  ;;  %v2697_v22 = vpack.c.bf16 %v1273_v19, %v1272_v17 }
  0x57   : > { %1145 = vmatpush1.bf16.msra.mxu0 %v2143_v20  ;;  %v1256_v20 = vld [vmem:[%s2829_s2 + $0x20] sm:$0xff] }
  0x58   : > { %1146 = vmatprep.subr.bf16.mxu0 %v2151_v21  ;;  %1781 = vmatmul.mubr.msk.bf16.vlgmr.msra.gmra.mrb[0].mxu1 %vm521_vm0, %v2229_v40  ;;  %v1257_v21 = vld [vmem:[%s2829_s2 + $0x28] sm:$0xff]  ;;  %v1262_v40 = vld [vmem:[%s2829_s2 + $0x50] sm:$0xff] }
  0x59   : > { %1978 = vmatpush3.bf16.msra.mxu1 %v2590_v42  ;;  %v2706_v25 = vpack.c.bf16 %v1257_v21, %v1256_v20 }
  0x5a   : > { %1980 = vmatprep.subr.bf16.mxu1 %v2674_v14 }
  0x5b   : > { %1147 = vmatpush1.bf16.msra.mxu0 %v2149_v24  ;;  %v1275_v24 = vld [vmem:[%s2829_s2 + $0xb8] sm:$0xff] }
  0x5c   : > { %1148 = vmatprep.subr.bf16.mxu0 %v2157_v26  ;;  %v2709_v26 = vpack.c.bf16 %v1275_v24, %v1274_v23 }
  0x5f   : > { %1149 = vmatpush1.bf16.msra.mxu0 %v2155_v31  ;;  %v1277_v31 = vld [vmem:[%s2829_s2 + $0xc8] sm:$0xff] }
  0x60   : > { %1150 = vmatprep.subr.bf16.mxu0 %v2163_v32  ;;  %v2728_v32 = vpack.c.bf16 %v1277_v31, %v1276_v30 }
  0x63   : > { %1151 = vmatpush1.bf16.msra.mxu0 %v2161_v35  ;;  %v1261_v35 = vld [vmem:[%s2829_s2 + $0x48] sm:$0xff] }
  0x64   : > { %1152 = vmatprep.subr.bf16.mxu0 %v2169_v36  ;;  %v2736_v36 = vpack.c.bf16 %v1261_v35, %v1260_v33 }
  0x67   : > { %1153 = vmatpush1.bf16.msra.mxu0 %v2167_v39  ;;  %v2746_v39 = vpack.c.bf16 %v1279_v38, %v1278_v37 }
  0x68   : > { %1154 = vmatprep.subr.bf16.mxu0 %v2175_v41  ;;  %v1263_v41 = vld [vmem:[%s2829_s2 + $0x58] sm:$0xff] }
  0x6b   : > { %1155 = vmatpush1.bf16.msra.mxu0 %v2173_v43  ;;  %v2754_v43 = vpack.c.bf16 %v1263_v41, %v1262_v40 }
  0x6c   : > { %1156 = vmatprep.subr.bf16.mxu0 %v2181_v44  ;;  %v1280_v44 = vld [vmem:[%s2829_s2 + $0xe0] sm:$0xff] }
  0x6f   : > { %1157 = vmatpush1.bf16.msra.mxu0 %v2179_v45  ;;  %v1281_v45 = vld [vmem:[%s2829_s2 + $0xe8] sm:$0xff] }
  0x70   : > { %1158 = vmatprep.subr.bf16.mxu0 %v2187_v46  ;;  %v1999_v46 = vpack.c.bf16 %v1281_v45, %v1280_v44  ;;  %v1582_v45 = vlaneseq }
  0x73   : > { %1159 = vmatpush1.bf16.msra.mxu0 %v2185_v47  ;;  %v1264_v47 = vld [vmem:[%s2829_s2 + $0x60] sm:$0xff] }
  0x74   : > { %1160 = vmatprep.subr.bf16.mxu0 %v2193_v48  ;;  %v1265_v48 = vld [vmem:[%s2829_s2 + $0x68] sm:$0xff] }
  0x77   : > { %1161 = vmatpush1.bf16.msra.mxu0 %v2191_v49  ;;  %v2001_v49 = vpack.c.bf16 %v1265_v48, %v1264_v47  ;;  %v1592_v47 = vld [vmem:[%s2831_s4] sm:$0x3] }
  0x78   : > { %1162 = vmatprep.subr.bf16.mxu0 %v2199_v50  ;;  %v1282_v50 = vld [vmem:[%s2829_s2 + $0xf0] sm:$0xff] }
  0x7b   : > { %1163 = vmatpush1.bf16.msra.mxu0 %v2197_v51  ;;  %v1283_v51 = vld [vmem:[%s2829_s2 + $0xf8] sm:$0xff] }
  0x7c   : > { %1164 = vmatprep.subr.bf16.mxu0 %v2205_v52  ;;  %v1266_v52 = vld [vmem:[%s2829_s2 + $0x70] sm:$0xff] }
  0x7f   : > { %1165 = vmatpush1.bf16.msra.mxu0 %v2203_v53  ;;  %v2003_v53 = vpack.c.bf16 %v1283_v51, %v1282_v50 }
  0x80   : > { %1166 = vmatprep.subr.bf16.mxu0 %v2211_v54  ;;  %v1267_v54 = vld [vmem:[%s2829_s2 + $0x78] sm:$0xff] }
  0x83   : > { %1167 = vmatpush1.bf16.msra.mxu0 %v2209_v55  ;;  %v2005_v55 = vpack.c.bf16 %v1267_v54, %v1266_v52 }
  0x84   : > { %1168 = vmatprep.subr.bf16.mxu0 %v2216_v56 }
  0x87   : > { %1169 = vmatpush1.bf16.msra.mxu0 %v2214_v58 }
  0x88   : > { %1170 = vmatprep.subr.bf16.mxu0 %v2222_v59 }
  0x8b   : > { %1171 = vmatpush1.bf16.msra.mxu0 %v2220_v61 }
  0x8c   : > { %1172 = vmatprep.subr.bf16.mxu0 %v2228_v15 }
  0x8f   : > { %1173 = vmatpush1.bf16.msra.mxu0 %v2226_v0 }
  0x90   : > { %1183 = vmatprep.subr.bf16.mxu0 %v2234_v1 }
  0x92   : > { %1175 = vmatmul.mubr.bf16.vlgmr.msra.gmra.mrb[0].mxu0 %v942_v3 }
  0x93   : > { %1184 = vmatpush1.bf16.msra.mxu0 %v2232_v5  ;;  %1215 = vmatprep.mubr.bf16.mxu0 %v2249_v2  ;;  %v1254_v2 = vld [vmem:[%s2829_s2 + $0x10] sm:$0xff] }
  0x94   : > { %1185 = vmatprep.subr.bf16.mxu0 %v2237_v6  ;;  %v2685_v18 = vpack.c.bf16 %v1255_v16, %v1254_v2 }
  0x96   : > { %1982 = vmatpush3.bf16.msra.mxu1 %v2685_v18 }
  0x97   : > { %1186 = vmatpush1.bf16.msra.mxu0 %v2235_v8  ;;  %1984 = vmatprep.subr.bf16.mxu1 %v2697_v22 }
  0x9a   : > { %1986 = vmatpush3.bf16.msra.mxu1 %v2706_v25 }
  0x9b   : > { %1988 = vmatprep.subr.bf16.mxu1 %v2709_v26 }
  0x9e   : > { %1897 = vmatmul.mubr.msk.bf16.vlgmr.msra.gmra.mrb[0].mxu0 %vm521_vm0, %v956_v11  ;;  %1990 = vmatpush3.bf16.msra.mxu1 %v2718_v29 }
  0x9f   : > { %1992 = vmatprep.subr.bf16.mxu1 %v2728_v32 }
  0xa2   : > { %1994 = vmatpush3.bf16.msra.mxu1 %v2736_v36 }
  0xa3   : > { %1996 = vmatprep.subr.bf16.mxu1 %v2746_v39 }
  0xa6   : > { %1998 = vmatpush3.bf16.msra.mxu1 %v2754_v43 }
  0xa7   : > { %2000 = vmatprep.subr.bf16.mxu1 %v1999_v46 }
  0xaa   : > { %2002 = vmatpush3.bf16.msra.mxu1 %v2001_v49 }
  0xab   : > { %2004 = vmatprep.subr.bf16.mxu1 %v2003_v53 }
  0xae   : > { %2006 = vmatpush3.bf16.msra.mxu1 %v2005_v55 }
  0xaf   : > { %2008 = vmatprep.subr.bf16.mxu1 %v2568_v34 }
 0x12b   : > { %v600_v56 = vpop.f32.mrb[0].mxu1 }
 0x12c   : > { %v602_v57 = vpop.f32.mrb[1].mxu1 }
 0x12d   : > { %v604_v58 = vpop.f32.mrb[2].mxu1 }
 0x12e   : > { %v605_v59 = vpop.f32.mrb[3].mxu1 }
 0x171   : > { %v1217_v60 = vpop.f32.mrb[0].mxu0 }
 0x172   : > { %v2783_v61 = vadd.f32 %v1217_v60, %v600_v56  ;;  %v1219_v15 = vpop.f32.mrb[1].mxu0 }
 0x173   : > { %v2785_v62 = vadd.f32 %v1219_v15, %v602_v57  ;;  %v1221_v63 = vpop.f32.mrb[2].mxu0 }
 0x174   : > { %v1226_v0 = vrot.slane %v2783_v61, 4  ;;  %v1222_v1 = vpop.f32.mrb[3].mxu0  ;;  %v1238_v23 = vmul.f32 %v2783_v61, %v2783_v61 }
 0x175   : > { %v1232_v3 = vrot.slane %v2785_v62, 4  ;;  %v1239_v4 = vmul.f32 %v2785_v62, %v2785_v62 }
 0x176   : > { %v1227_v34 = vadd.f32 %v2783_v61, %v1226_v0  ;;  %v1240_v24 = vrot.slane %v1238_v23, 4 }
 0x177   : > { %v1233_v5 = vadd.f32 %v2785_v62, %v1232_v3  ;;  %v1246_v6 = vrot.slane %v1239_v4, 4 }
 0x178   : > { %v1228_v7 = vrot.slane %v1227_v34, 2  ;;  %v1241_v27 = vadd.f32 %v1240_v24, %v1238_v23 }
 0x179   : > { %v1234_v8 = vrot.slane %v1233_v5, 2  ;;  %v1247_v9 = vadd.f32 %v1246_v6, %v1239_v4 }
 0x17a   : > { %v1229_v10 = vadd.f32 %v1228_v7, %v1227_v34 }
 0x17b   : > { %v1235_v11 = vadd.f32 %v1234_v8, %v1233_v5  ;;  %v1248_v12 = vrot.slane %v1247_v9, 2 }
 0x17c   : > { %v1230_v13 = vrot.slane %v1229_v10, 1 }
 0x17d   : > { %v1236_v2 = vrot.slane %v1235_v11, 1  ;;  %v1249_v16 = vadd.f32 %v1248_v12, %v1247_v9 }
 0x17e   : > { %v1231_v20 = vadd.f32 %v1230_v13, %v1229_v10 }
 0x17f   : > { %v1237_v17 = vadd.f32 %v1236_v2, %v1235_v11  ;;  %v1250_v19 = vrot.slane %v1249_v16, 1 }
 0x181   : > { %1348 = vmatprep.mubr.f32.mxu1 %v1237_v17  ;;  %v1251_v21 = vadd.f32 %v1250_v19, %v1249_v16 }
 0x182   : > { %1349 = vmatmul.mubr.f32.vlgmr.msra.gmra.mrb[4].mxu1 %v1231_v20 }
 0x183   : > { %2010 = vmatpush3.bf16.msra.mxu1 %v2590_v42  ;;  %1418 = vmatprep.mubr.f32.mxu1 %v1251_v21  ;;  %v1242_v42 = vrot.slane %v1241_v27, 2 }
 0x184   : > { %2012 = vmatprep.subr.bf16.mxu1 %v2674_v14 }
 0x185   : > { %v1243_v14 = vadd.f32 %v1242_v42, %v1241_v27 }
 0x187   : > { %2014 = vmatpush3.bf16.msra.mxu1 %v2685_v18  ;;  %v1244_v18 = vrot.slane %v1243_v14, 1 }
 0x188   : > { %2016 = vmatprep.subr.bf16.mxu1 %v2697_v22 }
 0x189   : > { %v1245_v22 = vadd.f32 %v1244_v18, %v1243_v14 }
 0x18b   : > { %2018 = vmatpush3.bf16.msra.mxu1 %v2706_v25  ;;  %v1432_v25 = vld [vmem:[%s2830_s3 + $0x8] sm:$0xff] }
 0x18c   : > { %2020 = vmatprep.subr.bf16.mxu1 %v2709_v26  ;;  %v1431_v26 = vld [vmem:[%s2830_s3] sm:$0xff] }
 0x18f   : > { %2022 = vmatpush3.bf16.msra.mxu1 %v2718_v29 }
 0x190   : > { %2024 = vmatprep.subr.bf16.mxu1 %v2728_v32 }
 0x193   : > { %2026 = vmatpush3.bf16.msra.mxu1 %v2736_v36 }
 0x194   : > { %2028 = vmatprep.subr.bf16.mxu1 %v2746_v39 }
 0x197   : > { %2030 = vmatpush3.bf16.msra.mxu1 %v2754_v43 }
 0x198   : > { %2032 = vmatprep.subr.bf16.mxu1 %v1999_v46  ;;  %v1583_v46 = vshrl.u32 %v1582_v45, 7 }
 0x19a   : > { %v1600_v48 = vsub.s32 1, %v1583_v46 }
 0x19b   : > { %2034 = vmatpush3.bf16.msra.mxu1 %v2001_v49  ;;  %v1584_v49 = vsub.s32 0, %v1583_v46 }
 0x19c   : > { %2036 = vmatprep.subr.bf16.mxu1 %v2003_v53  ;;  %v1601_v51 = vrot.slane %v1592_v47, %v1600_v48 }
 0x19d   : > { %v1597_v50 = vrot.slane %v1592_v47, %v1584_v49 }
 0x19f   : > { %2038 = vmatpush3.bf16.msra.mxu1 %v2005_v55  ;;  %v1616_v55 = vld [vmem:[%s2832_s5] sm:$0x3] }
 0x1a0   : > { %1437 = vmatprep.subr.mxu1 %v1432_v25  ;;  %v1621_v15 = vrot.slane %v1616_v55, %v1584_v49  ;;  %v1625_v1 = vrot.slane %v1616_v55, %v1600_v48 }
 0x1a2   : > { %1419 = vmatmul.mubr.f32.vlgmr.msra.gmra.mrb[6].mxu1 %v1245_v22 }
 0x1a3   : > { %1438 = vmatpush1.msra.mxu1 %v1431_v26  ;;  %1501 = vmatprep.mubr.f32.mxu1 %v2250_v28 }
 0x1a4   : > { %1511 = vmatprep.subr.mxu1 %v1432_v25 }
 0x255   : > { %v1937_v29 = vpop.f32.mrb[4].mxu1 }
 0x256   : > { %v1938_v30 = vpop.f32.mrb[5].mxu1 }
 0x257   : > { %v1939_v31 = vadd.f32 %v1938_v30, %v1937_v29 }
 0x259   : > { %v1425_v32 = vmul.f32 0.00390625, %v1939_v31 }
 0x25b   : > { %1898 = vmatmul.mubr.msk.f32.vlgmr.msra.gmra.mrb[8].mxu1 %vm1433_vm1, %v1425_v32  ;;  %v1427_v37 = vmul.f32 %v1425_v32, %v1425_v32 }
 0x25c   : > { %1512 = vmatpush1.msra.mxu1 %v1431_v26  ;;  %1575 = vmatprep.mubr.f32.mxu1 %v2250_v28 }
 0x275   : > { %v1972_v33 = vpop.f32.mrb[6].mxu1 }
 0x276   : > { %v1973_v35 = vpop.f32.mrb[7].mxu1 }
 0x277   : > { %v1974_v36 = vadd.f32 %v1973_v35, %v1972_v33 }
 0x279   : > { %v1426_v38 = vmul.f32 0.00390625, %v1974_v36 }
 0x27b   : > { %v1428_v39 = vsub.f32 %v1426_v38, %v1427_v37 }
 0x27d   : > { %v1429_v40 = vadd.f32 1e-05, %v1428_v39 }
 0x27f   : > { %2239 = vrsqrt.f32 %v1429_v40 }
 0x289   : > { %v2240_v41 = vpop.eup %2239 }
 0x28a   : > { %1899 = vmatmul.mubr.msk.f32.vlgmr.msra.gmra.mrb[10].mxu1 %vm1433_vm1, %v2240_v41 }
 0x32e   : > { %v1503_v43 = vpop.f32.mrb[8].mxu1 }
 0x32f   : > { %v1505_v44 = vpop.f32.mrb[9].mxu1  ;;  %v1585_v52 = vrot.slane %v1503_v43, %v1584_v49 }
 0x330   : > { %v1589_v53 = vrot.slane %v1505_v44, %v1584_v49 }
 0x331   : > { %v1590_v59 = vsub.f32 %v2783_v61, %v1585_v52 }
 0x332   : > { %v1591_v63 = vsub.f32 %v2785_v62, %v1589_v53 }
 0x35d   : > { %v1577_v54 = vpop.f32.mrb[10].mxu1 }
 0x35e   : > { %v1604_v56 = vmul.f32 %v1597_v50, %v1577_v54  ;;  %v1579_v57 = vpop.f32.mrb[11].mxu1 }
 0x35f   : > { %v1605_v58 = vmul.f32 %v1601_v51, %v1579_v57 }
 0x360   : > { %v1609_v60 = vrot.slane %v1604_v56, %v1584_v49 }
 0x361   : > { %v1613_v0 = vrot.slane %v1605_v58, %v1584_v49 }
 0x362   : > { %v1614_v3 = vmul.f32 %v1609_v60, %v1590_v59 }
 0x363   : > { %v1615_v4 = vmul.f32 %v1613_v0, %v1591_v63 }
 0x364   : > { %v1628_v34 = vadd.f32 %v1621_v15, %v1614_v3 }
 0x365   : > { %v1629_v5 = vadd.f32 %v1625_v1, %v1615_v4 }
 0x366   : > { %v1630_v6 = vmax.f32 %v1628_v34, 0.0 }
 0x367   : > { %v1631_v7 = vmax.f32 %v1629_v5, 0.0 }
 0x369   : > { %v1904_v8 = vpack.c.bf16 %v1631_v7, %v1630_v6 }
 0x36b   : > { %1640 = vst [vmem:[%s251_s16] sm:$0xff] %v1904_v8 }
 0x36c PF: > { %s16_s21 = sadd.s32 1, %s2247_s21  }
 0x36d   : > { %p13_p4 = scmp.ge.s32.totalorder %s16_s21, 4  }
 0x36f   :  { %15 = sbr.rel (!%p13_p4) target bundleno = 1 (0x1), region = 77 }

// kernel: tile.78
= control target key start
LH: loop header
LB: loop body
LE: loop exit
PB: predicated region body
PF: predicated region fallthrough
CT: control target
= control target key end

     0   :  { %s22_s0 = inlined_call_operand.vmem [shape: s32[64], index: 0, kind: input, shape index: {}]   ;;  %s23_s1 = inlined_call_operand.vmem [shape: s32[4,64], index: 1, kind: output, shape index: {}]  }
   0x1   :  { %v4_v0 = vld [vmem:[%s22_s0] ss:$0 sm:$0xff] }
   0x2   :  { %5 = vst [vmem:[%s23_s1] sm:$0xf] %v4_v0 }

// kernel: eq.85
= control target key start
LH: loop header
LB: loop body
LE: loop exit
PB: predicated region body
PF: predicated region fallthrough
CT: control target
= control target key end

     0   :  { %s6_s8 = smov 3  ;;  %vm8_vm0 = vcmask 523264   ;;  %s24_s9 = smov 64   ;;  %vm15_vm1 = vcmask 1048064   ;;  %s41_s0 = inlined_call_operand.vmem [shape: s32[4,64], index: 0, kind: input, shape index: {}]   ;;  %s42_s1 = inlined_call_operand.vmem [shape: s32[256], index: 1, kind: output, shape index: {}]  }
   0x1   :  { %v4_v0 = vld [vmem:[%s41_s0] sm:$0xf]  ;;  %s11_s0 = smov 3 }
   0x2   :  { %5 = vst [vmem:[#allocation1] sm:$0xf] %v4_v0 }
   0x9   :  { %v12_v1 = vld [vmem:[#allocation1 + $0x1] ss:$2 sm:%s11_s0]   ;;  %v7_v2 = vld [vmem:[#allocation1] ss:$2 sm:%s6_s8]  }
   0xa   :  { %13 = vrot.lane.b32.xlu0 %v12_v1, %s24_s9  ;;  %9 = vst.msk [vmem:[#allocation0] sm:$0x3] %vm8_vm0, %v7_v2  }
  0x7c   :  { %v14_v3 = vpop.permute.xlu0 %13  }
  0x7d   :  { %16 = vst.msk [vmem:[#allocation0] sm:$0x3] %vm15_vm1, %v14_v3  }
  0x84   :  { %v20_v4 = vld [vmem:[#allocation0] sm:$0x3] }
  0x85   :  { %22 = vst [vmem:[%s42_s1] sm:$0x3] %v20_v4 }

// kernel: tile.83
= control target key start
LH: loop header
LB: loop body
LE: loop exit
PB: predicated region body
PF: predicated region fallthrough
CT: control target
= control target key end

     0   :  { %s22_s0 = inlined_call_operand.vmem [shape: f32[64], index: 0, kind: input, shape index: {}]   ;;  %s23_s1 = inlined_call_operand.vmem [shape: f32[4,64], index: 1, kind: output, shape index: {}]  }
   0x1   :  { %v4_v0 = vld [vmem:[%s22_s0] ss:$0 sm:$0xff] }
   0x2   :  { %5 = vst [vmem:[%s23_s1] sm:$0xf] %v4_v0 }

// kernel: tile.84
= control target key start
LH: loop header
LB: loop body
LE: loop exit
PB: predicated region body
PF: predicated region fallthrough
CT: control target
= control target key end

     0   :  { %s6_s8 = smov 3  ;;  %vm8_vm0 = vcmask 523264   ;;  %s30_s9 = smov 64   ;;  %vm15_vm1 = vcmask 1048064   ;;  %s50_s0 = inlined_call_operand.vmem [shape: f32[4,64], index: 0, kind: input, shape index: {}]   ;;  %s51_s1 = inlined_call_operand.vmem [shape: f32[1,256], index: 1, kind: output, shape index: {}]  }
   0x1   :  { %v4_v0 = vld [vmem:[%s50_s0] sm:$0xf]  ;;  %s11_s0 = smov 3 }
   0x2   :  { %5 = vst [vmem:[#allocation1] sm:$0xf] %v4_v0 }
   0x9   :  { %v12_v1 = vld [vmem:[#allocation1 + $0x1] ss:$2 sm:%s11_s0]   ;;  %v7_v2 = vld [vmem:[#allocation1] ss:$2 sm:%s6_s8]  }
   0xa   :  { %13 = vrot.lane.b32.xlu0 %v12_v1, %s30_s9  ;;  %9 = vst.msk [vmem:[#allocation0] ss:$8 sm:$0x3] %vm8_vm0, %v7_v2  }
  0x7c   :  { %v14_v3 = vpop.permute.xlu0 %13  }
  0x7d   :  { %16 = vst.msk [vmem:[#allocation0] ss:$8 sm:$0x3] %vm15_vm1, %v14_v3  }
  0x84   :  { %v20_v4 = vld [vmem:[#allocation0] sm:$0x1]  ;;  %v24_v5 = vld [vmem:[#allocation0 + $0x8] sm:$0x1] }
  0x85   :  { %22 = vst [vmem:[%s51_s1] sm:$0x1] %v20_v4  ;;  %28 = vst [vmem:[%s51_s1 + $0x1] sm:$0x1] %v24_v5 }

// kernel: full_conv_patch_embedding_forward.6
= control target key start
LH: loop header
LB: loop body
LE: loop exit
PB: predicated region body
PF: predicated region fallthrough
CT: control target
= control target key end

     0   :  { %s2399_s21 = smov 0   ;;  %s2988_s0 = inlined_call_operand.vmem [shape: bf16[2,2,5,320], index: 0, kind: input, shape index: {}]   ;;  %s2989_s1 = inlined_call_operand.vmem [shape: bf16[3,320,256], index: 1, kind: input, shape index: {}]   ;;  %s2990_s2 = inlined_call_operand.vmem [shape: f32[256,8], index: 2, kind: input, shape index: {}]   ;;  %s2991_s3 = inlined_call_operand.vmem [shape: f32[8,256], index: 3, kind: input, shape index: {}]   ;;  %s2992_s4 = inlined_call_operand.vmem [shape: f32[1,256], index: 4, kind: input, shape index: {}]   ;;  %s2993_s5 = inlined_call_operand.vmem [shape: f32[1,256], index: 5, kind: input, shape index: {}]   ;;  %s2994_s6 = inlined_call_operand.vmem [shape: bf16[2,4,256], index: 6, kind: output, shape index: {}]  }
   0x1 LB: > { %s1771_s22 = sadd.s32 4294967295, %s2360_s21   ;;  %p1775_p0 = scmp.ge.s32.totalorder %s2360_s21, 1  ;;  %s2360_s21 = sphi %s2399_s21, %s16_s21  }
   0x2   : > { %p212_p1 = scmp.lt.s32.totalorder %s2360_s21, 3 }
   0x4   : > { %p213_p2 = pnand %p1775_p0, %p212_p1 }
   0x5   : > { %v2163_v0 = vld [vmem:[%s2989_s1 + $0x4] ss:$8 sps:$4 sm:$0xff] (!%p213_p2)   ;;  %v2165_v1 = vld [vmem:[%s2989_s1] ss:$8 sps:$4 sm:$0xff] (!%p213_p2)   ;;  %v2166_v2 = vld [vmem:[%s2989_s1 + $0x14] ss:$8 sps:$4 sm:$0xff] (!%p213_p2)  }
   0x6   : > { %216 = sbr.rel (%p213_p2) target bundleno = 885 (0x375), region = 44  ;;  %848 = vmatprep.subr.bf16.mxu0 (!%p213_p2), %v2163_v0  ;;  %v2168_v3 = vld [vmem:[%s2989_s1 + $0x10] ss:$8 sps:$4 sm:$0xff] (!%p213_p2)   ;;  %v2169_v4 = vld [vmem:[%s2989_s1 + $0x24] ss:$8 sps:$4 sm:$0xff] (!%p213_p2)   ;;  %p242_p3 = scmp.lt.s32.totalorder (!%p213_p2), %s1771_s22, 1 }
   0x7   : > { %849 = vmatpush1.bf16.msra.mxu0 (!%p213_p2), %v2165_v1  ;;  %v2171_v5 = vld [vmem:[%s2989_s1 + $0x20] ss:$8 sps:$4 sm:$0xff] (!%p213_p2)   ;;  %v2172_v6 = vld [vmem:[%s2989_s1 + $0x34] ss:$8 sps:$4 sm:$0xff] (!%p213_p2)   ;;  %v2174_v7 = vld [vmem:[%s2989_s1 + $0x30] ss:$8 sps:$4 sm:$0xff] (!%p213_p2)  }
   0x8   : > { %850 = vmatprep.subr.bf16.mxu0 (!%p213_p2), %v2166_v2  ;;  %v2175_v8 = vld [vmem:[%s2989_s1 + $0x44] ss:$8 sps:$4 sm:$0xff] (!%p213_p2)   ;;  %v2177_v9 = vld [vmem:[%s2989_s1 + $0x40] ss:$8 sps:$4 sm:$0xff] (!%p213_p2)   ;;  %v2178_v10 = vld [vmem:[%s2989_s1 + $0x54] ss:$8 sps:$4 sm:$0xff] (!%p213_p2)  }
   0x9   : > { %v2180_v11 = vld [vmem:[%s2989_s1 + $0x50] ss:$8 sps:$4 sm:$0xff] (!%p213_p2)   ;;  %v2181_v12 = vld [vmem:[%s2989_s1 + $0x64] ss:$8 sps:$4 sm:$0xff] (!%p213_p2)   ;;  %v2213_v14 = vld [vmem:[%s2989_s1 + $0x140] ss:$8 sps:$4 sm:$0xff] (!%p213_p2)  }
   0xa   : > { %v2211_v13 = vld [vmem:[%s2989_s1 + $0x144] ss:$8 sps:$4 sm:$0xff] (!%p213_p2)   ;;  %v2183_v16 = vld [vmem:[%s2989_s1 + $0x60] ss:$8 sps:$4 sm:$0xff] (!%p213_p2)   ;;  %v2184_v18 = vld [vmem:[%s2989_s1 + $0x74] ss:$8 sps:$4 sm:$0xff] (!%p213_p2)  }
   0xb   : > { %851 = vmatpush1.bf16.msra.mxu0 (!%p213_p2), %v2168_v3  ;;  %553 = vmatprep.subr.bf16.mxu1 (!%p213_p2), %v2211_v13  ;;  %v2219_v19 = vld [vmem:[%s2989_s1 + $0x154] ss:$8 sps:$4 sm:$0xff] (!%p213_p2)   ;;  %v2221_v20 = vld [vmem:[%s2989_s1 + $0x150] ss:$8 sps:$4 sm:$0xff] (!%p213_p2)   ;;  %v2225_v22 = vld [vmem:[%s2989_s1 + $0x164] ss:$8 sps:$4 sm:$0xff] (!%p213_p2)  }
   0xc   : > { %852 = vmatprep.subr.bf16.mxu0 (!%p213_p2), %v2169_v4  ;;  %554 = vmatpush1.bf16.msra.mxu1 (!%p213_p2), %v2213_v14  ;;  %v2186_v21 = vld [vmem:[%s2989_s1 + $0x70] ss:$8 sps:$4 sm:$0xff] (!%p213_p2)   ;;  %v2187_v23 = vld [vmem:[%s2989_s1 + $0x84] ss:$8 sps:$4 sm:$0xff] (!%p213_p2)   ;;  %v2227_v24 = vld [vmem:[%s2989_s1 + $0x160] ss:$8 sps:$4 sm:$0xff] (!%p213_p2)  }
   0xd   : > { %s2996_s22 = smov (!%p242_p3, %s1771_s22), 1  ;;  %555 = vmatprep.subr.bf16.mxu1 %v2219_v19  ;;  %v2231_v25 = vld [vmem:[%s2989_s1 + $0x174] ss:$8 sps:$4 sm:$0xff]   ;;  %v2189_v26 = vld [vmem:[%s2989_s1 + $0x80] ss:$8 sps:$4 sm:$0xff]   ;;  %v2362_v2 = vmov 0  }
   0xe   : > { %s2152_s19 = smul.u32 24, %s2996_s22  ;;  %v2190_v27 = vld [vmem:[%s2989_s1 + $0x94] ss:$8 sps:$4 sm:$0xff]   ;;  %v2233_v28 = vld [vmem:[%s2989_s1 + $0x170] ss:$8 sps:$4 sm:$0xff]   ;;  %vm549_vm0 = vcmask 523264  }
   0xf   : > { %853 = vmatpush1.bf16.msra.mxu0 %v2171_v5  ;;  %v2237_v29 = vld [vmem:[%s2989_s1 + $0x184] ss:$8 sps:$4 sm:$0xff]   ;;  %v2192_v30 = vld [vmem:[%s2989_s1 + $0x90] ss:$8 sps:$4 sm:$0xff]   ;;  %v2239_v32 = vld [vmem:[%s2989_s1 + $0x180] ss:$8 sps:$4 sm:$0xff]  }
  0x10   : > { %854 = vmatprep.subr.bf16.mxu0 %v2172_v6  ;;  %s2449_s28 = scalar_lea.vmem %s2988_s0, %s2152_s19  ;;  %556 = vmatpush1.bf16.msra.mxu1 %v2221_v20  ;;  %v2193_v31 = vld [vmem:[%s2989_s1 + $0xa4] ss:$8 sps:$4 sm:$0xff]   ;;  %v2244_v33 = vld [vmem:[%s2989_s1 + $0x194] ss:$8 sps:$4 sm:$0xff]   ;;  %v2195_v34 = vld [vmem:[%s2989_s1 + $0xa0] ss:$8 sps:$4 sm:$0xff]  }
  0x11   : > { %v2461_v15 = vld [vmem:[%s2449_s28] sm:$0x33]  ;;  %557 = vmatprep.subr.bf16.mxu1 %v2225_v22  ;;  %v2196_v35 = vld [vmem:[%s2989_s1 + $0xb4] ss:$8 sps:$4 sm:$0xff]   ;;  %v2246_v36 = vld [vmem:[%s2989_s1 + $0x190] ss:$8 sps:$4 sm:$0xff]  }
  0x12   : > { %v1866_v17 = vcombine.high %v2461_v15, %v2461_v15  ;;  %v2250_v37 = vld [vmem:[%s2989_s1 + $0x1a4] ss:$8 sps:$4 sm:$0xff]   ;;  %v2198_v38 = vld [vmem:[%s2989_s1 + $0xb0] ss:$8 sps:$4 sm:$0xff]   ;;  %v2252_v40 = vld [vmem:[%s2989_s1 + $0x1a0] ss:$8 sps:$4 sm:$0xff]   ;;  %v1865_v57 = vcombine.low %v2461_v15, %v2461_v15 }
  0x13   : > { %855 = vmatpush1.bf16.msra.mxu0 %v2174_v7  ;;  %v2199_v39 = vld [vmem:[%s2989_s1 + $0xc4] ss:$8 sps:$4 sm:$0xff]   ;;  %v2256_v41 = vld [vmem:[%s2989_s1 + $0x1b4] ss:$8 sps:$4 sm:$0xff]   ;;  %v2201_v42 = vld [vmem:[%s2989_s1 + $0xc0] ss:$8 sps:$4 sm:$0xff]  }
  0x14   : > { %856 = vmatprep.subr.bf16.mxu0 %v2175_v8  ;;  %880 = vmatprep.mubr.bf16.mxu0 %v1866_v17  ;;  %v2202_v43 = vld [vmem:[%s2989_s1 + $0xd4] ss:$8 sps:$4 sm:$0xff]   ;;  %v2258_v44 = vld [vmem:[%s2989_s1 + $0x1b0] ss:$8 sps:$4 sm:$0xff]   ;;  %v2262_v45 = vld [vmem:[%s2989_s1 + $0x1c4] ss:$8 sps:$4 sm:$0xff]  }
  0x15   : > { %558 = vmatpush1.bf16.msra.mxu1 %v2227_v24  ;;  %v2204_v46 = vld [vmem:[%s2989_s1 + $0xd0] ss:$8 sps:$4 sm:$0xff]   ;;  %v2205_v47 = vld [vmem:[%s2989_s1 + $0xe4] ss:$8 sps:$4 sm:$0xff]   ;;  %v2264_v48 = vld [vmem:[%s2989_s1 + $0x1c0] ss:$8 sps:$4 sm:$0xff]  }
  0x16   : > { %559 = vmatprep.subr.bf16.mxu1 %v2231_v25  ;;  %v2268_v49 = vld [vmem:[%s2989_s1 + $0x1d4] ss:$8 sps:$4 sm:$0xff]   ;;  %v2207_v50 = vld [vmem:[%s2989_s1 + $0xe0] ss:$8 sps:$4 sm:$0xff]   ;;  %v2270_v52 = vld [vmem:[%s2989_s1 + $0x1d0] ss:$8 sps:$4 sm:$0xff]  }
  0x17   : > { %857 = vmatpush1.bf16.msra.mxu0 %v2177_v9  ;;  %v2208_v51 = vld [vmem:[%s2989_s1 + $0xf4] ss:$8 sps:$4 sm:$0xff]   ;;  %v2274_v53 = vld [vmem:[%s2989_s1 + $0x1e4] ss:$8 sps:$4 sm:$0xff]   ;;  %v2210_v54 = vld [vmem:[%s2989_s1 + $0xf0] ss:$8 sps:$4 sm:$0xff]  }
  0x18   : > { %858 = vmatprep.subr.bf16.mxu0 %v2178_v10  ;;  %v2218_v55 = vld [vmem:[%s2989_s1 + $0x104] ss:$8 sps:$4 sm:$0xff]   ;;  %v2276_v56 = vld [vmem:[%s2989_s1 + $0x1e0] ss:$8 sps:$4 sm:$0xff]   ;;  %v2280_v58 = vld [vmem:[%s2989_s1 + $0x1f4] ss:$8 sps:$4 sm:$0xff]  }
  0x19   : > { %560 = vmatpush1.bf16.msra.mxu1 %v2233_v28  ;;  %v2216_v59 = vld [vmem:[%s2989_s1 + $0x100] ss:$8 sps:$4 sm:$0xff]   ;;  %v2224_v60 = vld [vmem:[%s2989_s1 + $0x114] ss:$8 sps:$4 sm:$0xff]   ;;  %v2282_v61 = vld [vmem:[%s2989_s1 + $0x1f0] ss:$8 sps:$4 sm:$0xff]  }
  0x1a   : > { %561 = vmatprep.subr.bf16.mxu1 %v2237_v29  ;;  %v2600_v62 = vld [vmem:[%s2449_s28 + $0xc] sm:$0x33]  ;;  %v2288_v4 = vld [vmem:[%s2989_s1 + $0x200] ss:$8 sps:$4 sm:$0xff]   ;;  %v2292_v5 = vld [vmem:[%s2989_s1 + $0x214] ss:$8 sps:$4 sm:$0xff]  }
  0x1b   : > { %859 = vmatpush1.bf16.msra.mxu0 %v2180_v11  ;;  %v2286_v63 = vld [vmem:[%s2989_s1 + $0x204] ss:$8 sps:$4 sm:$0xff]   ;;  %v1822_v0 = vcombine.high %v2600_v62, %v2600_v62  ;;  %v2222_v1 = vld [vmem:[%s2989_s1 + $0x110] ss:$8 sps:$4 sm:$0xff]   ;;  %v2228_v6 = vld [vmem:[%s2989_s1 + $0x120] ss:$8 sps:$4 sm:$0xff]  }
  0x1c   : > { %860 = vmatprep.subr.bf16.mxu0 %v2181_v12  ;;  %v2230_v3 = vld [vmem:[%s2989_s1 + $0x124] ss:$8 sps:$4 sm:$0xff]   ;;  %v2236_v7 = vld [vmem:[%s2989_s1 + $0x134] ss:$8 sps:$4 sm:$0xff]   ;;  %v2294_v8 = vld [vmem:[%s2989_s1 + $0x210] ss:$8 sps:$4 sm:$0xff]  }
  0x1d   : > { %562 = vmatpush1.bf16.msra.mxu1 %v2239_v32  ;;  %585 = vmatprep.mubr.bf16.mxu1 %v1822_v0  ;;  %v2298_v9 = vld [vmem:[%s2989_s1 + $0x224] ss:$8 sps:$4 sm:$0xff]   ;;  %v2234_v10 = vld [vmem:[%s2989_s1 + $0x130] ss:$8 sps:$4 sm:$0xff]   ;;  %v2300_v13 = vld [vmem:[%s2989_s1 + $0x220] ss:$8 sps:$4 sm:$0xff]  }
  0x1e   : > { %563 = vmatprep.subr.bf16.mxu1 %v2244_v33  ;;  %v2242_v11 = vld [vmem:[%s2989_s1 + $0x284] ss:$8 sps:$4 sm:$0xff]   ;;  %v2243_v12 = vld [vmem:[%s2449_s28 + $0x8] ss:$0 sps:$4 sm:$0x33]   ;;  %vm1291_vm1 = vcmask 1043456  }
  0x1f   : > { %861 = vmatpush1.bf16.msra.mxu0 %v2183_v16  ;;  %v2643_v14 = vld [vmem:[%s2449_s28] sm:$0x77]  ;;  %v2304_v15 = vld [vmem:[%s2989_s1 + $0x234] ss:$8 sps:$4 sm:$0xff]   ;;  %v2247_v24 = vld [vmem:[%s2989_s1 + $0x290] ss:$8 sps:$4 sm:$0xff]  }
  0x20   : > { %862 = vmatprep.subr.bf16.mxu0 %v2184_v18  ;;  %v1950_v16 = vcombine.high %v2643_v14, %v2643_v14  ;;  %v2240_v17 = vld [vmem:[%s2989_s1 + $0x280] ss:$8 sps:$4 sm:$0xff]   ;;  %v2249_v18 = vld [vmem:[%s2989_s1 + $0x294] ss:$8 sps:$4 sm:$0xff]   ;;  %v2314_v22 = vld [vmem:[%s2989_s1 + $0x244] ss:$8 sps:$4 sm:$0xff]  }
  0x21   : > { %564 = vmatpush1.bf16.msra.mxu1 %v2246_v36  ;;  %v2255_v25 = vld [vmem:[%s2989_s1 + $0x2a4] ss:$8 sps:$4 sm:$0xff]   ;;  %v2312_v28 = vld [vmem:[%s2989_s1 + $0x240] ss:$8 sps:$4 sm:$0xff]   ;;  %v2320_v29 = vld [vmem:[%s2989_s1 + $0x254] ss:$8 sps:$4 sm:$0xff]  }
  0x22   : > { %565 = vmatprep.subr.bf16.mxu1 %v2250_v37  ;;  %v989_v19 = vshrl.u32 %v1950_v16, 16  ;;  %v991_v20 = vshll.u32 %v1950_v16, 16  ;;  %v2318_v32 = vld [vmem:[%s2989_s1 + $0x250] ss:$8 sps:$4 sm:$0xff]   ;;  %v2326_v33 = vld [vmem:[%s2989_s1 + $0x264] ss:$8 sps:$4 sm:$0xff]  }
  0x23   : > { %863 = vmatpush1.bf16.msra.mxu0 %v2186_v21  ;;  %v2306_v21 = vld [vmem:[%s2989_s1 + $0x230] ss:$8 sps:$4 sm:$0xff]   ;;  %v2324_v36 = vld [vmem:[%s2989_s1 + $0x260] ss:$8 sps:$4 sm:$0xff]   ;;  %v2332_v37 = vld [vmem:[%s2989_s1 + $0x274] ss:$8 sps:$4 sm:$0xff]  }
  0x24   : > { %864 = vmatprep.subr.bf16.mxu0 %v2187_v23  ;;  %v993_v23 = vrot.slane %v991_v20, 1  ;;  %vm1503_vm2 = vcmask 64512   ;;  %s1999_s16 = sshll.u32 %s2996_s22, 2 }
  0x25   : > { %566 = vmatpush1.bf16.msra.mxu1 %v2252_v40  ;;  %v2330_v40 = vld [vmem:[%s2989_s1 + $0x270] ss:$8 sps:$4 sm:$0xff]   ;;  %s251_s19 = scalar_lea.vmem %s2994_s6, %s1999_s16 }
  0x26   : > { %567 = vmatprep.subr.bf16.mxu1 %v2256_v41  ;;  %v2271_v41 = vld [vmem:[%s2989_s1 + $0x2d0] ss:$8 sps:$4 sm:$0xff]  }
  0x27   : > { %865 = vmatpush1.bf16.msra.mxu0 %v2189_v26  ;;  %v1821_v26 = vcombine.low %v2600_v62, %v2600_v62  ;;  %v2327_v62 = vld [vmem:[%s2989_s1 + $0x360] ss:$8 sps:$4 sm:$0xff]  }
  0x28   : > { %866 = vmatprep.subr.bf16.mxu0 %v2190_v27  ;;  %v994_v27 = vor.u32 %v993_v23, %v989_v19  ;;  %v1322_v19 = vld [vmem:[%s2990_s2] sm:$0xff]  ;;  %v1341_v23 = vld [vmem:[%s2990_s2 + $0x98] sm:$0xff] }
  0x29   : > { %568 = vmatpush1.bf16.msra.mxu1 %v2258_v44  ;;  %v2277_v44 = vld [vmem:[%s2989_s1 + $0x2e0] ss:$8 sps:$4 sm:$0xff]  }
  0x2a   : > { %569 = vmatprep.subr.bf16.mxu1 %v2262_v45  ;;  %v2285_v45 = vld [vmem:[%s2989_s1 + $0x2f4] ss:$8 sps:$4 sm:$0xff]  }
  0x2b   : > { %867 = vmatpush1.bf16.msra.mxu0 %v2192_v30  ;;  %v2253_v30 = vld [vmem:[%s2989_s1 + $0x2a0] ss:$8 sps:$4 sm:$0xff]  }
  0x2c   : > { %868 = vmatprep.subr.bf16.mxu0 %v2193_v31  ;;  %v2261_v31 = vld [vmem:[%s2989_s1 + $0x2b4] ss:$8 sps:$4 sm:$0xff]  }
  0x2d   : > { %570 = vmatpush1.bf16.msra.mxu1 %v2264_v48  ;;  %v2289_v48 = vld [vmem:[%s2989_s1 + $0x300] ss:$8 sps:$4 sm:$0xff]  }
  0x2e   : > { %571 = vmatprep.subr.bf16.mxu1 %v2268_v49  ;;  %v2297_v49 = vld [vmem:[%s2989_s1 + $0x314] ss:$8 sps:$4 sm:$0xff]  }
  0x2f   : > { %869 = vmatpush1.bf16.msra.mxu0 %v2195_v34  ;;  %v2259_v34 = vld [vmem:[%s2989_s1 + $0x2b0] ss:$8 sps:$4 sm:$0xff]  }
  0x30   : > { %870 = vmatprep.subr.bf16.mxu0 %v2196_v35  ;;  %v2267_v35 = vld [vmem:[%s2989_s1 + $0x2c4] ss:$8 sps:$4 sm:$0xff]  }
  0x31   : > { %572 = vmatpush1.bf16.msra.mxu1 %v2270_v52  ;;  %v2301_v52 = vld [vmem:[%s2989_s1 + $0x320] ss:$8 sps:$4 sm:$0xff]  }
  0x32   : > { %573 = vmatprep.subr.bf16.mxu1 %v2274_v53  ;;  %v2309_v53 = vld [vmem:[%s2989_s1 + $0x334] ss:$8 sps:$4 sm:$0xff]  }
  0x33   : > { %871 = vmatpush1.bf16.msra.mxu0 %v2198_v38  ;;  %v2265_v38 = vld [vmem:[%s2989_s1 + $0x2c0] ss:$8 sps:$4 sm:$0xff]  }
  0x34   : > { %872 = vmatprep.subr.bf16.mxu0 %v2199_v39  ;;  %v2273_v39 = vld [vmem:[%s2989_s1 + $0x2d4] ss:$8 sps:$4 sm:$0xff]  }
  0x35   : > { %574 = vmatpush1.bf16.msra.mxu1 %v2276_v56  ;;  %v2315_v56 = vld [vmem:[%s2989_s1 + $0x340] ss:$8 sps:$4 sm:$0xff]  }
  0x36   : > { %575 = vmatprep.subr.bf16.mxu1 %v2280_v58  ;;  %v1949_v58 = vcombine.low %v2643_v14, %v2643_v14 }
  0x37   : > { %873 = vmatpush1.bf16.msra.mxu0 %v2201_v42  ;;  %v2279_v42 = vld [vmem:[%s2989_s1 + $0x2e4] ss:$8 sps:$4 sm:$0xff]  }
  0x38   : > { %874 = vmatprep.subr.bf16.mxu0 %v2202_v43  ;;  %v2336_v43 = vld [vmem:[%s2449_s28 + $0x14] ss:$0 sps:$4 sm:$0x33]   ;;  %v982_v0 = vshrl.u32 %v1949_v58, 16 }
  0x39   : > { %576 = vmatpush1.bf16.msra.mxu1 %v2282_v61  ;;  %v984_v61 = vshll.u32 %v1949_v58, 16 }
  0x3a   : > { %577 = vmatprep.subr.bf16.mxu1 %v2286_v63  ;;  %v2335_v63 = vld [vmem:[%s2989_s1 + $0x374] ss:$8 sps:$4 sm:$0xff]  }
  0x3b   : > { %875 = vmatpush1.bf16.msra.mxu0 %v2204_v46  ;;  %v2283_v46 = vld [vmem:[%s2989_s1 + $0x2f0] ss:$8 sps:$4 sm:$0xff]  }
  0x3c   : > { %876 = vmatprep.subr.bf16.mxu0 %v2205_v47  ;;  %v2291_v47 = vld [vmem:[%s2989_s1 + $0x304] ss:$8 sps:$4 sm:$0xff]  }
  0x3d   : > { %578 = vmatpush1.bf16.msra.mxu1 %v2288_v4  ;;  %v2341_v4 = vld [vmem:[%s2989_s1 + $0x384] ss:$8 sps:$4 sm:$0xff]  }
  0x3e   : > { %579 = vmatprep.subr.bf16.mxu1 %v2292_v5 }
  0x3f   : > { %877 = vmatpush1.bf16.msra.mxu0 %v2207_v50  ;;  %v2295_v50 = vld [vmem:[%s2989_s1 + $0x310] ss:$8 sps:$4 sm:$0xff]  }
  0x40   : > { %878 = vmatprep.subr.bf16.mxu0 %v2208_v51  ;;  %v2303_v51 = vld [vmem:[%s2989_s1 + $0x324] ss:$8 sps:$4 sm:$0xff]  }
  0x41   : > { %580 = vmatpush1.bf16.msra.mxu1 %v2294_v8  ;;  %v2351_v8 = vld [vmem:[%s2449_s28 + $0x8] ss:$0 sps:$4 sm:$0x77]  }
  0x42   : > { %581 = vmatprep.subr.bf16.mxu1 %v2298_v9  ;;  %v2342_v9 = vld [vmem:[%s2989_s1 + $0x390] ss:$8 sps:$4 sm:$0xff]   ;;  %v996_v14 = vshrl.u32 %v2351_v8, 16 }
  0x43   : > { %879 = vmatpush1.bf16.msra.mxu0 %v2210_v54  ;;  %v2307_v54 = vld [vmem:[%s2989_s1 + $0x330] ss:$8 sps:$4 sm:$0xff]  }
  0x44   : > { %889 = vmatprep.subr.bf16.mxu0 %v2218_v55  ;;  %v2317_v55 = vld [vmem:[%s2989_s1 + $0x344] ss:$8 sps:$4 sm:$0xff]  }
  0x45   : > { %582 = vmatpush1.bf16.msra.mxu1 %v2300_v13  ;;  %v2350_v13 = vld [vmem:[%s2989_s1 + $0x3b4] ss:$8 sps:$4 sm:$0xff]  }
  0x46   : > { %881 = vmatmul.mubr.bf16.vlgmr.msra.gmra.mrb[0].mxu0 %v1865_v57  ;;  %583 = vmatprep.subr.bf16.mxu1 %v2304_v15  ;;  %v2323_v57 = vld [vmem:[%s2989_s1 + $0x354] ss:$8 sps:$4 sm:$0xff]  }
  0x47   : > { %890 = vmatpush1.bf16.msra.mxu0 %v2216_v59  ;;  %921 = vmatprep.mubr.bf16.mxu0 %v2362_v2  ;;  %v2321_v59 = vld [vmem:[%s2989_s1 + $0x350] ss:$8 sps:$4 sm:$0xff]  }
  0x48   : > { %891 = vmatprep.subr.bf16.mxu0 %v2224_v60  ;;  %v2329_v60 = vld [vmem:[%s2989_s1 + $0x364] ss:$8 sps:$4 sm:$0xff]  }
  0x49   : > { %584 = vmatpush1.bf16.msra.mxu1 %v2306_v21  ;;  %v1323_v21 = vld [vmem:[%s2990_s2 + $0x8] sm:$0xff] }
  0x4a   : > { %594 = vmatprep.subr.bf16.mxu1 %v2314_v22  ;;  %v1340_v22 = vld [vmem:[%s2990_s2 + $0x90] sm:$0xff] }
  0x4b   : > { %892 = vmatpush1.bf16.msra.mxu0 %v2222_v1  ;;  %v986_v1 = vrot.slane %v984_v61, 1  ;;  %v1336_v61 = vld [vmem:[%s2990_s2 + $0x70] sm:$0xff] }
  0x4c   : > { %893 = vmatprep.subr.bf16.mxu0 %v2230_v3  ;;  %586 = vmatmul.mubr.bf16.vlgmr.msra.gmra.mrb[0].mxu1 %v1821_v26  ;;  %v2333_v3 = vld [vmem:[%s2989_s1 + $0x370] ss:$8 sps:$4 sm:$0xff]  }
  0x4d   : > { %595 = vmatpush1.bf16.msra.mxu1 %v2312_v28  ;;  %626 = vmatprep.mubr.bf16.mxu1 %v2362_v2  ;;  %v987_v5 = vor.u32 %v986_v1, %v982_v0  ;;  %v1324_v26 = vld [vmem:[%s2990_s2 + $0x10] sm:$0xff]  ;;  %v1342_v28 = vld [vmem:[%s2990_s2 + $0xa0] sm:$0xff] }
  0x4e   : > { %596 = vmatprep.subr.bf16.mxu1 %v2320_v29  ;;  %v1343_v29 = vld [vmem:[%s2990_s2 + $0xa8] sm:$0xff] }
  0x4f   : > { %894 = vmatpush1.bf16.msra.mxu0 %v2228_v6  ;;  %v2339_v6 = vld [vmem:[%s2989_s1 + $0x380] ss:$8 sps:$4 sm:$0xff]  }
  0x50   : > { %895 = vmatprep.subr.bf16.mxu0 %v2236_v7  ;;  %v2344_v7 = vld [vmem:[%s2989_s1 + $0x394] ss:$8 sps:$4 sm:$0xff]  }
  0x51   : > { %597 = vmatpush1.bf16.msra.mxu1 %v2318_v32  ;;  %v1326_v32 = vld [vmem:[%s2990_s2 + $0x20] sm:$0xff] }
  0x52   : > { %598 = vmatprep.subr.bf16.mxu1 %v2326_v33  ;;  %v1327_v33 = vld [vmem:[%s2990_s2 + $0x28] sm:$0xff] }
  0x53   : > { %896 = vmatpush1.bf16.msra.mxu0 %v2234_v10  ;;  %v2347_v10 = vld [vmem:[%s2989_s1 + $0x3a4] ss:$8 sps:$4 sm:$0xff]  }
  0x54   : > { %1207 = vmatprep.subr.bf16.mxu0 %v2242_v11  ;;  %v998_v11 = vshll.u32 %v2351_v8, 16 }
  0x55   : > { %599 = vmatpush1.bf16.msra.mxu1 %v2324_v36  ;;  %v2858_v36 = vpack.c.bf16 %v1327_v33, %v1326_v32 }
  0x56   : > { %1908 = vmatmul.mubr.msk.bf16.vlgmr.msra.gmra.mrb[0].mxu0 %vm549_vm0, %v2243_v12  ;;  %600 = vmatprep.subr.bf16.mxu1 %v2332_v37  ;;  %v2345_v12 = vld [vmem:[%s2989_s1 + $0x3a0] ss:$8 sps:$4 sm:$0xff]   ;;  %v1000_v15 = vrot.slane %v998_v11, 1 }
  0x57   : > { %1208 = vmatpush1.bf16.msra.mxu0 %v2240_v17  ;;  %1239 = vmatprep.mubr.bf16.mxu0 %v994_v27  ;;  %v1338_v17 = vld [vmem:[%s2990_s2 + $0x80] sm:$0xff]  ;;  %v1325_v27 = vld [vmem:[%s2990_s2 + $0x18] sm:$0xff] }
  0x58   : > { %1209 = vmatprep.subr.bf16.mxu0 %v2249_v18  ;;  %v1001_v16 = vor.u32 %v1000_v15, %v996_v14  ;;  %v1339_v18 = vld [vmem:[%s2990_s2 + $0x88] sm:$0xff] }
  0x59   : > { %601 = vmatpush1.bf16.msra.mxu1 %v2330_v40  ;;  %v2070_v20 = vpack.c.bf16 %v1339_v18, %v1338_v17 }
  0x5b   : > { %1210 = vmatpush1.bf16.msra.mxu0 %v2247_v24  ;;  %v2823_v24 = vpack.c.bf16 %v1323_v21, %v1322_v19  ;;  %2071 = vmatprep.subr.bf16.mxu1 %v2070_v20 }
  0x5c   : > { %1211 = vmatprep.subr.bf16.mxu0 %v2255_v25  ;;  %1864 = vmatmul.mubr.msk.bf16.vlgmr.msra.gmra.mrb[0].mxu1 %vm549_vm0, %v2336_v43  ;;  %v2825_v25 = vpack.c.bf16 %v1341_v23, %v1340_v22 }
  0x5d   : > { %2073 = vmatpush3.bf16.msra.mxu1 %v2823_v24 }
  0x5e   : > { %2075 = vmatprep.subr.bf16.mxu1 %v2825_v25 }
  0x5f   : > { %1212 = vmatpush1.bf16.msra.mxu0 %v2253_v30  ;;  %v2840_v30 = vpack.c.bf16 %v1325_v27, %v1324_v26 }
  0x60   : > { %1213 = vmatprep.subr.bf16.mxu0 %v2261_v31  ;;  %v2843_v31 = vpack.c.bf16 %v1343_v29, %v1342_v28 }
  0x61   : > { %2077 = vmatpush3.bf16.msra.mxu1 %v2840_v30 }
  0x62   : > { %2079 = vmatprep.subr.bf16.mxu1 %v2843_v31 }
  0x63   : > { %1214 = vmatpush1.bf16.msra.mxu0 %v2259_v34  ;;  %v1344_v34 = vld [vmem:[%s2990_s2 + $0xb0] sm:$0xff] }
  0x64   : > { %1215 = vmatprep.subr.bf16.mxu0 %v2267_v35  ;;  %v1345_v35 = vld [vmem:[%s2990_s2 + $0xb8] sm:$0xff] }
  0x65   : > { %v2861_v37 = vpack.c.bf16 %v1345_v35, %v1344_v34  ;;  %2081 = vmatpush3.bf16.msra.mxu1 %v2858_v36 }
  0x67   : > { %1216 = vmatpush1.bf16.msra.mxu0 %v2265_v38  ;;  %v1328_v38 = vld [vmem:[%s2990_s2 + $0x30] sm:$0xff]  ;;  %2083 = vmatprep.subr.bf16.mxu1 %v2861_v37 }
  0x68   : > { %1217 = vmatprep.subr.bf16.mxu0 %v2273_v39  ;;  %v1329_v39 = vld [vmem:[%s2990_s2 + $0x38] sm:$0xff] }
  0x69   : > { %v2870_v40 = vpack.c.bf16 %v1329_v39, %v1328_v38 }
  0x6b   : > { %1218 = vmatpush1.bf16.msra.mxu0 %v2271_v41  ;;  %2085 = vmatpush3.bf16.msra.mxu1 %v2870_v40  ;;  %v1346_v41 = vld [vmem:[%s2990_s2 + $0xc0] sm:$0xff] }
  0x6c   : > { %1219 = vmatprep.subr.bf16.mxu0 %v2279_v42  ;;  %v1347_v42 = vld [vmem:[%s2990_s2 + $0xc8] sm:$0xff] }
  0x6d   : > { %v2880_v43 = vpack.c.bf16 %v1347_v42, %v1346_v41 }
  0x6f   : > { %1220 = vmatpush1.bf16.msra.mxu0 %v2277_v44  ;;  %v1330_v44 = vld [vmem:[%s2990_s2 + $0x40] sm:$0xff]  ;;  %2087 = vmatprep.subr.bf16.mxu1 %v2880_v43 }
  0x70   : > { %1221 = vmatprep.subr.bf16.mxu0 %v2285_v45  ;;  %v1331_v45 = vld [vmem:[%s2990_s2 + $0x48] sm:$0xff] }
  0x73   : > { %1222 = vmatpush1.bf16.msra.mxu0 %v2283_v46  ;;  %v2888_v46 = vpack.c.bf16 %v1331_v45, %v1330_v44 }
  0x74   : > { %1223 = vmatprep.subr.bf16.mxu0 %v2291_v47  ;;  %v1348_v47 = vld [vmem:[%s2990_s2 + $0xd0] sm:$0xff] }
  0x75   : > { %2089 = vmatpush3.bf16.msra.mxu1 %v2888_v46 }
  0x77   : > { %1224 = vmatpush1.bf16.msra.mxu0 %v2289_v48  ;;  %v1349_v48 = vld [vmem:[%s2990_s2 + $0xd8] sm:$0xff] }
  0x78   : > { %1225 = vmatprep.subr.bf16.mxu0 %v2297_v49  ;;  %v2898_v49 = vpack.c.bf16 %v1349_v48, %v1348_v47 }
  0x7a   : > { %2091 = vmatprep.subr.bf16.mxu1 %v2898_v49 }
  0x7b   : > { %1226 = vmatpush1.bf16.msra.mxu0 %v2295_v50  ;;  %v1332_v50 = vld [vmem:[%s2990_s2 + $0x50] sm:$0xff] }
  0x7c   : > { %1227 = vmatprep.subr.bf16.mxu0 %v2303_v51  ;;  %v1333_v51 = vld [vmem:[%s2990_s2 + $0x58] sm:$0xff] }
  0x7f   : > { %1228 = vmatpush1.bf16.msra.mxu0 %v2301_v52  ;;  %v2906_v52 = vpack.c.bf16 %v1333_v51, %v1332_v50 }
  0x80   : > { %1229 = vmatprep.subr.bf16.mxu0 %v2309_v53  ;;  %v1350_v53 = vld [vmem:[%s2990_s2 + $0xe0] sm:$0xff] }
  0x81   : > { %2093 = vmatpush3.bf16.msra.mxu1 %v2906_v52 }
  0x83   : > { %1230 = vmatpush1.bf16.msra.mxu0 %v2307_v54  ;;  %v1351_v54 = vld [vmem:[%s2990_s2 + $0xe8] sm:$0xff] }
  0x84   : > { %1231 = vmatprep.subr.bf16.mxu0 %v2317_v55  ;;  %v2916_v55 = vpack.c.bf16 %v1351_v54, %v1350_v53 }
  0x86   : > { %2095 = vmatprep.subr.bf16.mxu1 %v2916_v55 }
  0x87   : > { %1232 = vmatpush1.bf16.msra.mxu0 %v2315_v56  ;;  %v1334_v56 = vld [vmem:[%s2990_s2 + $0x60] sm:$0xff] }
  0x88   : > { %1233 = vmatprep.subr.bf16.mxu0 %v2323_v57  ;;  %v1335_v57 = vld [vmem:[%s2990_s2 + $0x68] sm:$0xff] }
  0x89   : > { %v2924_v58 = vpack.c.bf16 %v1335_v57, %v1334_v56 }
  0x8b   : > { %1234 = vmatpush1.bf16.msra.mxu0 %v2321_v59  ;;  %2097 = vmatpush3.bf16.msra.mxu1 %v2924_v58  ;;  %v1352_v59 = vld [vmem:[%s2990_s2 + $0xf0] sm:$0xff] }
  0x8c   : > { %1235 = vmatprep.subr.bf16.mxu0 %v2329_v60  ;;  %v1353_v60 = vld [vmem:[%s2990_s2 + $0xf8] sm:$0xff] }
  0x8f   : > { %1236 = vmatpush1.bf16.msra.mxu0 %v2327_v62  ;;  %v2098_v62 = vpack.c.bf16 %v1353_v60, %v1352_v59  ;;  %v1662_v60 = vld [vmem:[%s2992_s4] sm:$0x3] }
  0x90   : > { %1237 = vmatprep.subr.bf16.mxu0 %v2335_v63  ;;  %v1337_v63 = vld [vmem:[%s2990_s2 + $0x78] sm:$0xff] }
  0x91   : > { %v2100_v0 = vpack.c.bf16 %v1337_v63, %v1336_v61  ;;  %2099 = vmatprep.subr.bf16.mxu1 %v2098_v62 }
  0x93   : > { %1238 = vmatpush1.bf16.msra.mxu0 %v2333_v3  ;;  %2101 = vmatpush3.bf16.msra.mxu1 %v2100_v0 }
  0x94   : > { %1248 = vmatprep.subr.bf16.mxu0 %v2341_v4  ;;  %2103 = vmatprep.subr.bf16.mxu1 %v2070_v20 }
  0x96   : > { %1240 = vmatmul.mubr.bf16.vlgmr.msra.gmra.mrb[0].mxu0 %v987_v5 }
  0x97   : > { %1249 = vmatpush1.bf16.msra.mxu0 %v2339_v6  ;;  %1280 = vmatprep.mubr.bf16.mxu0 %v2362_v2  ;;  %v2348_v2 = vld [vmem:[%s2989_s1 + $0x3b0] ss:$8 sps:$4 sm:$0xff]  }
  0x98   : > { %1250 = vmatprep.subr.bf16.mxu0 %v2344_v7 }
  0x9b   : > { %1251 = vmatpush1.bf16.msra.mxu0 %v2342_v9 }
  0x9c   : > { %1252 = vmatprep.subr.bf16.mxu0 %v2347_v10 }
  0x9f   : > { %1253 = vmatpush1.bf16.msra.mxu0 %v2345_v12 }
  0xa0   : > { %1254 = vmatprep.subr.bf16.mxu0 %v2350_v13 }
  0xa3   : > { %1255 = vmatpush1.bf16.msra.mxu0 %v2348_v2 }
  0xa6   : > { %1992 = vmatmul.mubr.msk.bf16.vlgmr.msra.gmra.mrb[0].mxu0 %vm549_vm0, %v1001_v16 }
 0x12f   : > { %v628_v1 = vpop.f32.mrb[0].mxu1 }
 0x130   : > { %v630_v3 = vpop.f32.mrb[1].mxu1 }
 0x131   : > { %v632_v4 = vpop.f32.mrb[2].mxu1 }
 0x132   : > { %v633_v5 = vpop.f32.mrb[3].mxu1 }
 0x133   : > { %v1686_v5 = vld [vmem:[%s2993_s5] sm:$0x3] }
 0x179   : > { %v1282_v6 = vpop.f32.mrb[0].mxu0 }
 0x17a   : > { %v2940_v7 = vadd.f32 %v1282_v6, %v628_v1  ;;  %v1284_v8 = vpop.f32.mrb[1].mxu0 }
 0x17b   : > { %v2942_v9 = vadd.f32 %v1284_v8, %v630_v3  ;;  %v1286_v10 = vpop.f32.mrb[2].mxu0 }
 0x17c   : > { %v1292_v11 = vsel %vm1291_vm1, %v2940_v7, 0.0  ;;  %v1287_v12 = vpop.f32.mrb[3].mxu0  ;;  %v1306_v39 = vmul.f32 %v2940_v7, %v2940_v7 }
 0x17d   : > { %v1293_v13 = vrot.slane %v1292_v11, 4  ;;  %v1299_v14 = vsel %vm1291_vm1, %v2942_v9, 0.0  ;;  %v1307_v15 = vmul.f32 %v2942_v9, %v2942_v9 }
 0x17e   : > { %v1300_v2 = vrot.slane %v1299_v14, 4  ;;  %v1308_v41 = vsel %vm1291_vm1, %v1306_v39, 0.0 }
 0x17f   : > { %v1294_v16 = vadd.f32 %v1293_v13, %v1292_v11  ;;  %v1315_v17 = vsel %vm1291_vm1, %v1307_v15, 0.0  ;;  %v1309_v42 = vrot.slane %v1308_v41, 4 }
 0x180   : > { %v1301_v18 = vadd.f32 %v1300_v2, %v1299_v14  ;;  %v1316_v19 = vrot.slane %v1315_v17, 4 }
 0x181   : > { %v1295_v20 = vrot.slane %v1294_v16, 2 }
 0x182   : > { %v1302_v21 = vrot.slane %v1301_v18, 2  ;;  %v1317_v22 = vadd.f32 %v1316_v19, %v1315_v17 }
 0x183   : > { %v1296_v23 = vadd.f32 %v1295_v20, %v1294_v16 }
 0x184   : > { %v1303_v26 = vadd.f32 %v1302_v21, %v1301_v18  ;;  %v1318_v27 = vrot.slane %v1317_v22, 2 }
 0x185   : > { %v1297_v28 = vrot.slane %v1296_v23, 1 }
 0x186   : > { %v1304_v29 = vrot.slane %v1303_v26, 1  ;;  %v1319_v32 = vadd.f32 %v1318_v27, %v1317_v22 }
 0x187   : > { %v1298_v35 = vadd.f32 %v1297_v28, %v1296_v23 }
 0x188   : > { %v1305_v33 = vadd.f32 %v1304_v29, %v1303_v26  ;;  %v1320_v34 = vrot.slane %v1319_v32, 1 }
 0x18a   : > { %1418 = vmatprep.mubr.f32.mxu1 %v1305_v33  ;;  %v1321_v38 = vadd.f32 %v1320_v34, %v1319_v32 }
 0x18b   : > { %1419 = vmatmul.mubr.f32.vlgmr.msra.gmra.mrb[4].mxu1 %v1298_v35 }
 0x18c   : > { %2105 = vmatpush3.bf16.msra.mxu1 %v2823_v24  ;;  %1488 = vmatprep.mubr.f32.mxu1 %v1321_v38  ;;  %v1310_v24 = vadd.f32 %v1309_v42, %v1308_v41 }
 0x18d   : > { %2107 = vmatprep.subr.bf16.mxu1 %v2825_v25 }
 0x18e   : > { %v1311_v25 = vrot.slane %v1310_v24, 2 }
 0x190   : > { %2109 = vmatpush3.bf16.msra.mxu1 %v2840_v30  ;;  %v1312_v30 = vadd.f32 %v1311_v25, %v1310_v24 }
 0x191   : > { %2111 = vmatprep.subr.bf16.mxu1 %v2843_v31 }
 0x192   : > { %v1313_v31 = vrot.slane %v1312_v30, 1 }
 0x194   : > { %2113 = vmatpush3.bf16.msra.mxu1 %v2858_v36  ;;  %v1314_v36 = vadd.f32 %v1313_v31, %v1312_v30 }
 0x195   : > { %2115 = vmatprep.subr.bf16.mxu1 %v2861_v37  ;;  %v1502_v37 = vld [vmem:[%s2991_s3 + $0x8] sm:$0xff] }
 0x198   : > { %2117 = vmatpush3.bf16.msra.mxu1 %v2870_v40  ;;  %v1501_v40 = vld [vmem:[%s2991_s3] sm:$0xff] }
 0x199   : > { %2119 = vmatprep.subr.bf16.mxu1 %v2880_v43  ;;  %v2363_v43 = vmov 0.0  }
 0x19c   : > { %2121 = vmatpush3.bf16.msra.mxu1 %v2888_v46 }
 0x19d   : > { %2123 = vmatprep.subr.bf16.mxu1 %v2898_v49 }
 0x1a0   : > { %2125 = vmatpush3.bf16.msra.mxu1 %v2906_v52 }
 0x1a1   : > { %2127 = vmatprep.subr.bf16.mxu1 %v2916_v55 }
 0x1a4   : > { %2129 = vmatpush3.bf16.msra.mxu1 %v2924_v58  ;;  %v1652_v58 = vlaneseq }
 0x1a5   : > { %2131 = vmatprep.subr.bf16.mxu1 %v2098_v62 }
 0x1a6   : > { %v1653_v59 = vshrl.u32 %v1652_v58, 7 }
 0x1a8   : > { %2133 = vmatpush3.bf16.msra.mxu1 %v2100_v0  ;;  %v1670_v61 = vsub.s32 1, %v1653_v59  ;;  %v1654_v62 = vsub.s32 0, %v1653_v59 }
 0x1a9   : > { %1507 = vmatprep.subr.mxu1 %v1502_v37 }
 0x1aa   : > { %v1667_v63 = vrot.slane %v1662_v60, %v1654_v62  ;;  %v1671_v0 = vrot.slane %v1662_v60, %v1670_v61  ;;  %v1691_v13 = vrot.slane %v1686_v5, %v1654_v62  ;;  %v1695_v2 = vrot.slane %v1686_v5, %v1670_v61 }
 0x1ab   : > { %1489 = vmatmul.mubr.f32.vlgmr.msra.gmra.mrb[6].mxu1 %v1314_v36 }
 0x1ac   : > { %1508 = vmatpush1.msra.mxu1 %v1501_v40  ;;  %1571 = vmatprep.mubr.f32.mxu1 %v2363_v43 }
 0x1ad   : > { %1581 = vmatprep.subr.mxu1 %v1502_v37 }
 0x25e   : > { %v2032_v44 = vpop.f32.mrb[4].mxu1 }
 0x25f   : > { %v2033_v45 = vpop.f32.mrb[5].mxu1 }
 0x260   : > { %v2034_v46 = vadd.f32 %v2033_v45, %v2032_v44 }
 0x262   : > { %v1495_v47 = vmul.f32 0.0078125, %v2034_v46 }
 0x264   : > { %1993 = vmatmul.mubr.msk.f32.vlgmr.msra.gmra.mrb[8].mxu1 %vm1503_vm2, %v1495_v47  ;;  %v1497_v51 = vmul.f32 %v1495_v47, %v1495_v47 }
 0x265   : > { %1582 = vmatpush1.msra.mxu1 %v1501_v40  ;;  %1645 = vmatprep.mubr.f32.mxu1 %v2363_v43 }
 0x27e   : > { %v2067_v48 = vpop.f32.mrb[6].mxu1 }
 0x27f   : > { %v2068_v49 = vpop.f32.mrb[7].mxu1 }
 0x280   : > { %v2069_v50 = vadd.f32 %v2068_v49, %v2067_v48 }
 0x282   : > { %v1496_v52 = vmul.f32 0.0078125, %v2069_v50 }
 0x284   : > { %v1498_v53 = vsub.f32 %v1496_v52, %v1497_v51 }
 0x286   : > { %v1499_v54 = vadd.f32 1e-05, %v1498_v53 }
 0x288   : > { %2352 = vrsqrt.f32 %v1499_v54 }
 0x292   : > { %v2353_v55 = vpop.eup %2352 }
 0x293   : > { %1994 = vmatmul.mubr.msk.f32.vlgmr.msra.gmra.mrb[10].mxu1 %vm1503_vm2, %v2353_v55 }
 0x337   : > { %v1573_v56 = vpop.f32.mrb[8].mxu1 }
 0x338   : > { %v1575_v57 = vpop.f32.mrb[9].mxu1  ;;  %v1655_v1 = vrot.slane %v1573_v56, %v1654_v62 }
 0x339   : > { %v1659_v3 = vrot.slane %v1575_v57, %v1654_v62 }
 0x33a   : > { %v1660_v11 = vsub.f32 %v2940_v7, %v1655_v1 }
 0x33b   : > { %v1661_v14 = vsub.f32 %v2942_v9, %v1659_v3 }
 0x366   : > { %v1647_v4 = vpop.f32.mrb[10].mxu1 }
 0x367   : > { %v1674_v6 = vmul.f32 %v1667_v63, %v1647_v4  ;;  %v1649_v8 = vpop.f32.mrb[11].mxu1 }
 0x368   : > { %v1675_v10 = vmul.f32 %v1671_v0, %v1649_v8 }
 0x369   : > { %v1679_v12 = vrot.slane %v1674_v6, %v1654_v62 }
 0x36a   : > { %v1683_v15 = vrot.slane %v1675_v10, %v1654_v62 }
 0x36b   : > { %v1684_v16 = vmul.f32 %v1679_v12, %v1660_v11 }
 0x36c   : > { %v1685_v17 = vmul.f32 %v1683_v15, %v1661_v14 }
 0x36d   : > { %v1698_v18 = vadd.f32 %v1691_v13, %v1684_v16 }
 0x36e   : > { %v1699_v19 = vadd.f32 %v1695_v2, %v1685_v17 }
 0x36f   : > { %v1700_v20 = vmax.f32 %v1698_v18, 0.0 }
 0x370   : > { %v1701_v21 = vmax.f32 %v1699_v19, 0.0 }
 0x372   : > { %v1995_v22 = vpack.c.bf16 %v1701_v21, %v1700_v20 }
 0x374   : > { %1996 = vst.sshfl [vmem:[%s251_s19] sm:$0x33 pattern:$0x76325410] %v1995_v22 }
 0x375 PF: > { %s16_s21 = sadd.s32 1, %s2360_s21  }
 0x376   : > { %p13_p4 = scmp.ge.s32.totalorder %s16_s21, 4  }
 0x378   :  { %15 = sbr.rel (!%p13_p4) target bundleno = 1 (0x1), region = 77 }

// kernel: full_conv_patch_embedding_forward.7
= control target key start
LH: loop header
LB: loop body
LE: loop exit
PB: predicated region body
PF: predicated region fallthrough
CT: control target
= control target key end

     0   :  { %s769_s9 = smov 0   ;;  %s890_s0 = inlined_call_operand.vmem [shape: bf16[2,2,2,256], index: 0, kind: input, shape index: {}]   ;;  %s891_s1 = inlined_call_operand.vmem [shape: bf16[2,256,128], index: 1, kind: input, shape index: {}]   ;;  %s892_s2 = inlined_call_operand.vmem [shape: f32[2,2,128], index: 2, kind: output, shape index: {}]  }
   0x1 LB: > { %s584_s10 = sadd.s32 4294967295, %s751_s9   ;;  %p588_p0 = scmp.ge.s32.totalorder %s751_s9, 1  ;;  %s751_s9 = sphi %s769_s9, %s12_s9  }
   0x2   : > { %p111_p1 = scmp.lt.s32.totalorder %s751_s9, 3 }
   0x4   : > { %p112_p2 = pnand %p588_p0, %p111_p1 }
   0x5   : > { %v713_v0 = vld [vmem:[%s891_s1 + $0xc0] sm:$0xff] (!%p112_p2)   ;;  %v717_v4 = vld [vmem:[%s891_s1 + $0xc8] sm:$0xff] (!%p112_p2)   ;;  %v721_v8 = vld [vmem:[%s891_s1 + $0xd0] sm:$0xff] (!%p112_p2)   ;;  %p131_p3 = scmp.lt.s32.totalorder (!%p112_p2), %s584_s10, 1  ;;  %v220_v30 = vlaneseq (!%p112_p2)  ;;  %v753_v34 = vmov (!%p112_p2), 1966171168  }
   0x6   : > { %115 = sbr.rel (%p112_p2) target bundleno = 258 (0x102), region = 28  ;;  %v714_v1 = vld [vmem:[%s891_s1 + $0x40] sm:$0xff] (!%p112_p2)   ;;  %660 = vmatprep.subr.bf16.mxu0 (!%p112_p2), %v713_v0  ;;  %v718_v5 = vld [vmem:[%s891_s1 + $0x48] sm:$0xff] (!%p112_p2)   ;;  %v722_v9 = vld [vmem:[%s891_s1 + $0x50] sm:$0xff] (!%p112_p2)   ;;  %v218_v35 = vunpack.c.l.s4 (!%p112_p2), %v753_v34 }
   0x7   : > { %v715_v2 = vld [vmem:[%s891_s1 + $0x80] sm:$0xff] (!%p112_p2)   ;;  %682 = vmatprep.subr.bf16.mxu1 (!%p112_p2), %v714_v1  ;;  %v719_v6 = vld [vmem:[%s891_s1 + $0x88] sm:$0xff] (!%p112_p2)   ;;  %v723_v10 = vld [vmem:[%s891_s1 + $0x90] sm:$0xff] (!%p112_p2)   ;;  %v221_v36 = vshrl.u32 (!%p112_p2), %v220_v30, 7 }
   0x8   : > { %v716_v3 = vld [vmem:[%s891_s1] sm:$0xff] (!%p112_p2)   ;;  %661 = vmatpush3.bf16.msra.mxu0 (!%p112_p2), %v715_v2  ;;  %v720_v7 = vld [vmem:[%s891_s1 + $0x8] sm:$0xff] (!%p112_p2)   ;;  %v724_v11 = vld [vmem:[%s891_s1 + $0x10] sm:$0xff] (!%p112_p2)   ;;  %v219_v39 = vunpack.c.0.s8 (!%p112_p2), %v218_v35 }
   0x9   : > { %683 = vmatpush3.bf16.msra.mxu1 (!%p112_p2), %v716_v3  ;;  %662 = vmatprep.subr.bf16.mxu0 (!%p112_p2), %v717_v4  ;;  %v725_v12 = vld [vmem:[%s891_s1 + $0xd8] sm:$0xff] (!%p112_p2)   ;;  %v729_v16 = vld [vmem:[%s891_s1 + $0xe0] sm:$0xff] (!%p112_p2)   ;;  %v733_v20 = vld [vmem:[%s891_s1 + $0xe8] sm:$0xff] (!%p112_p2)  }
   0xa   : > { %684 = vmatprep.subr.bf16.mxu1 (!%p112_p2), %v718_v5  ;;  %v726_v13 = vld [vmem:[%s891_s1 + $0x58] sm:$0xff] (!%p112_p2)   ;;  %v730_v17 = vld [vmem:[%s891_s1 + $0x60] sm:$0xff] (!%p112_p2)   ;;  %v734_v21 = vld [vmem:[%s891_s1 + $0x68] sm:$0xff] (!%p112_p2)   ;;  %v222_v41 = vsub.s32 (!%p112_p2), %v219_v39, %v221_v36 }
   0xb   : > { %v727_v14 = vld [vmem:[%s891_s1 + $0x98] sm:$0xff] (!%p112_p2)   ;;  %v731_v18 = vld [vmem:[%s891_s1 + $0xa0] sm:$0xff] (!%p112_p2)   ;;  %v735_v22 = vld [vmem:[%s891_s1 + $0xa8] sm:$0xff] (!%p112_p2)  }
   0xc   : > { %663 = vmatpush3.bf16.msra.mxu0 (!%p112_p2), %v719_v6  ;;  %v728_v15 = vld [vmem:[%s891_s1 + $0x18] sm:$0xff] (!%p112_p2)   ;;  %v732_v19 = vld [vmem:[%s891_s1 + $0x20] sm:$0xff] (!%p112_p2)   ;;  %v736_v23 = vld [vmem:[%s891_s1 + $0x28] sm:$0xff] (!%p112_p2)  }
   0xd   : > { %685 = vmatpush3.bf16.msra.mxu1 %v720_v7  ;;  %664 = vmatprep.subr.bf16.mxu0 %v721_v8  ;;  %s894_s10 = smov (!%p131_p3, %s584_s10), 1  ;;  %v737_v24 = vld [vmem:[%s891_s1 + $0xf0] sm:$0xff]   ;;  %v741_v28 = vld [vmem:[%s891_s1 + $0xf8] sm:$0xff]  }
   0xe   : > { %686 = vmatprep.subr.bf16.mxu1 %v722_v9  ;;  %v738_v25 = vld [vmem:[%s891_s1 + $0x70] sm:$0xff]   ;;  %s589_s13 = sshll.u32 %s894_s10, 2  ;;  %v742_v29 = vld [vmem:[%s891_s1 + $0x78] sm:$0xff]   ;;  %s590_s27 = sshll.u32 %s894_s10, 1 }
   0xf   : > { %v739_v26 = vld [vmem:[%s891_s1 + $0xb0] sm:$0xff]   ;;  %s134_s22 = scalar_lea.vmem %s890_s0, %s589_s13  ;;  %v743_v31 = vld [vmem:[%s891_s1 + $0xb8] sm:$0xff]   ;;  %s138_s30 = scalar_lea.vmem %s892_s2, %s590_s27 }
  0x10   : > { %665 = vmatpush3.bf16.msra.mxu0 %v723_v10  ;;  %v740_v27 = vld [vmem:[%s891_s1 + $0x30] sm:$0xff]   ;;  %v744_v32 = vld [vmem:[%s891_s1 + $0x38] sm:$0xff]   ;;  %v624_v33 = vld.sshfl [vmem:[%s134_s22 + $0x2] sm:$0x11 pattern:$0x75316420] }
  0x11   : > { %687 = vmatpush3.bf16.msra.mxu1 %v724_v11  ;;  %666 = vmatprep.subr.bf16.mxu0 %v725_v12  ;;  %v641_v37 = vld.sshfl [vmem:[%s134_s22] sm:$0x11 pattern:$0x75316420]  ;;  %v216_v38 = vcombine.high %v624_v33, %v624_v33  ;;  %v223_v44 = vrot.slane %v624_v33, %v222_v41 }
  0x12   : > { %688 = vmatprep.subr.bf16.mxu1 %v726_v13  ;;  %v377_v40 = vcombine.high %v641_v37, %v641_v37  ;;  %v384_v45 = vrot.slane %v641_v37, %v222_v41 }
  0x13   : > { %v230_v42 = vrot.slane %v216_v38, %v222_v41 }
  0x14   : > { %667 = vmatpush3.bf16.msra.mxu0 %v727_v14  ;;  %v391_v43 = vrot.slane %v377_v40, %v222_v41 }
  0x15   : > { %689 = vmatpush3.bf16.msra.mxu1 %v728_v15  ;;  %668 = vmatprep.subr.bf16.mxu0 %v729_v16 }
  0x16   : > { %690 = vmatprep.subr.bf16.mxu1 %v730_v17  ;;  %361 = vmatprep.mubr.bf16.mxu0 %v230_v42 }
  0x17   : > { %522 = vmatprep.mubr.bf16.mxu1 %v391_v43 }
  0x18   : > { %669 = vmatpush3.bf16.msra.mxu0 %v731_v18 }
  0x19   : > { %691 = vmatpush3.bf16.msra.mxu1 %v732_v19  ;;  %670 = vmatprep.subr.bf16.mxu0 %v733_v20 }
  0x1a   : > { %692 = vmatprep.subr.bf16.mxu1 %v734_v21 }
  0x1c   : > { %671 = vmatpush3.bf16.msra.mxu0 %v735_v22 }
  0x1d   : > { %693 = vmatpush3.bf16.msra.mxu1 %v736_v23  ;;  %672 = vmatprep.subr.bf16.mxu0 %v737_v24 }
  0x1e   : > { %694 = vmatprep.subr.bf16.mxu1 %v738_v25 }
  0x20   : > { %673 = vmatpush3.bf16.msra.mxu0 %v739_v26 }
  0x21   : > { %695 = vmatpush3.bf16.msra.mxu1 %v740_v27  ;;  %674 = vmatprep.subr.bf16.mxu0 %v741_v28 }
  0x22   : > { %696 = vmatprep.subr.bf16.mxu1 %v742_v29 }
  0x24   : > { %675 = vmatpush3.bf16.msra.mxu0 %v743_v31 }
  0x25   : > { %697 = vmatpush3.bf16.msra.mxu1 %v744_v32 }
  0x27   : > { %362 = vmatmul.mubr.bf16.vlgmr.msra.gmra.mrb[0].mxu0 %v223_v44 }
  0x28   : > { %523 = vmatmul.mubr.bf16.vlgmr.msra.gmra.mrb[0].mxu1 %v384_v45 }
  0xfa   : > { %v676_v46 = vpop.f32.mrb[0].mxu0 }
  0xfb   : > { %v698_v47 = vpop.f32.mrb[0].mxu1  ;;  %v677_v48 = vpop.f32.mrb[1].mxu0 }
  0xfc   : > { %v699_v49 = vpop.f32.mrb[1].mxu1  ;;  %v678_v50 = vadd.f32 %v677_v48, %v676_v46  ;;  %v679_v52 = vpop.f32.mrb[2].mxu0 }
  0xfd   : > { %v700_v51 = vadd.f32 %v699_v49, %v698_v47  ;;  %v701_v53 = vpop.f32.mrb[2].mxu1  ;;  %v680_v54 = vpop.f32.mrb[3].mxu0 }
  0xfe   : > { %v702_v55 = vpop.f32.mrb[3].mxu1 }
  0xff   : > { %v525_v56 = vadd.f32 %v700_v51, %v678_v50 }
 0x101   : > { %530 = vst [vmem:[%s138_s30] sm:$0x3] %v525_v56 }
 0x102 PF: > { %s12_s9 = sadd.s32 1, %s751_s9  }
 0x103   : > { %p9_p4 = scmp.ge.s32.totalorder %s12_s9, 4  }
 0x105   :  { %11 = sbr.rel (!%p9_p4) target bundleno = 1 (0x1), region = 60 }

</bundles_post_ra>
